<compile_context>
chip_gen: v7x
topology: tpu7x:2x2x1
jax: 0.10.0
libtpu: 0.0.40
codegen_flags: <defaults>
</compile_context>

<pallas_src>
import functools

import jax
import jax.numpy as jnp
from jax.experimental import pallas as pl
from jax.experimental.pallas import tpu as pltpu


def _round_up(x, m):
    return (x + m - 1) // m * m


def _vmem_limit(block_bytes):
    # Explicit per-call VMEM budget (scoped defaults are 16/32/32 MiB on
    # v5e/v6e/v7x).  Keep <= 56 MiB so the config also fits v7x's 64 MiB/TC.
    return int(min(max(2 * block_bytes, 32 << 20), 56 << 20))


# ----------------------------------------------------------------------------
# Pallas GEMM kernel:  out = act(A @ W + bias [+ residual])
#   A:[M,K] bf16, W:[K,N] bf16, bias:[1,N] f32, residual:[M,N] bf16 (optional)
#   f32 accumulator in VMEM scratch, epilogue fused on the last K step.
# ----------------------------------------------------------------------------
def _gemm_kernel(*refs, relu, has_res):
    if has_res:
        a_ref, w_ref, b_ref, r_ref, o_ref, acc_ref = refs
    else:
        a_ref, w_ref, b_ref, o_ref, acc_ref = refs

    k = pl.program_id(2)

    @pl.when(k == 0)
    def _():
        acc_ref[...] = jnp.zeros_like(acc_ref)

    acc_ref[...] += jnp.dot(a_ref[...], w_ref[...],
                            preferred_element_type=jnp.float32)

    @pl.when(k == pl.num_programs(2) - 1)
    def _():
        r = acc_ref[...] + b_ref[...].astype(jnp.float32)
        if has_res:
            r = r + r_ref[...].astype(jnp.float32)
        if relu:
            r = jnp.maximum(r, 0.0)
        o_ref[...] = r.astype(o_ref.dtype)


def _pick_tk(K):
    for cand in (2048, 1024, 512, 384, 256, 128):
        if K % cand == 0:
            return cand
    return K          # small / odd K (64, 147): single full-K step


def _pick_tn(N):
    if N % 256 == 0:      # fill the 256-wide MXU on v6e/v7x
        return 256
    if N % 128 == 0:
        return 128
    return N              # full-dim block (e.g. 64-channel layer1)


def gemm_bias_act(a, w, b, residual=None, relu=True, out_dtype=jnp.bfloat16):
    """act(a @ w + b [+ residual]).  a:[M,K], w:[K,N], b:[N], residual:[M,N]."""
    M, K = a.shape
    N = w.shape[1]

    # Tiny problems (global-pool branch, classifier heads): plain XLA dot.
    # A stays bf16 (the large operand), accumulation in f32.
    if M < 64 or N < 64:
        r = jnp.dot(a.astype(jnp.bfloat16), w.astype(jnp.bfloat16),
                    preferred_element_type=jnp.float32) + b.astype(jnp.float32)
        if residual is not None:
            r = r + residual.astype(jnp.float32)
        if relu:
            r = jnp.maximum(r, 0.0)
        return r.astype(out_dtype)

    a = a.astype(jnp.bfloat16)
    w = w.astype(jnp.bfloat16)
    b2 = b.reshape(1, N).astype(jnp.float32)

    tn = _pick_tn(N)
    tk = _pick_tk(K)
    # Bigger M tiles -> the W tile is re-streamed fewer times; a ragged last M
    # tile is handled by the pl.cdiv grid (no whole-matrix jnp.pad copy).
    if M >= 1024:
        tm = 1024
    elif M >= 512:
        tm = 512
    else:
        tm = _round_up(M, 8)

    in_specs = [
        pl.BlockSpec((tm, tk), lambda i, j, k: (i, k)),
        pl.BlockSpec((tk, tn), lambda i, j, k: (k, j)),
        pl.BlockSpec((1, tn), lambda i, j, k: (0, j)),
    ]
    operands = [a, w, b2]
    has_res = residual is not None
    if has_res:
        in_specs.append(pl.BlockSpec((tm, tn), lambda i, j, k: (i, j)))
        operands.append(residual.astype(jnp.bfloat16))

    block_bytes = (2 * (tm * tk + tk * tn + tm * tn + (tm * tn if has_res else 0)) * 2
                   + tm * tn * 4 + tn * 8)
    flops = 2 * M * N * K
    bytes_accessed = (M * K + K * N + M * N + (M * N if has_res else 0)) * 2 + N * 4

    return pl.pallas_call(
        functools.partial(_gemm_kernel, relu=relu, has_res=has_res),
        out_shape=jax.ShapeDtypeStruct((M, N), out_dtype),
        grid_spec=pltpu.PrefetchScalarGridSpec(
            num_scalar_prefetch=0,
            grid=(pl.cdiv(M, tm), N // tn, K // tk),
            in_specs=in_specs,
            out_specs=pl.BlockSpec((tm, tn), lambda i, j, k: (i, j)),
            scratch_shapes=[pltpu.VMEM((tm, tn), jnp.float32)],
        ),
        compiler_params=pltpu.CompilerParams(
            dimension_semantics=("parallel", "parallel", "arbitrary"),
            vmem_limit_bytes=_vmem_limit(block_bytes)),
        cost_estimate=pl.CostEstimate(flops=flops, transcendentals=0,
                                      bytes_accessed=bytes_accessed),
    )(*operands)


# ----------------------------------------------------------------------------
# Direct 3x3 (dilated) stride-1 conv kernel — NO materialized im2col.
#   Grid (batch, Cout tiles, Cin tiles); per step the kernel slices the padded
#   spatial block 9 times (one per tap, static offsets) and accumulates
#   9 shifted GEMMs into one f32 VMEM scratch.  Bias + ReLU fused in epilogue.
# ----------------------------------------------------------------------------
def _conv_tap_kernel(x_ref, w_ref, b_ref, o_ref, acc_ref, *, kh, kw, dil, H, W, relu):
    kc = pl.program_id(2)

    @pl.when(kc == 0)
    def _():
        acc_ref[...] = jnp.zeros_like(acc_ref)

    ck = x_ref.shape[-1]
    partial = None
    for t in range(kh * kw):           # unrolled static tap loop -> static slices
        i, j = divmod(t, kw)
        a = x_ref[0, i * dil:i * dil + H, j * dil:j * dil + W, :]
        a = a.reshape(H * W, ck)
        d = jnp.dot(a, w_ref[t], preferred_element_type=jnp.float32)
        partial = d if partial is None else partial + d
    acc_ref[...] += partial

    @pl.when(kc == pl.num_programs(2) - 1)
    def _():
        r = acc_ref[...] + b_ref[...].astype(jnp.float32)
        if relu:
            r = jnp.maximum(r, 0.0)
        o_ref[...] = r.reshape(o_ref.shape).astype(o_ref.dtype)


@functools.partial(jax.jit, static_argnames=("dilation", "relu"))
def conv3x3_direct(x, w, b, *, dilation=1, relu=True):
    """3x3 stride-1 conv with padding == dilation, NHWC in / NHWC out (bf16)."""
    n, H, W, cin = x.shape
    kh, kw, _, cout = w.shape
    d = dilation
    xp = jnp.pad(x.astype(jnp.bfloat16), ((0, 0), (d, d), (d, d), (0, 0)))
    Hp, Wp = H + 2 * d, W + 2 * d
    w3 = w.reshape(kh * kw, cin, cout).astype(jnp.bfloat16)
    b2 = b.reshape(1, cout).astype(jnp.float32)

    ck = cin if cin <= 512 else 512            # cin in {64,256,512,1024,2048}
    tn = 256 if cout % 256 == 0 else (128 if cout % 128 == 0 else cout)

    block_bytes = (2 * (Hp * Wp * ck + kh * kw * ck * tn + H * W * tn) * 2
                   + H * W * tn * 4 + tn * 8)
    flops = 2 * n * H * W * cout * cin * kh * kw
    bytes_accessed = (n * Hp * Wp * cin + kh * kw * cin * cout + n * H * W * cout) * 2

    return pl.pallas_call(
        functools.partial(_conv_tap_kernel, kh=kh, kw=kw, dil=d, H=H, W=W, relu=relu),
        out_shape=jax.ShapeDtypeStruct((n, H, W, cout), jnp.bfloat16),
        grid_spec=pltpu.PrefetchScalarGridSpec(
            num_scalar_prefetch=0,
            grid=(n, cout // tn, cin // ck),
            in_specs=[
                pl.BlockSpec((1, Hp, Wp, ck), lambda nn, jc, kc: (nn, 0, 0, kc)),
                pl.BlockSpec((kh * kw, ck, tn), lambda nn, jc, kc: (0, kc, jc)),
                pl.BlockSpec((1, tn), lambda nn, jc, kc: (0, jc)),
            ],
            out_specs=pl.BlockSpec((1, H, W, tn), lambda nn, jc, kc: (nn, 0, 0, jc)),
            scratch_shapes=[pltpu.VMEM((H * W, tn), jnp.float32)],
        ),
        compiler_params=pltpu.CompilerParams(
            dimension_semantics=("parallel", "parallel", "arbitrary"),
            vmem_limit_bytes=_vmem_limit(block_bytes)),
        cost_estimate=pl.CostEstimate(flops=flops, transcendentals=0,
                                      bytes_accessed=bytes_accessed),
    )(xp, w3, b2)


# ----------------------------------------------------------------------------
# Conv glue: 1x1 convs go straight to the GEMM; remaining kxk convs (stem 7x7/2,
# layer2.0 3x3/2) use small bf16 im2col.
# ----------------------------------------------------------------------------
def _im2col(x, kh, kw, stride, padding, dilation):
    n, h, w, c = x.shape
    ho = (h + 2 * padding - dilation * (kh - 1) - 1) // stride + 1
    wo = (w + 2 * padding - dilation * (kw - 1) - 1) // stride + 1
    xp = jnp.pad(x, ((0, 0), (padding, padding), (padding, padding), (0, 0)))
    cols = []
    for i in range(kh):
        for j in range(kw):
            hi, wj = i * dilation, j * dilation
            patch = jax.lax.slice(
                xp,
                (0, hi, wj, 0),
                (n, hi + (ho - 1) * stride + 1, wj + (wo - 1) * stride + 1, c),
                (1, stride, stride, 1))
            cols.append(patch)
    cols = jnp.stack(cols, axis=3)                      # (n, ho, wo, kh*kw, c)
    return cols.reshape(n * ho * wo, kh * kw * c), (n, ho, wo)


@functools.partial(jax.jit, static_argnames=("stride", "padding", "dilation",
                                             "relu", "out_dtype"))
def conv2d(x, w, b, residual=None, *, stride=1, padding=0, dilation=1,
           relu=True, out_dtype=jnp.bfloat16):
    """x: NHWC, w: (kh,kw,Cin,Cout), b: (Cout,), residual fused in GEMM epilogue."""
    kh, kw, cin, cout = w.shape
    if kh == 1 and kw == 1 and padding == 0:
        if stride != 1:                        # 1x1 stride-s conv == subsample + 1x1
            x = x[:, ::stride, ::stride, :]
        n, ho, wo, _ = x.shape
        a = x.reshape(n * ho * wo, cin)
    else:
        a, (n, ho, wo) = _im2col(x.astype(jnp.bfloat16), kh, kw,
                                 stride, padding, dilation)
    res2 = None
    if residual is not None:
        res2 = residual.reshape(-1, residual.shape[-1])
    out = gemm_bias_act(a, w.reshape(kh * kw * cin, cout), b,
                        residual=res2, relu=relu, out_dtype=out_dtype)
    return out.reshape(n, ho, wo, cout)


@jax.jit
def max_pool_3x3_s2_p1(x):
    """MaxPool2d(kernel=3, stride=2, padding=1)  (plain-JAX glue)."""
    n, h, w, c = x.shape
    ho = (h + 2 - 3) // 2 + 1
    wo = (w + 2 - 3) // 2 + 1
    xp = jnp.pad(x, ((0, 0), (1, 1), (1, 1), (0, 0)),
                 constant_values=-jnp.inf)
    out = None
    for i in range(3):
        for j in range(3):
            patch = jax.lax.slice(
                xp, (0, i, j, 0),
                (n, i + (ho - 1) * 2 + 1, j + (wo - 1) * 2 + 1, c),
                (1, 2, 2, 1))
            out = patch if out is None else jnp.maximum(out, patch)
    return out


# ----------------------------------------------------------------------------
# Deterministic synthetic parameters (DeepLabV3 / ResNet-101 shapes)
# ----------------------------------------------------------------------------
class ParamGen:
    def __init__(self, key):
        self.key = key
        self.count = 0

    def _next(self):
        self.count += 1
        return jax.random.fold_in(self.key, self.count)

    def conv(self, kh, kw, cin, cout, bias=False):
        fan_in = kh * kw * cin
        std = (2.0 / fan_in) ** 0.5
        w = std * jax.random.normal(self._next(), (kh, kw, cin, cout), jnp.float32)
        b = (0.01 * jax.random.normal(self._next(), (cout,), jnp.float32)
             if bias else None)
        return w, b

    def bn(self, c):
        gamma = 1.0 + 0.05 * jax.random.normal(self._next(), (c,), jnp.float32)
        beta = 0.05 * jax.random.normal(self._next(), (c,), jnp.float32)
        mean = 0.05 * jax.random.normal(self._next(), (c,), jnp.float32)
        var = 1.0 + 0.05 * jax.random.normal(self._next(), (c,), jnp.float32) ** 2
        return gamma, beta, mean, var


def fold_bn(w, b, bn, eps=1e-5):
    """Fold (conv, BatchNorm[eval]) into a single conv weight (bf16) / bias (f32)."""
    gamma, beta, mean, var = bn
    scale = gamma / jnp.sqrt(var + eps)
    w_f = (w * scale).astype(jnp.bfloat16)             # broadcast over Cout
    b0 = b if b is not None else jnp.zeros_like(mean)
    b_f = (b0 - mean) * scale + beta
    return w_f, b_f


def _make_bottleneck(pg, inplanes, planes, stride, dilation, downsample):
    width = planes
    blk = {}
    w, _ = pg.conv(1, 1, inplanes, width)
    blk["conv1"] = fold_bn(w, None, pg.bn(width))
    w, _ = pg.conv(3, 3, width, width)
    blk["conv2"] = fold_bn(w, None, pg.bn(width))
    blk["conv2_stride"] = stride
    blk["conv2_dilation"] = dilation
    w, _ = pg.conv(1, 1, width, planes * 4)
    blk["conv3"] = fold_bn(w, None, pg.bn(planes * 4))
    if downsample:
        w, _ = pg.conv(1, 1, inplanes, planes * 4)
        blk["down"] = fold_bn(w, None, pg.bn(planes * 4))
        blk["down_stride"] = stride
    else:
        blk["down"] = None
    return blk


def _make_layer(pg, state, planes, blocks, stride, dilate):
    inplanes, dilation = state["inplanes"], state["dilation"]
    previous_dilation = dilation
    if dilate:
        dilation *= stride
        stride = 1
    layer = []
    downsample = (stride != 1) or (inplanes != planes * 4)
    layer.append(_make_bottleneck(pg, inplanes, planes, stride,
                                  previous_dilation, downsample))
    inplanes = planes * 4
    for _ in range(1, blocks):
        layer.append(_make_bottleneck(pg, inplanes, planes, 1, dilation, False))
    state["inplanes"], state["dilation"] = inplanes, dilation
    return layer


def make_params(num_classes, key):
    pg = ParamGen(key)
    p = {}
    # ResNet-101 backbone, replace_stride_with_dilation = [False, True, True]
    w, _ = pg.conv(7, 7, 3, 64)
    p["stem"] = fold_bn(w, None, pg.bn(64))
    state = {"inplanes": 64, "dilation": 1}
    p["layer1"] = _make_layer(pg, state, 64, 3, 1, False)
    p["layer2"] = _make_layer(pg, state, 128, 4, 2, False)
    p["layer3"] = _make_layer(pg, state, 256, 23, 2, True)
    p["layer4"] = _make_layer(pg, state, 512, 3, 2, True)
    # DeepLabHead: ASPP(2048, [12, 24, 36]) + 3x3 conv + replaced 1x1 conv
    w, _ = pg.conv(1, 1, 2048, 256); p["aspp_b0"] = fold_bn(w, None, pg.bn(256))
    for name in ("aspp_b1", "aspp_b2", "aspp_b3"):
        w, _ = pg.conv(3, 3, 2048, 256); p[name] = fold_bn(w, None, pg.bn(256))
    w, _ = pg.conv(1, 1, 2048, 256); p["aspp_pool"] = fold_bn(w, None, pg.bn(256))
    w, _ = pg.conv(1, 1, 1280, 256); p["aspp_proj"] = fold_bn(w, None, pg.bn(256))
    w, _ = pg.conv(3, 3, 256, 256); p["head_conv"] = fold_bn(w, None, pg.bn(256))
    p["cls_w"], p["cls_b"] = pg.conv(1, 1, 256, num_classes, bias=True)
    # Aux FCNHead on layer3 features (kept at 21 classes like torchvision)
    w, _ = pg.conv(3, 3, 1024, 256); p["aux_conv"] = fold_bn(w, None, pg.bn(256))
    p["aux_w"], p["aux_b"] = pg.conv(1, 1, 256, 21, bias=True)
    return p


# ----------------------------------------------------------------------------
# Forward pass
# ----------------------------------------------------------------------------
def _cba(x, layer, stride=1, padding=0, dilation=1, relu=True, residual=None):
    w, b = layer
    kh, kw = w.shape[0], w.shape[1]
    # All 3x3 stride-1 convs in this net have padding == dilation -> direct tap kernel.
    if (kh == 3 and kw == 3 and stride == 1 and padding == dilation
            and residual is None):
        return conv3x3_direct(x, w, b, dilation=dilation, relu=relu)
    return conv2d(x, w, b, residual, stride=stride, padding=padding,
                  dilation=dilation, relu=relu)


def _bottleneck(x, blk):
    if blk["down"] is not None:
        identity = _cba(x, blk["down"], stride=blk["down_stride"], relu=False)
    else:
        identity = x
    out = _cba(x, blk["conv1"])
    out = _cba(out, blk["conv2"], stride=blk["conv2_stride"],
               padding=blk["conv2_dilation"], dilation=blk["conv2_dilation"])
    # residual add + ReLU fused into the conv3 GEMM epilogue (no extra kernel)
    out = _cba(out, blk["conv3"], relu=True, residual=identity)
    return out


def custom_deeplabv3plus_forward(params, x_nchw):
    x = jnp.transpose(x_nchw, (0, 2, 3, 1)).astype(jnp.float32)   # NCHW -> NHWC
    in_h, in_w = x.shape[1], x.shape[2]

    # ---- backbone (ResNet-101, output stride 8) ----
    y = _cba(x, params["stem"], stride=2, padding=3)
    y = max_pool_3x3_s2_p1(y)
    for blk in params["layer1"]:
        y = _bottleneck(y, blk)
    for blk in params["layer2"]:
        y = _bottleneck(y, blk)
    for blk in params["layer3"]:
        y = _bottleneck(y, blk)
    aux_feat = y
    for blk in params["layer4"]:
        y = _bottleneck(y, blk)

    # ---- DeepLabHead / ASPP ----
    h, w = y.shape[1], y.shape[2]
    b0 = _cba(y, params["aspp_b0"])
    b1 = _cba(y, params["aspp_b1"], padding=12, dilation=12)
    b2 = _cba(y, params["aspp_b2"], padding=24, dilation=24)
    b3 = _cba(y, params["aspp_b3"], padding=36, dilation=36)

    # Global-pool branch folded into the projection GEMM epilogue: b4 is
    # spatially constant, so its contribution through the 1x1 projection is a
    # per-sample 256-vector added (before the ReLU) as the fused residual.
    # The concat is therefore only 1024 channels (single clean K step).
    pooled = jnp.mean(y.astype(jnp.float32), axis=(1, 2), keepdims=True)  # AdaptiveAvgPool2d(1)
    b4 = _cba(pooled, params["aspp_pool"])              # (N,1,1,256), tiny-GEMM path
    wp, bp = params["aspp_proj"]                        # (1,1,1280,256), (256,)
    w_main = wp[:, :, :1024, :]
    w_tail = wp[0, 0, 1024:, :].astype(jnp.float32)     # (256, 256)
    c4 = jnp.dot(b4.reshape(b4.shape[0], 256).astype(jnp.float32), w_tail)  # (N,256)
    res = jnp.broadcast_to(c4[:, None, None, :],
                           (b0.shape[0], h, w, 256)).astype(jnp.bfloat16)
    cat = jnp.concatenate([b0, b1, b2, b3], axis=-1)    # (N, h, w, 1024)
    proj = conv2d(cat, w_main, bp, res, relu=True)      # Dropout(0.5): eval identity
    head = _cba(proj, params["head_conv"], padding=1, dilation=1)
    logits = conv2d(head, params["cls_w"], params["cls_b"],
                    relu=False, out_dtype=jnp.float32)  # Cout=num_classes -> jnp.dot path

    # ---- Aux FCNHead ----
    a = _cba(aux_feat, params["aux_conv"], padding=1)   # Dropout(0.1): eval identity
    aux_logits = conv2d(a, params["aux_w"], params["aux_b"],
                        relu=False, out_dtype=jnp.float32)

    # ---- bilinear upsample to input resolution (align_corners=False) ----
    out = jax.image.resize(logits, (logits.shape[0], in_h, in_w, logits.shape[3]),
                           method="bilinear")
    aux = jax.image.resize(aux_logits, (aux_logits.shape[0], in_h, in_w,
                                        aux_logits.shape[3]), method="bilinear")
    return {
        "out": jnp.transpose(out, (0, 3, 1, 2)),    # back to NCHW
        "aux": jnp.transpose(aux, (0, 3, 1, 2)),
    }


# ----------------------------------------------------------------------------
if __name__ == "__main__":
    key = jax.random.PRNGKey(0)
    num_classes = 5

    params = make_params(num_classes, key)
    x = jax.random.normal(jax.random.fold_in(key, 987654),
                          (2, 3, 64, 64), jnp.float32)          # NCHW like PyTorch

    result = custom_deeplabv3plus_forward(params, x)
    result = jax.block_until_ready(result)

    assert result["out"].shape == (2, num_classes, 64, 64)
    assert result["aux"].shape == (2, 21, 64, 64)
    assert bool(jnp.isfinite(result["out"]).all())
    assert bool(jnp.isfinite(result["aux"]).all())
    print("KERNEL_OK")
</pallas_src>

<mosaic_0001>
module attributes {stable_mosaic.version = 11 : i64} {
  func.func @_gemm_kernel(%arg0: i32, %arg1: i32, %arg2: i32, %arg3: memref<1024x147xbf16, #tpu.memory_space<vmem>>, %arg4: memref<147x64xbf16, #tpu.memory_space<vmem>>, %arg5: memref<1x64xf32, #tpu.memory_space<vmem>>, %arg6: memref<1024x64xbf16, #tpu.memory_space<vmem>>, %arg7: memref<1024x64xf32, #tpu.memory_space<vmem>>) attributes {dimension_semantics = [#tpu.dimension_semantics<parallel>, #tpu.dimension_semantics<parallel>, #tpu.dimension_semantics<arbitrary>], iteration_bounds = array<i64: 2, 1, 1>, scalar_prefetch = 0 : i64, scratch_operands = 1 : i64, tpu.core_type = #tpu.core_type<tc>, window_params = [{transform_indices = @transform_0, window_bounds = array<i64: 1024, 147>}, {transform_indices = @transform_1, window_bounds = array<i64: 147, 64>}, {transform_indices = @transform_2, window_bounds = array<i64: 1, 64>}, {transform_indices = @transform_3, window_bounds = array<i64: 1024, 64>}]} {
    %c0_i32 = arith.constant 0 : i32
    %0 = arith.cmpi eq, %arg2, %c0_i32 : i32
    %1 = arith.extui %0 : i1 to i32
    %c0_i32_0 = arith.constant 0 : i32
    %2 = arith.cmpi ne, %1, %c0_i32_0 : i32
    scf.if %2 {
      %cst_10 = arith.constant 0.000000e+00 : f32
      %12 = vector.broadcast %cst_10 : f32 to vector<1024x64xf32>
      %c0_11 = arith.constant 0 : index
      %c0_12 = arith.constant 0 : index
      %13 = vector.load %arg7[%c0_11, %c0_12] : memref<1024x64xf32, #tpu.memory_space<vmem>>, vector<1024x64xf32>
      tpu.vector_store %arg7[%c0_11, %c0_12], %12 {strides = array<i32>} : memref<1024x64xf32, #tpu.memory_space<vmem>>, vector<1024x64xf32>,
    } else {
    }
    %c0 = arith.constant 0 : index
    %c0_1 = arith.constant 0 : index
    %3 = vector.load %arg7[%c0, %c0_1] : memref<1024x64xf32, #tpu.memory_space<vmem>>, vector<1024x64xf32>
    %c0_2 = arith.constant 0 : index
    %c0_3 = arith.constant 0 : index
    %4 = vector.load %arg3[%c0_2, %c0_3] : memref<1024x147xbf16, #tpu.memory_space<vmem>>, vector<1024x147xbf16>
    %c0_4 = arith.constant 0 : index
    %c0_5 = arith.constant 0 : index
    %5 = vector.load %arg4[%c0_4, %c0_5] : memref<147x64xbf16, #tpu.memory_space<vmem>>, vector<147x64xbf16>
    %cst = arith.constant dense<0.000000e+00> : vector<1024x64xf32>
    %6 = tpu.matmul %4, %5, %cst {dimension_numbers = #tpu.dot_dimension_numbers<[1], [0], [0], [1], [0, 0, 1, 1], [], []>} : vector<1024x147xbf16>, vector<147x64xbf16>, vector<1024x64xf32> -> vector<1024x64xf32>
    %7 = arith.addf %3, %6 : vector<1024x64xf32>
    %c0_6 = arith.constant 0 : index
    %c0_7 = arith.constant 0 : index
    %8 = vector.load %arg7[%c0_6, %c0_7] : memref<1024x64xf32, #tpu.memory_space<vmem>>, vector<1024x64xf32>
    tpu.vector_store %arg7[%c0_6, %c0_7], %7 {strides = array<i32>} : memref<1024x64xf32, #tpu.memory_space<vmem>>, vector<1024x64xf32>,
    %c0_i32_8 = arith.constant 0 : i32
    %9 = arith.cmpi eq, %arg2, %c0_i32_8 : i32
    %10 = arith.extui %9 : i1 to i32
    %c0_i32_9 = arith.constant 0 : i32
    %11 = arith.cmpi ne, %10, %c0_i32_9 : i32
    scf.if %11 {
      %c0_10 = arith.constant 0 : index
      %c0_11 = arith.constant 0 : index
      %12 = vector.load %arg7[%c0_10, %c0_11] : memref<1024x64xf32, #tpu.memory_space<vmem>>, vector<1024x64xf32>
      %c0_12 = arith.constant 0 : index
      %c0_13 = arith.constant 0 : index
      %13 = vector.load %arg5[%c0_12, %c0_13] : memref<1x64xf32, #tpu.memory_space<vmem>>, vector<1x64xf32>
      %14 = vector.broadcast %13 : vector<1x64xf32> to vector<1024x64xf32>
      %15 = arith.addf %12, %14 : vector<1024x64xf32>
      %cst_14 = arith.constant 0.000000e+00 : f32
      %16 = vector.broadcast %cst_14 : f32 to vector<1024x64xf32>
      %17 = arith.maximumf %15, %16 : vector<1024x64xf32>
      %18 = arith.truncf %17 : vector<1024x64xf32> to vector<1024x64xbf16>
      %c0_15 = arith.constant 0 : index
      %c0_16 = arith.constant 0 : index
      %19 = vector.load %arg6[%c0_15, %c0_16] : memref<1024x64xbf16, #tpu.memory_space<vmem>>, vector<1024x64xbf16>
      tpu.vector_store %arg6[%c0_15, %c0_16], %18 {strides = array<i32>} : memref<1024x64xbf16, #tpu.memory_space<vmem>>, vector<1024x64xbf16>,
    } else {
    }
    return
  }
  func.func @transform_0(%arg0: i32, %arg1: i32, %arg2: i32) -> (i32, i32) {
    %c0_i32 = arith.constant 0 : i32
    return %arg0, %arg2 : i32, i32
  }
  func.func @transform_1(%arg0: i32, %arg1: i32, %arg2: i32) -> (i32, i32) {
    %c0_i32 = arith.constant 0 : i32
    return %arg2, %arg1 : i32, i32
  }
  func.func @transform_2(%arg0: i32, %arg1: i32, %arg2: i32) -> (i32, i32) {
    %c0_i32 = arith.constant 0 : i32
    %c0_i32_0 = arith.constant 0 : i32
    return %c0_i32, %arg1 : i32, i32
  }
  func.func @transform_3(%arg0: i32, %arg1: i32, %arg2: i32) -> (i32, i32) {
    %c0_i32 = arith.constant 0 : i32
    return %arg0, %arg1 : i32, i32
  }
}

</mosaic_0001>

<bundles_post_ra>
// kernel: conv2d.1
= control target key start
LH: loop header
LB: loop body
LE: loop exit
PB: predicated region body
PF: predicated region fallthrough
CT: control target
= control target key end

     0   :  { %8 = vsyncpa [#allocation4], 0  ;;  %s5468_s0 = inlined_call_operand.vmem [shape: bf16[2048,147], index: 0, kind: input, shape index: {}]   ;;  %s5469_s1 = inlined_call_operand.vmem [shape: bf16[147,64], index: 1, kind: input, shape index: {}]   ;;  %s5470_s2 = inlined_call_operand.vmem [shape: f32[1,64], index: 2, kind: input, shape index: {}]   ;;  %s5471_s3 = inlined_call_operand.hbm [shape: bf16[2048,64], index: 3, kind: output, shape index: {}]  }
   0x1   :  { %10 = vsyncpa [#allocation4 + $0x1], 0  ;;  %s4331_s12 = smov 0   ;;  %s4333_s13 = smov 0  }
   0x2   :  { %s4335_s14 = smov 0   ;;  %s4337_s15 = smov 0  }
   0x3   :  { %s4339_s16 = smov 0   ;;  %s4341_s17 = smov 0  }
   0x4 LB: > { %s3464_s18 = sadd.s32 4294967295, %s4303_s17   ;;  %s3465_s19 = sadd.s32 4294967294, %s4303_s17   ;;  %s4303_s17 = sphi %s4341_s17, %s16_s17   ;;  %s4299_s16 = sphi %s4339_s16, %s5478_s16   ;;  %s4295_s15 = sphi %s4337_s15, %s5477_s15   ;;  %s4291_s14 = sphi %s4335_s14, %s5476_s14   ;;  %s4287_s13 = sphi %s4333_s13, %s5475_s13   ;;  %s4283_s12 = sphi %s4331_s12, %s5474_s12  }
   0x5   : > { %s35_s20 = sadd.s32 1, %s4299_s16  ;;  %s126_s21 = sadd.s32 1, %s4291_s14 }
   0x6   : > { %p37_p0 = scmp.ge.s32.totalorder %s35_s20, 2  ;;  %p136_p1 = scmp.ne.s32.totalorder %s4291_s14, %s4287_s13 }
   0x7   : > { %p137_p2 = scmp.eq.s32.totalorder %s3464_s18, 1  ;;  %p142_p3 = scmp.ne.s32.totalorder %s4287_s13, %s4283_s12 }
   0x8   : > { %s5480_s20 = smov (%p37_p0, %s35_s20), 0  ;;  %p143_p5 = scmp.eq.s32.totalorder %s3465_s19, 1 }
   0x9   : > { %p4371_p4 = por %p137_p2, %p136_p1  ;;  %s121_s23 = ssub.s32 %s4299_s16, %s5480_s20 }
   0xa   : > { %p3470_p6 = scmp.ge.s32.totalorder %s4303_s17, 1  ;;  %p124_p7 = scmp.eq.s32.totalorder %s121_s23, 0 }
   0xb   : > { %p4378_p8 = por %p143_p5, %p142_p3  ;;  %p194_p9 = scmp.lt.s32.totalorder %s4303_s17, 3 }
   0xc   : > { %s4384_s25 = scalar_select %p124_p7, %s4291_s14, %s126_s21  }
   0xd   : > { %p195_p10 = pnand %p3470_p6, %p194_p9 }
   0xe   : > { %v4021_v0 = vld [vmem:[%s5469_s1] sm:$0xff] (!%p195_p10)   ;;  %v4305_v1 = vmov (!%p195_p10), 0   ;;  %v4022_v2 = vld [vmem:[%s5469_s1 + $0x8] sm:$0xff] (!%p195_p10)   ;;  %v4023_v3 = vld [vmem:[%s5469_s1 + $0x10] sm:$0xff] (!%p195_p10)   ;;  %s3472_s5 = sshll.u32 (!%p195_p10), %s4295_s15, 7  ;;  %vm1301_vm0 = vcmask (!%p195_p10), 154624  }
   0xf   : > { %198 = sbr.rel (%p195_p10) target bundleno = 551 (0x227), region = 32  ;;  %1501 = vmatprep.subr.bf16.mxu0 (!%p195_p10), %v4305_v1  ;;  %3941 = vmatprep.subr.bf16.mxu1 (!%p195_p10), %v4305_v1  ;;  %p236_p11 = scmp.lt.s32.totalorder (!%p195_p10), %s3472_s5, 255  ;;  %v4024_v4 = vld [vmem:[%s5469_s1 + $0x18] sm:$0xff] (!%p195_p10)   ;;  %v4025_v5 = vld [vmem:[%s5469_s1 + $0x20] sm:$0xff] (!%p195_p10)   ;;  %v4026_v8 = vld [vmem:[%s5469_s1 + $0x28] sm:$0xff] (!%p195_p10)   ;;  %vm1494_vm1 = vcmask (!%p195_p10), 1040384  }
  0x10   : > { %1502 = vmatpush1.bf16.msra.mxu0 (!%p195_p10), %v4021_v0  ;;  %3951 = vmatpush1.bf16.msra.mxu1 (!%p195_p10), %v4021_v0  ;;  %v4027_v9 = vld [vmem:[%s5469_s1 + $0x30] sm:$0xff] (!%p195_p10)   ;;  %v4028_v10 = vld [vmem:[%s5469_s1 + $0x38] sm:$0xff] (!%p195_p10)   ;;  %vm1495_vm2 = vcmask (!%p195_p10), 1041408   ;;  %v4306_v11 = vmov (!%p195_p10), 65535   ;;  %v4029_v13 = vld [vmem:[%s5469_s1 + $0x40] sm:$0xff] (!%p195_p10)   ;;  %vm264_vm3 = vcmask (!%p195_p10), 523264  }
  0x11   : > { %1503 = vmatprep.subr.bf16.mxu0 (!%p195_p10), %v4305_v1  ;;  %3942 = vmatprep.subr.bf16.mxu1 (!%p195_p10), %v4305_v1  ;;  %v1496_v12 = vsel (!%p195_p10), %vm1494_vm1, 4294967295, %v4306_v11  ;;  %v4030_v14 = vld [vmem:[%s5469_s1 + $0x48] ss:$0 sps:$4 sm:$0x33] (!%p195_p10)   ;;  %v4307_v59 = vmov (!%p195_p10), 0.0   ;;  %s231_s7 = sand.u32 (!%p195_p10), 1, %s4287_s13  }
  0x12   : > { %v1497_v15 = vsel (!%p195_p10), %vm1495_vm2, %v1496_v12, 0  ;;  %265 = vst.msk [vmem:[#allocation2] sm:$0xff] (!%p195_p10), %vm264_vm3, %v4307_v59  ;;  %266 = vst.msk [vmem:[#allocation2 + $0x8] sm:$0xff] (!%p195_p10), %vm264_vm3, %v4307_v59  ;;  %s4872_s10 = sshll.u32 (!%p195_p10), %s231_s7, 9  ;;  %vm3209_vm4 = vcmask (!%p195_p10), 519168   ;;  %s3940_s26 = sshll.u32 (!%p195_p10), %s4295_s15, 13 }
  0x13   : > { %v1499_v16 = vand.u32 (!%p195_p10), %v4030_v14, %v1497_v15  ;;  %267 = vst.msk [vmem:[#allocation2 + $0x10] sm:$0xff] (!%p195_p10), %vm264_vm3, %v4307_v59  ;;  %268 = vst.msk [vmem:[#allocation2 + $0x18] sm:$0xff] (!%p195_p10), %vm264_vm3, %v4307_v59  ;;  %s4886_s18 = scalar_lea.vmem (!%p195_p10), [#allocation3], %s4872_s10  ;;  %s5408_s30 = scalar_lea.hbm (!%p195_p10), %s5471_s3, %s3940_s26 }
  0x14   : > { %1504 = vmatpush1.bf16.msra.mxu0 (!%p195_p10), %v4022_v2  ;;  %3952 = vmatpush1.bf16.msra.mxu1 (!%p195_p10), %v4022_v2  ;;  %269 = vst.msk [vmem:[#allocation2 + $0x20] sm:$0xff] (!%p195_p10), %vm264_vm3, %v4307_v59  ;;  %270 = vst.msk [vmem:[#allocation2 + $0x28] sm:$0xff] (!%p195_p10), %vm264_vm3, %v4307_v59  ;;  %s3353_s27 = sshll.u32 (!%p195_p10), %s4886_s18, 4  ;;  %s5422_s15 = scalar_lea.sflag (!%p195_p10), [#allocation4], %s231_s7  ;;  %s5410_s27 = int_to_ptr.vmem [resolvable:$true] %s3353_s27 }
  0x15   : > { %1505 = vmatprep.subr.bf16.mxu0 (!%p195_p10), %v4305_v1  ;;  %3943 = vmatprep.subr.bf16.mxu1 (!%p195_p10), %v4305_v1  ;;  %271 = vst.msk [vmem:[#allocation2 + $0x30] sm:$0xff] (!%p195_p10), %vm264_vm3, %v4307_v59  ;;  %272 = vst.msk [vmem:[#allocation2 + $0x38] sm:$0xff] (!%p195_p10), %vm264_vm3, %v4307_v59  ;;  %s4225_s4 = scalar_lea.vmem (!%p195_p10), %s5410_s27, 8192 }
  0x16   : > { %s5482_s5 = smov (!%p236_p11, %s3472_s5), 255  ;;  %273 = vst.msk [vmem:[#allocation2 + $0x40] sm:$0xff] %vm264_vm3, %v4307_v59  ;;  %274 = vst.msk [vmem:[#allocation2 + $0x48] sm:$0xff] %vm264_vm3, %v4307_v59  ;;  %p4226_p12 = scmp.ne.s32.totalorder %s5410_s27, %s4225_s4 }
  0x17   : > { %s3811_s8 = sshll.u32 %s5482_s5, 3  ;;  %275 = vst.msk [vmem:[#allocation2 + $0x50] sm:$0xff] %vm264_vm3, %v4307_v59  ;;  %276 = vst.msk [vmem:[#allocation2 + $0x58] sm:$0xff] %vm264_vm3, %v4307_v59  ;;  %s4308_s5 = smov [#allocation3]  }
  0x18   : > { %1506 = vmatpush1.bf16.msra.mxu0 %v4023_v3  ;;  %3953 = vmatpush1.bf16.msra.mxu1 %v4023_v3  ;;  %s4402_s11 = scalar_lea.vmem %s5468_s0, %s3811_s8  ;;  %277 = vst.msk [vmem:[#allocation2 + $0x60] sm:$0xff] %vm264_vm3, %v4307_v59  ;;  %278 = vst.msk [vmem:[#allocation2 + $0x68] sm:$0xff] %vm264_vm3, %v4307_v59  ;;  %p4227_p13 = pnand %p4226_p12, %p4371_p4 }
  0x19   : > { %1507 = vmatprep.subr.bf16.mxu0 %v4305_v1  ;;  %3944 = vmatprep.subr.bf16.mxu1 %v4305_v1  ;;  %v4033_v6 = vld [vmem:[%s4402_s11 + $0x4] ss:$8 sps:$4 sm:$0xff]   ;;  %v4031_v17 = vld [vmem:[%s4402_s11] ss:$8 sps:$4 sm:$0xff]   ;;  %v4037_v19 = vld [vmem:[%s4402_s11 + $0x14] ss:$8 sps:$4 sm:$0xff]  }
  0x1a   : > { %v4036_v7 = vld [vmem:[%s4402_s11 + $0x204] ss:$8 sps:$4 sm:$0xff]   ;;  %3613 = vmatprep.mubr.msk.bf16.mxu0 %vm1301_vm0, %v4033_v6  ;;  %v4034_v18 = vld [vmem:[%s4402_s11 + $0x200] ss:$8 sps:$4 sm:$0xff]   ;;  %v4039_v20 = vld [vmem:[%s4402_s11 + $0x214] ss:$8 sps:$4 sm:$0xff]   ;;  %p4228_p0 = pneg %p4227_p13 }
  0x1b   : > { %3645 = vmatprep.mubr.msk.bf16.mxu1 %vm1301_vm0, %v4036_v7  ;;  %v4041_v21 = vld [vmem:[%s4402_s11 + $0x10] ss:$8 sps:$4 sm:$0xff]   ;;  %v4043_v23 = vld [vmem:[%s4402_s11 + $0x24] ss:$8 sps:$4 sm:$0xff]   ;;  %v4047_v25 = vld [vmem:[%s4402_s11 + $0x20] ss:$8 sps:$4 sm:$0xff]  }
  0x1c   : > { %1508 = vmatpush1.bf16.msra.mxu0 %v4024_v4  ;;  %3954 = vmatpush1.bf16.msra.mxu1 %v4024_v4  ;;  %v4042_v22 = vld [vmem:[%s4402_s11 + $0x210] ss:$8 sps:$4 sm:$0xff]   ;;  %v4045_v24 = vld [vmem:[%s4402_s11 + $0x224] ss:$8 sps:$4 sm:$0xff]   ;;  %v4048_v26 = vld [vmem:[%s4402_s11 + $0x220] ss:$8 sps:$4 sm:$0xff]  }
  0x1d   : > { %1509 = vmatprep.subr.bf16.mxu0 %v4305_v1  ;;  %3945 = vmatprep.subr.bf16.mxu1 %v4305_v1  ;;  %v4049_v27 = vld [vmem:[%s4402_s11 + $0x34] ss:$8 sps:$4 sm:$0xff]   ;;  %v4053_v29 = vld [vmem:[%s4402_s11 + $0x30] ss:$8 sps:$4 sm:$0xff]   ;;  %v4055_v31 = vld [vmem:[%s4402_s11 + $0x44] ss:$8 sps:$4 sm:$0xff]  }
  0x1e   : > { %v4051_v28 = vld [vmem:[%s4402_s11 + $0x234] ss:$8 sps:$4 sm:$0xff]   ;;  %v4054_v30 = vld [vmem:[%s4402_s11 + $0x230] ss:$8 sps:$4 sm:$0xff]   ;;  %v4057_v32 = vld [vmem:[%s4402_s11 + $0x244] ss:$8 sps:$4 sm:$0xff]  }
  0x1f   : > { %v4059_v33 = vld [vmem:[%s4402_s11 + $0x40] ss:$8 sps:$4 sm:$0xff]   ;;  %v4061_v35 = vld [vmem:[%s4402_s11 + $0x54] ss:$8 sps:$4 sm:$0xff]   ;;  %v4065_v37 = vld [vmem:[%s4402_s11 + $0x50] ss:$8 sps:$4 sm:$0xff]  }
  0x20   : > { %1510 = vmatpush1.bf16.msra.mxu0 %v4025_v5  ;;  %3955 = vmatpush1.bf16.msra.mxu1 %v4025_v5  ;;  %v4060_v34 = vld [vmem:[%s4402_s11 + $0x240] ss:$8 sps:$4 sm:$0xff]   ;;  %v4063_v36 = vld [vmem:[%s4402_s11 + $0x254] ss:$8 sps:$4 sm:$0xff]   ;;  %v4066_v38 = vld [vmem:[%s4402_s11 + $0x250] ss:$8 sps:$4 sm:$0xff]  }
  0x21   : > { %1511 = vmatprep.subr.bf16.mxu0 %v4305_v1  ;;  %3946 = vmatprep.subr.bf16.mxu1 %v4305_v1  ;;  %v4067_v39 = vld [vmem:[%s4402_s11 + $0x64] ss:$8 sps:$4 sm:$0xff]   ;;  %v4071_v41 = vld [vmem:[%s4402_s11 + $0x60] ss:$8 sps:$4 sm:$0xff]   ;;  %v4073_v43 = vld [vmem:[%s4402_s11 + $0x74] ss:$8 sps:$4 sm:$0xff]  }
  0x22   : > { %v4069_v40 = vld [vmem:[%s4402_s11 + $0x264] ss:$8 sps:$4 sm:$0xff]   ;;  %v4072_v42 = vld [vmem:[%s4402_s11 + $0x260] ss:$8 sps:$4 sm:$0xff]   ;;  %v4075_v44 = vld [vmem:[%s4402_s11 + $0x274] ss:$8 sps:$4 sm:$0xff]  }
  0x23   : > { %v4077_v45 = vld [vmem:[%s4402_s11 + $0x70] ss:$8 sps:$4 sm:$0xff]   ;;  %v4079_v47 = vld [vmem:[%s4402_s11 + $0x84] ss:$8 sps:$4 sm:$0xff]   ;;  %v4083_v49 = vld [vmem:[%s4402_s11 + $0x80] ss:$8 sps:$4 sm:$0xff]  }
  0x24   : > { %1512 = vmatpush1.bf16.msra.mxu0 %v4026_v8  ;;  %3956 = vmatpush1.bf16.msra.mxu1 %v4026_v8  ;;  %v4078_v46 = vld [vmem:[%s4402_s11 + $0x270] ss:$8 sps:$4 sm:$0xff]   ;;  %v4081_v48 = vld [vmem:[%s4402_s11 + $0x284] ss:$8 sps:$4 sm:$0xff]   ;;  %v4084_v50 = vld [vmem:[%s4402_s11 + $0x280] ss:$8 sps:$4 sm:$0xff]  }
  0x25   : > { %1513 = vmatprep.subr.bf16.mxu0 %v4305_v1  ;;  %3947 = vmatprep.subr.bf16.mxu1 %v4305_v1  ;;  %v4085_v51 = vld [vmem:[%s4402_s11 + $0x94] ss:$8 sps:$4 sm:$0xff]   ;;  %v4089_v53 = vld [vmem:[%s4402_s11 + $0x90] ss:$8 sps:$4 sm:$0xff]   ;;  %v4091_v55 = vld [vmem:[%s4402_s11 + $0xa4] ss:$8 sps:$4 sm:$0xff]  }
  0x26   : > { %v4087_v52 = vld [vmem:[%s4402_s11 + $0x294] ss:$8 sps:$4 sm:$0xff]   ;;  %v4090_v54 = vld [vmem:[%s4402_s11 + $0x290] ss:$8 sps:$4 sm:$0xff]   ;;  %v4093_v56 = vld [vmem:[%s4402_s11 + $0x2a4] ss:$8 sps:$4 sm:$0xff]  }
  0x27   : > { %v4487_v57 = vld [vmem:[%s4402_s11 + $0xa0] ss:$8 sps:$4 sm:$0xff]   ;;  %279 = vst.msk [vmem:[#allocation2 + $0x70] sm:$0xff] %vm264_vm3, %v4307_v59  ;;  %280 = vst.msk [vmem:[#allocation2 + $0x78] sm:$0xff] %vm264_vm3, %v4307_v59  ;;  %v4097_v60 = vld [vmem:[%s4402_s11 + $0xb4] ss:$8 sps:$4 sm:$0xff]  }
  0x28   : > { %1514 = vmatpush1.bf16.msra.mxu0 %v4027_v9  ;;  %3957 = vmatpush1.bf16.msra.mxu1 %v4027_v9  ;;  %v4490_v58 = vld [vmem:[%s4402_s11 + $0x2a0] ss:$8 sps:$4 sm:$0xff]   ;;  %281 = vst.msk [vmem:[#allocation2 + $0x80] sm:$0xff] %vm264_vm3, %v4307_v59  ;;  %282 = vst.msk [vmem:[#allocation2 + $0x88] sm:$0xff] %vm264_vm3, %v4307_v59  ;;  %v4099_v61 = vld [vmem:[%s4402_s11 + $0x2b4] ss:$8 sps:$4 sm:$0xff]  }
  0x29   : > { %1515 = vmatprep.subr.bf16.mxu0 %v4305_v1  ;;  %3948 = vmatprep.subr.bf16.mxu1 %v4305_v1  ;;  %283 = vst.msk [vmem:[#allocation2 + $0x90] sm:$0xff] %vm264_vm3, %v4307_v59  ;;  %284 = vst.msk [vmem:[#allocation2 + $0x98] sm:$0xff] %vm264_vm3, %v4307_v59  ;;  %v4101_v62 = vld [vmem:[%s4402_s11 + $0xb0] ss:$8 sps:$4 sm:$0xff]   ;;  %v4103_v0 = vld [vmem:[%s4402_s11 + $0xc4] ss:$8 sps:$4 sm:$0xff]  }
  0x2a   : > { %285 = vst.msk [vmem:[#allocation2 + $0xa0] sm:$0xff] %vm264_vm3, %v4307_v59  ;;  %286 = vst.msk [vmem:[#allocation2 + $0xa8] sm:$0xff] %vm264_vm3, %v4307_v59  ;;  %v4102_v63 = vld [vmem:[%s4402_s11 + $0x2b0] ss:$8 sps:$4 sm:$0xff]   ;;  %v4107_v2 = vld [vmem:[%s4402_s11 + $0xc0] ss:$8 sps:$4 sm:$0xff]  }
  0x2b   : > { %287 = vst.msk [vmem:[#allocation2 + $0xb0] sm:$0xff] %vm264_vm3, %v4307_v59  ;;  %288 = vst.msk [vmem:[#allocation2 + $0xb8] sm:$0xff] %vm264_vm3, %v4307_v59  ;;  %v4108_v3 = vld [vmem:[%s4402_s11 + $0x2c0] ss:$8 sps:$4 sm:$0xff]   ;;  %v4109_v4 = vld [vmem:[%s4402_s11 + $0xd4] ss:$8 sps:$4 sm:$0xff]  }
  0x2c   : > { %1516 = vmatpush1.bf16.msra.mxu0 %v4028_v10  ;;  %3958 = vmatpush1.bf16.msra.mxu1 %v4028_v10  ;;  %289 = vst.msk [vmem:[#allocation2 + $0xc0] sm:$0xff] %vm264_vm3, %v4307_v59  ;;  %290 = vst.msk [vmem:[#allocation2 + $0xc8] sm:$0xff] %vm264_vm3, %v4307_v59  ;;  %v4111_v5 = vld [vmem:[%s4402_s11 + $0x2d4] ss:$8 sps:$4 sm:$0xff]   ;;  %v4113_v6 = vld [vmem:[%s4402_s11 + $0xd0] ss:$8 sps:$4 sm:$0xff]  }
  0x2d   : > { %1517 = vmatprep.subr.bf16.mxu0 %v4305_v1  ;;  %3949 = vmatprep.subr.bf16.mxu1 %v4305_v1  ;;  %291 = vst.msk [vmem:[#allocation2 + $0xd0] sm:$0xff] %vm264_vm3, %v4307_v59  ;;  %292 = vst.msk [vmem:[#allocation2 + $0xd8] sm:$0xff] %vm264_vm3, %v4307_v59  ;;  %v4114_v7 = vld [vmem:[%s4402_s11 + $0x2d0] ss:$8 sps:$4 sm:$0xff]   ;;  %v4115_v8 = vld [vmem:[%s4402_s11 + $0xe4] ss:$8 sps:$4 sm:$0xff]  }
  0x2e   : > { %293 = vst.msk [vmem:[#allocation2 + $0xe0] sm:$0xff] %vm264_vm3, %v4307_v59  ;;  %294 = vst.msk [vmem:[#allocation2 + $0xe8] sm:$0xff] %vm264_vm3, %v4307_v59  ;;  %v4117_v9 = vld [vmem:[%s4402_s11 + $0x2e4] ss:$8 sps:$4 sm:$0xff]   ;;  %v4119_v10 = vld [vmem:[%s4402_s11 + $0xe0] ss:$8 sps:$4 sm:$0xff]  }
  0x2f   : > { %295 = vst.msk [vmem:[#allocation2 + $0xf0] sm:$0xff] %vm264_vm3, %v4307_v59  ;;  %296 = vst.msk [vmem:[#allocation2 + $0xf8] sm:$0xff] %vm264_vm3, %v4307_v59  ;;  %v4120_v11 = vld [vmem:[%s4402_s11 + $0x2e0] ss:$8 sps:$4 sm:$0xff]   ;;  %v4121_v12 = vld [vmem:[%s4402_s11 + $0xf4] ss:$8 sps:$4 sm:$0xff]  }
  0x30   : > { %1518 = vmatpush1.bf16.msra.mxu0 %v4029_v13  ;;  %3959 = vmatpush1.bf16.msra.mxu1 %v4029_v13  ;;  %297 = vst.msk [vmem:[#allocation2 + $0x100] sm:$0xff] %vm264_vm3, %v4307_v59  ;;  %298 = vst.msk [vmem:[#allocation2 + $0x108] sm:$0xff] %vm264_vm3, %v4307_v59  ;;  %v4123_v13 = vld [vmem:[%s4402_s11 + $0x2f4] ss:$8 sps:$4 sm:$0xff]   ;;  %v4125_v14 = vld [vmem:[%s4402_s11 + $0xf0] ss:$8 sps:$4 sm:$0xff]  }
  0x31   : > { %1519 = vmatprep.subr.bf16.mxu0 %v4305_v1  ;;  %3950 = vmatprep.subr.bf16.mxu1 %v4305_v1  ;;  %299 = vst.msk [vmem:[#allocation2 + $0x110] sm:$0xff] %vm264_vm3, %v4307_v59  ;;  %300 = vst.msk [vmem:[#allocation2 + $0x118] sm:$0xff] %vm264_vm3, %v4307_v59  ;;  %v4105_v1 = vld [vmem:[%s4402_s11 + $0x2c4] ss:$8 sps:$4 sm:$0xff]   ;;  %v4126_v15 = vld [vmem:[%s4402_s11 + $0x2f0] ss:$8 sps:$4 sm:$0xff]  }
  0x32   : > { %301 = vst.msk [vmem:[#allocation2 + $0x120] sm:$0xff] %vm264_vm3, %v4307_v59  ;;  %302 = vst.msk [vmem:[#allocation2 + $0x128] sm:$0xff] %vm264_vm3, %v4307_v59  ;;  %s4229_s6 = sshll.u32 %s4308_s5, 4  ;;  %s4230_s6 = int_to_ptr.vmem [resolvable:$false] %s4229_s6 }
  0x33   : > { %303 = vst.msk [vmem:[#allocation2 + $0x130] sm:$0xff] %vm264_vm3, %v4307_v59  ;;  %304 = vst.msk [vmem:[#allocation2 + $0x138] sm:$0xff] %vm264_vm3, %v4307_v59  ;;  %s4231_s8 = scalar_lea.vmem %s4230_s6, 16384  ;;  %p4232_p1 = scmp.lt.s32.totalorder %s5410_s27, %s4230_s6 }
  0x34   : > { %1520 = vmatpush1.bf16.msra.mxu0 %v1499_v16  ;;  %3960 = vmatpush1.bf16.msra.mxu1 %v1499_v16  ;;  %305 = vst.msk [vmem:[#allocation2 + $0x140] sm:$0xff] %vm264_vm3, %v4307_v59  ;;  %306 = vst.msk [vmem:[#allocation2 + $0x148] sm:$0xff] %vm264_vm3, %v4307_v59  ;;  %v4127_v16 = vld [vmem:[%s4402_s11 + $0x104] ss:$8 sps:$4 sm:$0xff]   ;;  %p4233_p2 = scmp.lt.s32.totalorder %s4231_s8, %s4225_s4 }
  0x35   : > { %307 = vst.msk [vmem:[#allocation2 + $0x150] sm:$0xff] %vm264_vm3, %v4307_v59  ;;  %308 = vst.msk [vmem:[#allocation2 + $0x158] sm:$0xff] %vm264_vm3, %v4307_v59 }
  0x36   : > { %309 = vst.msk [vmem:[#allocation2 + $0x160] sm:$0xff] %vm264_vm3, %v4307_v59  ;;  %310 = vst.msk [vmem:[#allocation2 + $0x168] sm:$0xff] %vm264_vm3, %v4307_v59  ;;  %p4234_p3 = por %p4233_p2, %p4232_p1 }
  0x37   : > { %1534 = vmatmul.mubr.bf16.vlgmr.msra.gmra.mrb[0].mxu0 %v4031_v17  ;;  %1790 = vmatmul.mubr.bf16.vlgmr.msra.gmra.mrb[0].mxu1 %v4034_v18  ;;  %311 = vst.msk [vmem:[#allocation2 + $0x170] sm:$0xff] %vm264_vm3, %v4307_v59  ;;  %312 = vst.msk [vmem:[#allocation2 + $0x178] sm:$0xff] %vm264_vm3, %v4307_v59  ;;  %v4129_v17 = vld [vmem:[%s4402_s11 + $0x304] ss:$8 sps:$4 sm:$0xff]   ;;  %v4131_v18 = vld [vmem:[%s4402_s11 + $0x100] ss:$8 sps:$4 sm:$0xff]  }
  0x38   : > { %3614 = vmatprep.mubr.msk.bf16.mxu0 %vm1301_vm0, %v4037_v19  ;;  %3646 = vmatprep.mubr.msk.bf16.mxu1 %vm1301_vm0, %v4039_v20  ;;  %313 = vst.msk [vmem:[#allocation2 + $0x180] sm:$0xff] %vm264_vm3, %v4307_v59  ;;  %314 = vst.msk [vmem:[#allocation2 + $0x188] sm:$0xff] %vm264_vm3, %v4307_v59  ;;  %v4132_v19 = vld [vmem:[%s4402_s11 + $0x300] ss:$8 sps:$4 sm:$0xff]   ;;  %v4133_v20 = vld [vmem:[%s4402_s11 + $0x114] ss:$8 sps:$4 sm:$0xff]   ;;  %p4235_p5 = pnand %p4234_p3, %p4228_p0 }
  0x39   : > { %315 = vst.msk [vmem:[#allocation2 + $0x190] sm:$0xff] %vm264_vm3, %v4307_v59  ;;  %316 = vst.msk [vmem:[#allocation2 + $0x198] sm:$0xff] %vm264_vm3, %v4307_v59 }
  0x3a   : > { %317 = vst.msk [vmem:[#allocation2 + $0x1a0] sm:$0xff] %vm264_vm3, %v4307_v59  ;;  %318 = vst.msk [vmem:[#allocation2 + $0x1a8] sm:$0xff] %vm264_vm3, %v4307_v59 }
  0x3b   : > { %319 = vst.msk [vmem:[#allocation2 + $0x1b0] sm:$0xff] %vm264_vm3, %v4307_v59  ;;  %320 = vst.msk [vmem:[#allocation2 + $0x1b8] sm:$0xff] %vm264_vm3, %v4307_v59 }
  0x3c   : > { %321 = vst.msk [vmem:[#allocation2 + $0x1c0] sm:$0xff] %vm264_vm3, %v4307_v59  ;;  %322 = vst.msk [vmem:[#allocation2 + $0x1c8] sm:$0xff] %vm264_vm3, %v4307_v59 }
  0x3d   : > { %323 = vst.msk [vmem:[#allocation2 + $0x1d0] sm:$0xff] %vm264_vm3, %v4307_v59  ;;  %324 = vst.msk [vmem:[#allocation2 + $0x1d8] sm:$0xff] %vm264_vm3, %v4307_v59 }
  0x3e   : > { %325 = vst.msk [vmem:[#allocation2 + $0x1e0] sm:$0xff] %vm264_vm3, %v4307_v59  ;;  %326 = vst.msk [vmem:[#allocation2 + $0x1e8] sm:$0xff] %vm264_vm3, %v4307_v59 }
  0x3f   : > { %1542 = vmatmul.mubr.bf16.gmra.mrb[4].mxu0 %v4041_v21  ;;  %1798 = vmatmul.mubr.bf16.gmra.mrb[4].mxu1 %v4042_v22  ;;  %327 = vst.msk [vmem:[#allocation2 + $0x1f0] sm:$0xff] %vm264_vm3, %v4307_v59  ;;  %328 = vst.msk [vmem:[#allocation2 + $0x1f8] sm:$0xff] %vm264_vm3, %v4307_v59  ;;  %v4135_v21 = vld [vmem:[%s4402_s11 + $0x314] ss:$8 sps:$4 sm:$0xff]   ;;  %v4137_v22 = vld [vmem:[%s4402_s11 + $0x110] ss:$8 sps:$4 sm:$0xff]  }
  0x40   : > { %3615 = vmatprep.mubr.msk.bf16.mxu0 %vm1301_vm0, %v4043_v23  ;;  %3647 = vmatprep.mubr.msk.bf16.mxu1 %vm1301_vm0, %v4045_v24  ;;  %329 = vst.msk [vmem:[#allocation2 + $0x200] sm:$0xff] %vm264_vm3, %v4307_v59  ;;  %330 = vst.msk [vmem:[#allocation2 + $0x208] sm:$0xff] %vm264_vm3, %v4307_v59  ;;  %v4138_v23 = vld [vmem:[%s4402_s11 + $0x310] ss:$8 sps:$4 sm:$0xff]   ;;  %v4139_v24 = vld [vmem:[%s4402_s11 + $0x124] ss:$8 sps:$4 sm:$0xff]  }
  0x41   : > { %331 = vst.msk [vmem:[#allocation2 + $0x210] sm:$0xff] %vm264_vm3, %v4307_v59  ;;  %332 = vst.msk [vmem:[#allocation2 + $0x218] sm:$0xff] %vm264_vm3, %v4307_v59 }
  0x42   : > { %333 = vst.msk [vmem:[#allocation2 + $0x220] sm:$0xff] %vm264_vm3, %v4307_v59  ;;  %334 = vst.msk [vmem:[#allocation2 + $0x228] sm:$0xff] %vm264_vm3, %v4307_v59 }
  0x43   : > { %335 = vst.msk [vmem:[#allocation2 + $0x230] sm:$0xff] %vm264_vm3, %v4307_v59  ;;  %336 = vst.msk [vmem:[#allocation2 + $0x238] sm:$0xff] %vm264_vm3, %v4307_v59 }
  0x44   : > { %337 = vst.msk [vmem:[#allocation2 + $0x240] sm:$0xff] %vm264_vm3, %v4307_v59  ;;  %338 = vst.msk [vmem:[#allocation2 + $0x248] sm:$0xff] %vm264_vm3, %v4307_v59 }
  0x45   : > { %339 = vst.msk [vmem:[#allocation2 + $0x250] sm:$0xff] %vm264_vm3, %v4307_v59  ;;  %340 = vst.msk [vmem:[#allocation2 + $0x258] sm:$0xff] %vm264_vm3, %v4307_v59 }
  0x46   : > { %341 = vst.msk [vmem:[#allocation2 + $0x260] sm:$0xff] %vm264_vm3, %v4307_v59  ;;  %342 = vst.msk [vmem:[#allocation2 + $0x268] sm:$0xff] %vm264_vm3, %v4307_v59 }
  0x47   : > { %1550 = vmatmul.mubr.bf16.gmra.mrb[8].mxu0 %v4047_v25  ;;  %1806 = vmatmul.mubr.bf16.gmra.mrb[8].mxu1 %v4048_v26  ;;  %343 = vst.msk [vmem:[#allocation2 + $0x270] sm:$0xff] %vm264_vm3, %v4307_v59  ;;  %344 = vst.msk [vmem:[#allocation2 + $0x278] sm:$0xff] %vm264_vm3, %v4307_v59  ;;  %v4141_v25 = vld [vmem:[%s4402_s11 + $0x324] ss:$8 sps:$4 sm:$0xff]   ;;  %v4143_v26 = vld [vmem:[%s4402_s11 + $0x120] ss:$8 sps:$4 sm:$0xff]  }
  0x48   : > { %3616 = vmatprep.mubr.msk.bf16.mxu0 %vm1301_vm0, %v4049_v27  ;;  %3648 = vmatprep.mubr.msk.bf16.mxu1 %vm1301_vm0, %v4051_v28  ;;  %345 = vst.msk [vmem:[#allocation2 + $0x280] sm:$0xff] %vm264_vm3, %v4307_v59  ;;  %346 = vst.msk [vmem:[#allocation2 + $0x288] sm:$0xff] %vm264_vm3, %v4307_v59  ;;  %v4144_v27 = vld [vmem:[%s4402_s11 + $0x320] ss:$8 sps:$4 sm:$0xff]   ;;  %v4145_v28 = vld [vmem:[%s4402_s11 + $0x134] ss:$8 sps:$4 sm:$0xff]  }
  0x49   : > { %347 = vst.msk [vmem:[#allocation2 + $0x290] sm:$0xff] %vm264_vm3, %v4307_v59  ;;  %348 = vst.msk [vmem:[#allocation2 + $0x298] sm:$0xff] %vm264_vm3, %v4307_v59 }
  0x4a   : > { %349 = vst.msk [vmem:[#allocation2 + $0x2a0] sm:$0xff] %vm264_vm3, %v4307_v59  ;;  %350 = vst.msk [vmem:[#allocation2 + $0x2a8] sm:$0xff] %vm264_vm3, %v4307_v59 }
  0x4b   : > { %351 = vst.msk [vmem:[#allocation2 + $0x2b0] sm:$0xff] %vm264_vm3, %v4307_v59  ;;  %352 = vst.msk [vmem:[#allocation2 + $0x2b8] sm:$0xff] %vm264_vm3, %v4307_v59 }
  0x4c   : > { %353 = vst.msk [vmem:[#allocation2 + $0x2c0] sm:$0xff] %vm264_vm3, %v4307_v59  ;;  %354 = vst.msk [vmem:[#allocation2 + $0x2c8] sm:$0xff] %vm264_vm3, %v4307_v59 }
  0x4d   : > { %355 = vst.msk [vmem:[#allocation2 + $0x2d0] sm:$0xff] %vm264_vm3, %v4307_v59  ;;  %356 = vst.msk [vmem:[#allocation2 + $0x2d8] sm:$0xff] %vm264_vm3, %v4307_v59 }
  0x4e   : > { %357 = vst.msk [vmem:[#allocation2 + $0x2e0] sm:$0xff] %vm264_vm3, %v4307_v59  ;;  %358 = vst.msk [vmem:[#allocation2 + $0x2e8] sm:$0xff] %vm264_vm3, %v4307_v59 }
  0x4f   : > { %1558 = vmatmul.mubr.bf16.gmra.mrb[12].mxu0 %v4053_v29  ;;  %1814 = vmatmul.mubr.bf16.gmra.mrb[12].mxu1 %v4054_v30  ;;  %359 = vst.msk [vmem:[#allocation2 + $0x2f0] sm:$0xff] %vm264_vm3, %v4307_v59  ;;  %360 = vst.msk [vmem:[#allocation2 + $0x2f8] sm:$0xff] %vm264_vm3, %v4307_v59  ;;  %v4147_v29 = vld [vmem:[%s4402_s11 + $0x334] ss:$8 sps:$4 sm:$0xff]   ;;  %v4149_v30 = vld [vmem:[%s4402_s11 + $0x130] ss:$8 sps:$4 sm:$0xff]  }
  0x50   : > { %3617 = vmatprep.mubr.msk.bf16.mxu0 %vm1301_vm0, %v4055_v31  ;;  %3649 = vmatprep.mubr.msk.bf16.mxu1 %vm1301_vm0, %v4057_v32  ;;  %361 = vst.msk [vmem:[#allocation2 + $0x300] sm:$0xff] %vm264_vm3, %v4307_v59  ;;  %362 = vst.msk [vmem:[#allocation2 + $0x308] sm:$0xff] %vm264_vm3, %v4307_v59  ;;  %v4150_v31 = vld [vmem:[%s4402_s11 + $0x330] ss:$8 sps:$4 sm:$0xff]   ;;  %v4151_v32 = vld [vmem:[%s4402_s11 + $0x144] ss:$8 sps:$4 sm:$0xff]  }
  0x51   : > { %363 = vst.msk [vmem:[#allocation2 + $0x310] sm:$0xff] %vm264_vm3, %v4307_v59  ;;  %364 = vst.msk [vmem:[#allocation2 + $0x318] sm:$0xff] %vm264_vm3, %v4307_v59 }
  0x52   : > { %365 = vst.msk [vmem:[#allocation2 + $0x320] sm:$0xff] %vm264_vm3, %v4307_v59  ;;  %366 = vst.msk [vmem:[#allocation2 + $0x328] sm:$0xff] %vm264_vm3, %v4307_v59 }
  0x53   : > { %367 = vst.msk [vmem:[#allocation2 + $0x330] sm:$0xff] %vm264_vm3, %v4307_v59  ;;  %368 = vst.msk [vmem:[#allocation2 + $0x338] sm:$0xff] %vm264_vm3, %v4307_v59 }
  0x54   : > { %369 = vst.msk [vmem:[#allocation2 + $0x340] sm:$0xff] %vm264_vm3, %v4307_v59  ;;  %370 = vst.msk [vmem:[#allocation2 + $0x348] sm:$0xff] %vm264_vm3, %v4307_v59 }
  0x55   : > { %371 = vst.msk [vmem:[#allocation2 + $0x350] sm:$0xff] %vm264_vm3, %v4307_v59  ;;  %372 = vst.msk [vmem:[#allocation2 + $0x358] sm:$0xff] %vm264_vm3, %v4307_v59 }
  0x56   : > { %373 = vst.msk [vmem:[#allocation2 + $0x360] sm:$0xff] %vm264_vm3, %v4307_v59  ;;  %374 = vst.msk [vmem:[#allocation2 + $0x368] sm:$0xff] %vm264_vm3, %v4307_v59 }
  0x57   : > { %1566 = vmatmul.mubr.bf16.gmra.mrb[16].mxu0 %v4059_v33  ;;  %1822 = vmatmul.mubr.bf16.gmra.mrb[16].mxu1 %v4060_v34  ;;  %375 = vst.msk [vmem:[#allocation2 + $0x370] sm:$0xff] %vm264_vm3, %v4307_v59  ;;  %376 = vst.msk [vmem:[#allocation2 + $0x378] sm:$0xff] %vm264_vm3, %v4307_v59  ;;  %v4153_v33 = vld [vmem:[%s4402_s11 + $0x344] ss:$8 sps:$4 sm:$0xff]   ;;  %v4155_v34 = vld [vmem:[%s4402_s11 + $0x140] ss:$8 sps:$4 sm:$0xff]  }
  0x58   : > { %3618 = vmatprep.mubr.msk.bf16.mxu0 %vm1301_vm0, %v4061_v35  ;;  %3650 = vmatprep.mubr.msk.bf16.mxu1 %vm1301_vm0, %v4063_v36  ;;  %377 = vst.msk [vmem:[#allocation2 + $0x380] sm:$0xff] %vm264_vm3, %v4307_v59  ;;  %378 = vst.msk [vmem:[#allocation2 + $0x388] sm:$0xff] %vm264_vm3, %v4307_v59  ;;  %v4156_v35 = vld [vmem:[%s4402_s11 + $0x340] ss:$8 sps:$4 sm:$0xff]   ;;  %v4157_v36 = vld [vmem:[%s4402_s11 + $0x154] ss:$8 sps:$4 sm:$0xff]  }
  0x59   : > { %379 = vst.msk [vmem:[#allocation2 + $0x390] sm:$0xff] %vm264_vm3, %v4307_v59  ;;  %380 = vst.msk [vmem:[#allocation2 + $0x398] sm:$0xff] %vm264_vm3, %v4307_v59 }
  0x5a   : > { %381 = vst.msk [vmem:[#allocation2 + $0x3a0] sm:$0xff] %vm264_vm3, %v4307_v59  ;;  %382 = vst.msk [vmem:[#allocation2 + $0x3a8] sm:$0xff] %vm264_vm3, %v4307_v59 }
  0x5b   : > { %383 = vst.msk [vmem:[#allocation2 + $0x3b0] sm:$0xff] %vm264_vm3, %v4307_v59  ;;  %384 = vst.msk [vmem:[#allocation2 + $0x3b8] sm:$0xff] %vm264_vm3, %v4307_v59 }
  0x5c   : > { %385 = vst.msk [vmem:[#allocation2 + $0x3c0] sm:$0xff] %vm264_vm3, %v4307_v59  ;;  %386 = vst.msk [vmem:[#allocation2 + $0x3c8] sm:$0xff] %vm264_vm3, %v4307_v59 }
  0x5d   : > { %387 = vst.msk [vmem:[#allocation2 + $0x3d0] sm:$0xff] %vm264_vm3, %v4307_v59  ;;  %388 = vst.msk [vmem:[#allocation2 + $0x3d8] sm:$0xff] %vm264_vm3, %v4307_v59 }
  0x5e   : > { %389 = vst.msk [vmem:[#allocation2 + $0x3e0] sm:$0xff] %vm264_vm3, %v4307_v59  ;;  %390 = vst.msk [vmem:[#allocation2 + $0x3e8] sm:$0xff] %vm264_vm3, %v4307_v59 }
  0x5f   : > { %1574 = vmatmul.mubr.bf16.gmra.mrb[20].mxu0 %v4065_v37  ;;  %1830 = vmatmul.mubr.bf16.gmra.mrb[20].mxu1 %v4066_v38  ;;  %391 = vst.msk [vmem:[#allocation2 + $0x3f0] sm:$0xff] %vm264_vm3, %v4307_v59  ;;  %392 = vst.msk [vmem:[#allocation2 + $0x3f8] sm:$0xff] %vm264_vm3, %v4307_v59  ;;  %v4159_v37 = vld [vmem:[%s4402_s11 + $0x354] ss:$8 sps:$4 sm:$0xff]   ;;  %v4161_v38 = vld [vmem:[%s4402_s11 + $0x150] ss:$8 sps:$4 sm:$0xff]  }
  0x60   : > { %3619 = vmatprep.mubr.msk.bf16.mxu0 %vm1301_vm0, %v4067_v39  ;;  %3651 = vmatprep.mubr.msk.bf16.mxu1 %vm1301_vm0, %v4069_v40  ;;  %v4162_v39 = vld [vmem:[%s4402_s11 + $0x350] ss:$8 sps:$4 sm:$0xff]   ;;  %v4163_v40 = vld [vmem:[%s4402_s11 + $0x164] ss:$8 sps:$4 sm:$0xff]   ;;  %v4192_v59 = vld [vmem:[%s4402_s11 + $0x3a0] ss:$8 sps:$4 sm:$0xff]  }
  0x67   : > { %1582 = vmatmul.mubr.bf16.gmra.mrb[24].mxu0 %v4071_v41  ;;  %1838 = vmatmul.mubr.bf16.gmra.mrb[24].mxu1 %v4072_v42  ;;  %v4165_v41 = vld [vmem:[%s4402_s11 + $0x364] ss:$8 sps:$4 sm:$0xff]   ;;  %v4167_v42 = vld [vmem:[%s4402_s11 + $0x160] ss:$8 sps:$4 sm:$0xff]  }
  0x68   : > { %3620 = vmatprep.mubr.msk.bf16.mxu0 %vm1301_vm0, %v4073_v43  ;;  %3652 = vmatprep.mubr.msk.bf16.mxu1 %vm1301_vm0, %v4075_v44  ;;  %v4168_v43 = vld [vmem:[%s4402_s11 + $0x360] ss:$8 sps:$4 sm:$0xff]   ;;  %v4169_v44 = vld [vmem:[%s4402_s11 + $0x174] ss:$8 sps:$4 sm:$0xff]  }
  0x6f   : > { %1590 = vmatmul.mubr.bf16.gmra.mrb[28].mxu0 %v4077_v45  ;;  %1846 = vmatmul.mubr.bf16.gmra.mrb[28].mxu1 %v4078_v46  ;;  %v4171_v45 = vld [vmem:[%s4402_s11 + $0x374] ss:$8 sps:$4 sm:$0xff]   ;;  %v4173_v46 = vld [vmem:[%s4402_s11 + $0x170] ss:$8 sps:$4 sm:$0xff]  }
  0x70   : > { %3621 = vmatprep.mubr.msk.bf16.mxu0 %vm1301_vm0, %v4079_v47  ;;  %3653 = vmatprep.mubr.msk.bf16.mxu1 %vm1301_vm0, %v4081_v48  ;;  %v4174_v47 = vld [vmem:[%s4402_s11 + $0x370] ss:$8 sps:$4 sm:$0xff]   ;;  %v4175_v48 = vld [vmem:[%s4402_s11 + $0x184] ss:$8 sps:$4 sm:$0xff]  }
  0x77   : > { %1598 = vmatmul.mubr.bf16.gmra.mrb[32].mxu0 %v4083_v49  ;;  %1854 = vmatmul.mubr.bf16.gmra.mrb[32].mxu1 %v4084_v50  ;;  %v4177_v49 = vld [vmem:[%s4402_s11 + $0x384] ss:$8 sps:$4 sm:$0xff]   ;;  %v4179_v50 = vld [vmem:[%s4402_s11 + $0x180] ss:$8 sps:$4 sm:$0xff]  }
  0x78   : > { %3622 = vmatprep.mubr.msk.bf16.mxu0 %vm1301_vm0, %v4085_v51  ;;  %3654 = vmatprep.mubr.msk.bf16.mxu1 %vm1301_vm0, %v4087_v52  ;;  %v4180_v51 = vld [vmem:[%s4402_s11 + $0x380] ss:$8 sps:$4 sm:$0xff]   ;;  %v4181_v52 = vld [vmem:[%s4402_s11 + $0x194] ss:$8 sps:$4 sm:$0xff]  }
  0x7f   : > { %1606 = vmatmul.mubr.bf16.gmra.mrb[36].mxu0 %v4089_v53  ;;  %1862 = vmatmul.mubr.bf16.gmra.mrb[36].mxu1 %v4090_v54  ;;  %v4183_v53 = vld [vmem:[%s4402_s11 + $0x394] ss:$8 sps:$4 sm:$0xff]   ;;  %v4185_v54 = vld [vmem:[%s4402_s11 + $0x190] ss:$8 sps:$4 sm:$0xff]  }
  0x80   : > { %3623 = vmatprep.mubr.msk.bf16.mxu0 %vm1301_vm0, %v4091_v55  ;;  %3655 = vmatprep.mubr.msk.bf16.mxu1 %vm1301_vm0, %v4093_v56  ;;  %v4186_v55 = vld [vmem:[%s4402_s11 + $0x390] ss:$8 sps:$4 sm:$0xff]   ;;  %v4187_v56 = vld [vmem:[%s4402_s11 + $0x1a4] ss:$8 sps:$4 sm:$0xff]  }
  0x87   : > { %1614 = vmatmul.mubr.bf16.gmra.mrb[40].mxu0 %v4487_v57  ;;  %1870 = vmatmul.mubr.bf16.gmra.mrb[40].mxu1 %v4490_v58  ;;  %v4189_v57 = vld [vmem:[%s4402_s11 + $0x3a4] ss:$8 sps:$4 sm:$0xff]   ;;  %v4191_v58 = vld [vmem:[%s4402_s11 + $0x1a0] ss:$8 sps:$4 sm:$0xff]  }
  0x88   : > { %3624 = vmatprep.mubr.msk.bf16.mxu0 %vm1301_vm0, %v4097_v60  ;;  %3656 = vmatprep.mubr.msk.bf16.mxu1 %vm1301_vm0, %v4099_v61  ;;  %v4193_v60 = vld [vmem:[%s4402_s11 + $0x1b4] ss:$8 sps:$4 sm:$0xff]  }
  0x89   : > { %v4195_v61 = vld [vmem:[%s4402_s11 + $0x3b4] ss:$8 sps:$4 sm:$0xff]  }
  0x8f   : > { %1622 = vmatmul.mubr.bf16.gmra.mrb[44].mxu0 %v4101_v62  ;;  %1878 = vmatmul.mubr.bf16.gmra.mrb[44].mxu1 %v4102_v63  ;;  %v393_v62 = vld [vmem:[#allocation2] sm:$0xff] }
  0x90   : > { %3625 = vmatprep.mubr.msk.bf16.mxu0 %vm1301_vm0, %v4103_v0  ;;  %3657 = vmatprep.mubr.msk.bf16.mxu1 %vm1301_vm0, %v4105_v1  ;;  %v457_v63 = vld [vmem:[#allocation2 + $0x200] sm:$0xff] }
  0x97   : > { %1630 = vmatmul.mubr.bf16.gmra.mrb[48].mxu0 %v4107_v2  ;;  %1886 = vmatmul.mubr.bf16.gmra.mrb[48].mxu1 %v4108_v3  ;;  %v394_v2 = vld [vmem:[#allocation2 + $0x8] sm:$0xff] }
  0x98   : > { %3626 = vmatprep.mubr.msk.bf16.mxu0 %vm1301_vm0, %v4109_v4  ;;  %3658 = vmatprep.mubr.msk.bf16.mxu1 %vm1301_vm0, %v4111_v5  ;;  %v458_v3 = vld [vmem:[#allocation2 + $0x208] sm:$0xff] }
  0x9f   : > { %1638 = vmatmul.mubr.bf16.gmra.mrb[52].mxu0 %v4113_v6  ;;  %1894 = vmatmul.mubr.bf16.gmra.mrb[52].mxu1 %v4114_v7 }
  0xa0   : > { %3627 = vmatprep.mubr.msk.bf16.mxu0 %vm1301_vm0, %v4115_v8  ;;  %3659 = vmatprep.mubr.msk.bf16.mxu1 %vm1301_vm0, %v4117_v9  ;;  %v4197_v8 = vld [vmem:[%s4402_s11 + $0x1b0] ss:$8 sps:$4 sm:$0xff]  }
  0xa1   : > { %v4198_v9 = vld [vmem:[%s4402_s11 + $0x3b0] ss:$8 sps:$4 sm:$0xff]  }
  0xa7   : > { %1646 = vmatmul.mubr.bf16.gmra.mrb[56].mxu0 %v4119_v10  ;;  %1902 = vmatmul.mubr.bf16.gmra.mrb[56].mxu1 %v4120_v11 }
  0xa8   : > { %3628 = vmatprep.mubr.msk.bf16.mxu0 %vm1301_vm0, %v4121_v12  ;;  %3660 = vmatprep.mubr.msk.bf16.mxu1 %vm1301_vm0, %v4123_v13  ;;  %v4199_v12 = vld [vmem:[%s4402_s11 + $0x1c4] ss:$8 sps:$4 sm:$0xff]  }
  0xa9   : > { %v4201_v13 = vld [vmem:[%s4402_s11 + $0x3c4] ss:$8 sps:$4 sm:$0xff]  }
  0xaf   : > { %1654 = vmatmul.mubr.bf16.gmra.mrb[60].mxu0 %v4125_v14  ;;  %1910 = vmatmul.mubr.bf16.gmra.mrb[60].mxu1 %v4126_v15 }
  0xb0   : > { %3629 = vmatprep.mubr.msk.bf16.mxu0 %vm1301_vm0, %v4127_v16  ;;  %3661 = vmatprep.mubr.msk.bf16.mxu1 %vm1301_vm0, %v4129_v17 }
  0xb7   : > { %1662 = vmatmul.mubr.bf16.gmra.mrb[64].mxu0 %v4131_v18  ;;  %1918 = vmatmul.mubr.bf16.gmra.mrb[64].mxu1 %v4132_v19  ;;  %v395_v18 = vld [vmem:[#allocation2 + $0x10] sm:$0xff] }
  0xb8   : > { %3630 = vmatprep.mubr.msk.bf16.mxu0 %vm1301_vm0, %v4133_v20  ;;  %3662 = vmatprep.mubr.msk.bf16.mxu1 %vm1301_vm0, %v4135_v21  ;;  %v459_v19 = vld [vmem:[#allocation2 + $0x210] sm:$0xff]  ;;  %v4864_v20 = vld [vmem:[%s5470_s2] ss:$0 sm:$0xff] }
  0xbf   : > { %1670 = vmatmul.mubr.bf16.gmra.mrb[68].mxu0 %v4137_v22  ;;  %1926 = vmatmul.mubr.bf16.gmra.mrb[68].mxu1 %v4138_v23  ;;  %v396_v23 = vld [vmem:[#allocation2 + $0x18] sm:$0xff] }
  0xc0   : > { %3631 = vmatprep.mubr.msk.bf16.mxu0 %vm1301_vm0, %v4139_v24  ;;  %3663 = vmatprep.mubr.msk.bf16.mxu1 %vm1301_vm0, %v4141_v25  ;;  %v460_v24 = vld [vmem:[#allocation2 + $0x218] sm:$0xff]  ;;  %v4203_v25 = vld [vmem:[%s4402_s11 + $0x1c0] ss:$8 sps:$4 sm:$0xff]  }
  0xc7   : > { %1678 = vmatmul.mubr.bf16.gmra.mrb[72].mxu0 %v4143_v26  ;;  %1934 = vmatmul.mubr.bf16.gmra.mrb[72].mxu1 %v4144_v27 }
  0xc8   : > { %3632 = vmatprep.mubr.msk.bf16.mxu0 %vm1301_vm0, %v4145_v28  ;;  %3664 = vmatprep.mubr.msk.bf16.mxu1 %vm1301_vm0, %v4147_v29 }
  0xcf   : > { %1686 = vmatmul.mubr.bf16.gmra.mrb[76].mxu0 %v4149_v30  ;;  %1942 = vmatmul.mubr.bf16.gmra.mrb[76].mxu1 %v4150_v31  ;;  %v4204_v30 = vld [vmem:[%s4402_s11 + $0x3c0] ss:$8 sps:$4 sm:$0xff]   ;;  %v4205_v31 = vld [vmem:[%s4402_s11 + $0x1d4] ss:$8 sps:$4 sm:$0xff]  }
  0xd0   : > { %3633 = vmatprep.mubr.msk.bf16.mxu0 %vm1301_vm0, %v4151_v32  ;;  %3665 = vmatprep.mubr.msk.bf16.mxu1 %vm1301_vm0, %v4153_v33 }
  0xd7   : > { %1694 = vmatmul.mubr.bf16.gmra.mrb[80].mxu0 %v4155_v34  ;;  %1950 = vmatmul.mubr.bf16.gmra.mrb[80].mxu1 %v4156_v35 }
  0xd8   : > { %3634 = vmatprep.mubr.msk.bf16.mxu0 %vm1301_vm0, %v4157_v36  ;;  %3666 = vmatprep.mubr.msk.bf16.mxu1 %vm1301_vm0, %v4159_v37  ;;  %v4207_v36 = vld [vmem:[%s4402_s11 + $0x3d4] ss:$8 sps:$4 sm:$0xff]  }
  0xdf   : > { %1702 = vmatmul.mubr.bf16.gmra.mrb[84].mxu0 %v4161_v38  ;;  %1958 = vmatmul.mubr.bf16.gmra.mrb[84].mxu1 %v4162_v39 }
  0xe0   : > { %3635 = vmatprep.mubr.msk.bf16.mxu0 %vm1301_vm0, %v4163_v40  ;;  %3667 = vmatprep.mubr.msk.bf16.mxu1 %vm1301_vm0, %v4165_v41 }
  0xe7   : > { %1710 = vmatmul.mubr.bf16.gmra.mrb[88].mxu0 %v4167_v42  ;;  %1966 = vmatmul.mubr.bf16.gmra.mrb[88].mxu1 %v4168_v43 }
  0xe8   : > { %3636 = vmatprep.mubr.msk.bf16.mxu0 %vm1301_vm0, %v4169_v44  ;;  %3668 = vmatprep.mubr.msk.bf16.mxu1 %vm1301_vm0, %v4171_v45 }
  0xef   : > { %1718 = vmatmul.mubr.bf16.gmra.mrb[92].mxu0 %v4173_v46  ;;  %1974 = vmatmul.mubr.bf16.gmra.mrb[92].mxu1 %v4174_v47 }
  0xf0   : > { %3637 = vmatprep.mubr.msk.bf16.mxu0 %vm1301_vm0, %v4175_v48  ;;  %3669 = vmatprep.mubr.msk.bf16.mxu1 %vm1301_vm0, %v4177_v49  ;;  %v397_v49 = vld [vmem:[#allocation2 + $0x20] sm:$0xff] }
  0xf7   : > { %1726 = vmatmul.mubr.bf16.gmra.mrb[96].mxu0 %v4179_v50  ;;  %1982 = vmatmul.mubr.bf16.gmra.mrb[96].mxu1 %v4180_v51  ;;  %v461_v50 = vld [vmem:[#allocation2 + $0x220] sm:$0xff] }
  0xf8   : > { %3638 = vmatprep.mubr.msk.bf16.mxu0 %vm1301_vm0, %v4181_v52  ;;  %3670 = vmatprep.mubr.msk.bf16.mxu1 %vm1301_vm0, %v4183_v53 }
  0xff   : > { %1734 = vmatmul.mubr.bf16.gmra.mrb[100].mxu0 %v4185_v54  ;;  %1990 = vmatmul.mubr.bf16.gmra.mrb[100].mxu1 %v4186_v55 }
 0x100   : > { %3639 = vmatprep.mubr.msk.bf16.mxu0 %vm1301_vm0, %v4187_v56  ;;  %3671 = vmatprep.mubr.msk.bf16.mxu1 %vm1301_vm0, %v4189_v57  ;;  %v398_v57 = vld [vmem:[#allocation2 + $0x28] sm:$0xff] }
 0x107   : > { %1742 = vmatmul.mubr.bf16.gmra.mrb[104].mxu0 %v4191_v58  ;;  %1998 = vmatmul.mubr.bf16.gmra.mrb[104].mxu1 %v4192_v59  ;;  %v462_v58 = vld [vmem:[#allocation2 + $0x228] sm:$0xff]  ;;  %v4209_v59 = vld [vmem:[%s4402_s11 + $0x1d0] ss:$8 sps:$4 sm:$0xff]  }
 0x108   : > { %3640 = vmatprep.mubr.msk.bf16.mxu0 %vm1301_vm0, %v4193_v60  ;;  %3672 = vmatprep.mubr.msk.bf16.mxu1 %vm1301_vm0, %v4195_v61 }
 0x10a   : > { %v1535_v0 = vpop.f32.mrb[0].mxu0  ;;  %v1791_v1 = vpop.f32.mrb[0].mxu1 }
 0x10b   : > { %v2046_v4 = vadd.f32 %v1535_v0, %v393_v62  ;;  %v2110_v5 = vadd.f32 %v1791_v1, %v457_v63  ;;  %v1537_v6 = vpop.f32.mrb[1].mxu0  ;;  %v1793_v7 = vpop.f32.mrb[1].mxu1 }
 0x10c   : > { %v1538_v10 = vpop.f32.mrb[2].mxu0  ;;  %v1794_v11 = vpop.f32.mrb[2].mxu1 }
 0x10d   : > { %2175 = vst.msk [vmem:[#allocation2] sm:$0xff] %vm264_vm3, %v2046_v4  ;;  %2239 = vst.msk [vmem:[#allocation2 + $0x200] sm:$0xff] %vm264_vm3, %v2110_v5  ;;  %v2047_v14 = vadd.f32 %v1538_v10, %v394_v2  ;;  %v2111_v15 = vadd.f32 %v1794_v11, %v458_v3  ;;  %v1540_v16 = vpop.f32.mrb[3].mxu0  ;;  %v1796_v17 = vpop.f32.mrb[3].mxu1  ;;  %v4210_v2 = vld [vmem:[%s4402_s11 + $0x3d0] ss:$8 sps:$4 sm:$0xff]  }
 0x10e   : > { %v4211_v3 = vld [vmem:[%s4402_s11 + $0x1e4] ss:$8 sps:$4 sm:$0xff]  }
 0x10f   : > { %2176 = vst.msk [vmem:[#allocation2 + $0x8] sm:$0xff] %vm264_vm3, %v2047_v14  ;;  %2240 = vst.msk [vmem:[#allocation2 + $0x208] sm:$0xff] %vm264_vm3, %v2111_v15  ;;  %1750 = vmatmul.mubr.bf16.gmra.mrb[108].mxu0 %v4197_v8  ;;  %2006 = vmatmul.mubr.bf16.gmra.mrb[108].mxu1 %v4198_v9  ;;  %v4213_v8 = vld [vmem:[%s4402_s11 + $0x3e4] ss:$8 sps:$4 sm:$0xff]  }
 0x110   : > { %3641 = vmatprep.mubr.msk.bf16.mxu0 %vm1301_vm0, %v4199_v12  ;;  %3673 = vmatprep.mubr.msk.bf16.mxu1 %vm1301_vm0, %v4201_v13 }
 0x112   : > { %v1543_v21 = vpop.f32.mrb[4].mxu0  ;;  %v1799_v22 = vpop.f32.mrb[4].mxu1 }
 0x113   : > { %v2048_v26 = vadd.f32 %v1543_v21, %v395_v18  ;;  %v2112_v27 = vadd.f32 %v1799_v22, %v459_v19  ;;  %v1545_v28 = vpop.f32.mrb[5].mxu0  ;;  %v1801_v29 = vpop.f32.mrb[5].mxu1  ;;  %v399_v22 = vld [vmem:[#allocation2 + $0x30] sm:$0xff] }
 0x114   : > { %v2306_v32 = vld [vmem:[#allocation2] sm:$0xff]  ;;  %v1546_v34 = vpop.f32.mrb[6].mxu0  ;;  %v1802_v35 = vpop.f32.mrb[6].mxu1 }
 0x115   : > { %v2370_v33 = vld [vmem:[#allocation2 + $0x200] sm:$0xff]  ;;  %v2441_v37 = vadd.f32 %v4864_v20, %v2306_v32  ;;  %2177 = vst.msk [vmem:[#allocation2 + $0x10] sm:$0xff] %vm264_vm3, %v2048_v26  ;;  %2241 = vst.msk [vmem:[#allocation2 + $0x210] sm:$0xff] %vm264_vm3, %v2112_v27  ;;  %v2049_v39 = vadd.f32 %v1546_v34, %v396_v23  ;;  %v2113_v40 = vadd.f32 %v1802_v35, %v460_v24  ;;  %v1548_v41 = vpop.f32.mrb[7].mxu0  ;;  %v1804_v42 = vpop.f32.mrb[7].mxu1  ;;  %v463_v23 = vld [vmem:[#allocation2 + $0x230] sm:$0xff] }
 0x116   : > { %v2505_v38 = vadd.f32 %v4864_v20, %v2370_v33  ;;  %v2307_v43 = vld [vmem:[#allocation2 + $0x8] sm:$0xff] }
 0x117   : > { %v2371_v44 = vld [vmem:[#allocation2 + $0x208] sm:$0xff]  ;;  %v2569_v45 = vmax.f32 %v2441_v37, 0.0  ;;  %v2442_v47 = vadd.f32 %v4864_v20, %v2307_v43  ;;  %2178 = vst.msk [vmem:[#allocation2 + $0x18] sm:$0xff] %vm264_vm3, %v2049_v39  ;;  %2242 = vst.msk [vmem:[#allocation2 + $0x218] sm:$0xff] %vm264_vm3, %v2113_v40  ;;  %1758 = vmatmul.mubr.bf16.gmra.mrb[112].mxu0 %v4203_v25  ;;  %2014 = vmatmul.mubr.bf16.gmra.mrb[112].mxu1 %v4204_v30  ;;  %v400_v30 = vld [vmem:[#allocation2 + $0x38] sm:$0xff] }
 0x118   : > { %v2633_v46 = vmax.f32 %v2505_v38, 0.0  ;;  %v2506_v48 = vadd.f32 %v4864_v20, %v2371_v44  ;;  %3642 = vmatprep.mubr.msk.bf16.mxu0 %vm1301_vm0, %v4205_v31  ;;  %3674 = vmatprep.mubr.msk.bf16.mxu1 %vm1301_vm0, %v4207_v36  ;;  %v464_v31 = vld [vmem:[#allocation2 + $0x238] sm:$0xff]  ;;  %v4215_v32 = vld [vmem:[%s4402_s11 + $0x1e0] ss:$8 sps:$4 sm:$0xff]  }
 0x119   : > { %v3812_v51 = vpack.c.bf16 %v2569_v45, %v2569_v45  ;;  %v2570_v53 = vmax.f32 %v2442_v47, 0.0  ;;  %v4216_v39 = vld [vmem:[%s4402_s11 + $0x3e0] ss:$8 sps:$4 sm:$0xff]   ;;  %v4217_v40 = vld [vmem:[%s4402_s11 + $0x1f4] ss:$8 sps:$4 sm:$0xff]  }
 0x11a   : > { %v3876_v52 = vpack.c.bf16 %v2633_v46, %v2633_v46  ;;  %v2634_v54 = vmax.f32 %v2506_v48, 0.0  ;;  %v1551_v55 = vpop.f32.mrb[8].mxu0  ;;  %v1807_v56 = vpop.f32.mrb[8].mxu1  ;;  %v4219_v45 = vld [vmem:[%s4402_s11 + $0x3f4] ss:$8 sps:$4 sm:$0xff]  }
 0x11b   : > { %3210 = vst.msk [vmem:[%s4886_s18] sm:$0xf] %vm3209_vm4, %v3812_v51  ;;  %v3813_v60 = vpack.c.bf16 %v2570_v53, %v2570_v53  ;;  %v2050_v62 = vadd.f32 %v1551_v55, %v397_v49  ;;  %v2114_v63 = vadd.f32 %v1807_v56, %v461_v50  ;;  %v1553_v0 = vpop.f32.mrb[9].mxu0  ;;  %v1809_v1 = vpop.f32.mrb[9].mxu1 }
 0x11c   : > { %3274 = vst.msk [vmem:[%s4886_s18 + $0x100] sm:$0xf] %vm3209_vm4, %v3876_v52  ;;  %v3877_v61 = vpack.c.bf16 %v2634_v54, %v2634_v54  ;;  %v2308_v4 = vld [vmem:[#allocation2 + $0x10] sm:$0xff]  ;;  %v1554_v6 = vpop.f32.mrb[10].mxu0  ;;  %v1810_v7 = vpop.f32.mrb[10].mxu1 }
 0x11d   : > { %v2372_v5 = vld [vmem:[#allocation2 + $0x210] sm:$0xff]  ;;  %3211 = vst.msk [vmem:[%s4886_s18 + $0x4] sm:$0xf] %vm3209_vm4, %v3813_v60  ;;  %v2443_v9 = vadd.f32 %v4864_v20, %v2308_v4  ;;  %v2051_v11 = vadd.f32 %v1554_v6, %v398_v57  ;;  %v2115_v12 = vadd.f32 %v1810_v7, %v462_v58  ;;  %v1556_v13 = vpop.f32.mrb[11].mxu0  ;;  %v1812_v14 = vpop.f32.mrb[11].mxu1  ;;  %v401_v58 = vld [vmem:[#allocation2 + $0x40] sm:$0xff] }
 0x11e   : > { %3275 = vst.msk [vmem:[%s4886_s18 + $0x104] sm:$0xf] %vm3209_vm4, %v3877_v61  ;;  %v2507_v10 = vadd.f32 %v4864_v20, %v2372_v5  ;;  %v2309_v15 = vld [vmem:[#allocation2 + $0x18] sm:$0xff] }
 0x11f   : > { %2179 = vst.msk [vmem:[#allocation2 + $0x20] sm:$0xff] %vm264_vm3, %v2050_v62  ;;  %2243 = vst.msk [vmem:[#allocation2 + $0x220] sm:$0xff] %vm264_vm3, %v2114_v63  ;;  %v2373_v16 = vld [vmem:[#allocation2 + $0x218] sm:$0xff]  ;;  %v2571_v17 = vmax.f32 %v2443_v9, 0.0  ;;  %v2444_v19 = vadd.f32 %v4864_v20, %v2309_v15  ;;  %1766 = vmatmul.mubr.bf16.gmra.mrb[116].mxu0 %v4209_v59  ;;  %2022 = vmatmul.mubr.bf16.gmra.mrb[116].mxu1 %v4210_v2  ;;  %v465_v59 = vld [vmem:[#allocation2 + $0x240] sm:$0xff] }
 0x120   : > { %v2635_v18 = vmax.f32 %v2507_v10, 0.0  ;;  %v2508_v21 = vadd.f32 %v4864_v20, %v2373_v16  ;;  %2180 = vst.msk [vmem:[#allocation2 + $0x28] sm:$0xff] %vm264_vm3, %v2051_v11  ;;  %2244 = vst.msk [vmem:[#allocation2 + $0x228] sm:$0xff] %vm264_vm3, %v2115_v12  ;;  %3643 = vmatprep.mubr.msk.bf16.mxu0 %vm1301_vm0, %v4211_v3  ;;  %3675 = vmatprep.mubr.msk.bf16.mxu1 %vm1301_vm0, %v4213_v8  ;;  %v402_v2 = vld [vmem:[#allocation2 + $0x48] sm:$0xff]  ;;  %v4221_v10 = vld [vmem:[%s4402_s11 + $0x1f0] ss:$8 sps:$4 sm:$0xff]  }
 0x121   : > { %v3814_v24 = vpack.c.bf16 %v2571_v17, %v2571_v17  ;;  %v2572_v26 = vmax.f32 %v2444_v19, 0.0  ;;  %v466_v3 = vld [vmem:[#allocation2 + $0x248] sm:$0xff]  ;;  %v4222_v11 = vld [vmem:[%s4402_s11 + $0x3f0] ss:$8 sps:$4 sm:$0xff]  }
 0x122   : > { %v3878_v25 = vpack.c.bf16 %v2635_v18, %v2635_v18  ;;  %v2636_v27 = vmax.f32 %v2508_v21, 0.0  ;;  %v1559_v28 = vpop.f32.mrb[12].mxu0  ;;  %v1815_v29 = vpop.f32.mrb[12].mxu1 }
 0x123   : > { %3212 = vst.msk [vmem:[%s4886_s18 + $0x8] sm:$0xf] %vm3209_vm4, %v3814_v24  ;;  %v3815_v33 = vpack.c.bf16 %v2572_v26, %v2572_v26  ;;  %v2052_v35 = vadd.f32 %v1559_v28, %v399_v22  ;;  %v2116_v36 = vadd.f32 %v1815_v29, %v463_v23  ;;  %v1561_v37 = vpop.f32.mrb[13].mxu0  ;;  %v1817_v38 = vpop.f32.mrb[13].mxu1  ;;  %v403_v29 = vld [vmem:[#allocation2 + $0x50] sm:$0xff] }
 0x124   : > { %3276 = vst.msk [vmem:[%s4886_s18 + $0x108] sm:$0xf] %vm3209_vm4, %v3878_v25  ;;  %v3879_v34 = vpack.c.bf16 %v2636_v27, %v2636_v27  ;;  %v1562_v43 = vpop.f32.mrb[14].mxu0  ;;  %v1818_v44 = vpop.f32.mrb[14].mxu1  ;;  %v404_v37 = vld [vmem:[#allocation2 + $0x58] sm:$0xff] }
 0x125   : > { %3213 = vst.msk [vmem:[%s4886_s18 + $0xc] sm:$0xf] %vm3209_vm4, %v3815_v33  ;;  %v2053_v48 = vadd.f32 %v1562_v43, %v400_v30  ;;  %v2117_v49 = vadd.f32 %v1818_v44, %v464_v31  ;;  %v1564_v50 = vpop.f32.mrb[15].mxu0  ;;  %v1820_v51 = vpop.f32.mrb[15].mxu1  ;;  %v467_v30 = vld [vmem:[#allocation2 + $0x250] sm:$0xff]  ;;  %v468_v38 = vld [vmem:[#allocation2 + $0x258] sm:$0xff] }
 0x126   : > { %v2310_v41 = vld [vmem:[#allocation2 + $0x20] sm:$0xff]  ;;  %3277 = vst.msk [vmem:[%s4886_s18 + $0x10c] sm:$0xf] %vm3209_vm4, %v3879_v34 }
 0x127   : > { %v2374_v42 = vld [vmem:[#allocation2 + $0x220] sm:$0xff]  ;;  %v2445_v46 = vadd.f32 %v4864_v20, %v2310_v41  ;;  %2181 = vst.msk [vmem:[#allocation2 + $0x30] sm:$0xff] %vm264_vm3, %v2052_v35  ;;  %2245 = vst.msk [vmem:[#allocation2 + $0x230] sm:$0xff] %vm264_vm3, %v2116_v36  ;;  %v2311_v52 = vld [vmem:[#allocation2 + $0x28] sm:$0xff]  ;;  %1774 = vmatmul.mubr.bf16.gmra.mrb[120].mxu0 %v4215_v32  ;;  %2030 = vmatmul.mubr.bf16.gmra.mrb[120].mxu1 %v4216_v39 }
 0x128   : > { %v2509_v47 = vadd.f32 %v4864_v20, %v2374_v42  ;;  %v2375_v53 = vld [vmem:[#allocation2 + $0x228] sm:$0xff]  ;;  %v2446_v56 = vadd.f32 %v4864_v20, %v2311_v52  ;;  %2182 = vst.msk [vmem:[#allocation2 + $0x38] sm:$0xff] %vm264_vm3, %v2053_v48  ;;  %2246 = vst.msk [vmem:[#allocation2 + $0x238] sm:$0xff] %vm264_vm3, %v2117_v49  ;;  %3644 = vmatprep.mubr.msk.bf16.mxu0 %vm1301_vm0, %v4217_v40  ;;  %3676 = vmatprep.mubr.msk.bf16.mxu1 %vm1301_vm0, %v4219_v45 }
 0x129   : > { %v2573_v54 = vmax.f32 %v2445_v46, 0.0  ;;  %v2510_v57 = vadd.f32 %v4864_v20, %v2375_v53 }
 0x12a   : > { %v2637_v55 = vmax.f32 %v2509_v47, 0.0  ;;  %v2574_v62 = vmax.f32 %v2446_v56, 0.0  ;;  %v1567_v0 = vpop.f32.mrb[16].mxu0  ;;  %v1823_v1 = vpop.f32.mrb[16].mxu1 }
 0x12b   : > { %v3816_v60 = vpack.c.bf16 %v2573_v54, %v2573_v54  ;;  %v2638_v63 = vmax.f32 %v2510_v57, 0.0  ;;  %v2054_v6 = vadd.f32 %v1567_v0, %v401_v58  ;;  %v2118_v7 = vadd.f32 %v1823_v1, %v465_v59  ;;  %v1569_v8 = vpop.f32.mrb[17].mxu0  ;;  %v1825_v9 = vpop.f32.mrb[17].mxu1 }
 0x12c   : > { %v3880_v61 = vpack.c.bf16 %v2637_v55, %v2637_v55  ;;  %v3817_v4 = vpack.c.bf16 %v2574_v62, %v2574_v62  ;;  %v1570_v14 = vpop.f32.mrb[18].mxu0  ;;  %v1826_v15 = vpop.f32.mrb[18].mxu1  ;;  %v469_v62 = vld [vmem:[#allocation2 + $0x260] sm:$0xff] }
 0x12d   : > { %3214 = vst.msk [vmem:[%s4886_s18 + $0x10] sm:$0xf] %vm3209_vm4, %v3816_v60  ;;  %v3881_v5 = vpack.c.bf16 %v2638_v63, %v2638_v63  ;;  %v2055_v18 = vadd.f32 %v1570_v14, %v402_v2  ;;  %v2119_v19 = vadd.f32 %v1826_v15, %v466_v3  ;;  %v1572_v21 = vpop.f32.mrb[19].mxu0  ;;  %v1828_v22 = vpop.f32.mrb[19].mxu1 }
 0x12e   : > { %3278 = vst.msk [vmem:[%s4886_s18 + $0x110] sm:$0xf] %vm3209_vm4, %v3880_v61  ;;  %v2312_v12 = vld [vmem:[#allocation2 + $0x30] sm:$0xff]  ;;  %3215 = vst.msk [vmem:[%s4886_s18 + $0x14] sm:$0xf] %vm3209_vm4, %v3817_v4  ;;  %v405_v61 = vld [vmem:[#allocation2 + $0x60] sm:$0xff] }
 0x12f   : > { %v2376_v13 = vld [vmem:[#allocation2 + $0x230] sm:$0xff]  ;;  %3279 = vst.msk [vmem:[%s4886_s18 + $0x114] sm:$0xf] %vm3209_vm4, %v3881_v5  ;;  %v2447_v16 = vadd.f32 %v4864_v20, %v2312_v12  ;;  %v2313_v23 = vld [vmem:[#allocation2 + $0x38] sm:$0xff]  ;;  %1782 = vmatmul.mubr.bf16.gmra.mrb[124].mxu0 %v4221_v10  ;;  %2038 = vmatmul.mubr.bf16.gmra.mrb[124].mxu1 %v4222_v11  ;;  %v406_v5 = vld [vmem:[#allocation2 + $0x68] sm:$0xff] }
 0x130   : > { %v2511_v17 = vadd.f32 %v4864_v20, %v2376_v13  ;;  %2183 = vst.msk [vmem:[#allocation2 + $0x40] sm:$0xff] %vm264_vm3, %v2054_v6  ;;  %2247 = vst.msk [vmem:[#allocation2 + $0x240] sm:$0xff] %vm264_vm3, %v2118_v7  ;;  %v2377_v24 = vld [vmem:[#allocation2 + $0x238] sm:$0xff]  ;;  %v2448_v27 = vadd.f32 %v4864_v20, %v2313_v23  ;;  %v470_v6 = vld [vmem:[#allocation2 + $0x268] sm:$0xff] }
 0x131   : > { %v2575_v25 = vmax.f32 %v2447_v16, 0.0  ;;  %v2512_v28 = vadd.f32 %v4864_v20, %v2377_v24  ;;  %2184 = vst.msk [vmem:[#allocation2 + $0x48] sm:$0xff] %vm264_vm3, %v2055_v18  ;;  %2248 = vst.msk [vmem:[#allocation2 + $0x248] sm:$0xff] %vm264_vm3, %v2119_v19 }
 0x132   : > { %v2639_v26 = vmax.f32 %v2511_v17, 0.0  ;;  %v2576_v33 = vmax.f32 %v2448_v27, 0.0  ;;  %v1575_v35 = vpop.f32.mrb[20].mxu0  ;;  %v1831_v36 = vpop.f32.mrb[20].mxu1 }
 0x133   : > { %v3818_v31 = vpack.c.bf16 %v2575_v25, %v2575_v25  ;;  %v2640_v34 = vmax.f32 %v2512_v28, 0.0  ;;  %v2056_v41 = vadd.f32 %v1575_v35, %v403_v29  ;;  %v2120_v42 = vadd.f32 %v1831_v36, %v467_v30  ;;  %v1577_v43 = vpop.f32.mrb[21].mxu0  ;;  %v1833_v44 = vpop.f32.mrb[21].mxu1  ;;  %v407_v30 = vld [vmem:[#allocation2 + $0x70] sm:$0xff] }
 0x134   : > { %v3882_v32 = vpack.c.bf16 %v2639_v26, %v2639_v26  ;;  %v3819_v39 = vpack.c.bf16 %v2576_v33, %v2576_v33  ;;  %v1578_v47 = vpop.f32.mrb[22].mxu0  ;;  %v1834_v48 = vpop.f32.mrb[22].mxu1 }
 0x135   : > { %3216 = vst.msk [vmem:[%s4886_s18 + $0x18] sm:$0xf] %vm3209_vm4, %v3818_v31  ;;  %v3883_v40 = vpack.c.bf16 %v2640_v34, %v2640_v34  ;;  %v2057_v51 = vadd.f32 %v1578_v47, %v404_v37  ;;  %v2121_v52 = vadd.f32 %v1834_v48, %v468_v38  ;;  %v1580_v53 = vpop.f32.mrb[23].mxu0  ;;  %v1836_v54 = vpop.f32.mrb[23].mxu1  ;;  %v471_v31 = vld [vmem:[#allocation2 + $0x270] sm:$0xff]  ;;  %v408_v38 = vld [vmem:[#allocation2 + $0x78] sm:$0xff] }
 0x136   : > { %3280 = vst.msk [vmem:[%s4886_s18 + $0x118] sm:$0xf] %vm3209_vm4, %v3882_v32  ;;  %3217 = vst.msk [vmem:[%s4886_s18 + $0x1c] sm:$0xf] %vm3209_vm4, %v3819_v39  ;;  %v472_v39 = vld [vmem:[#allocation2 + $0x278] sm:$0xff] }
 0x137   : > { %v2314_v45 = vld [vmem:[#allocation2 + $0x40] sm:$0xff]  ;;  %3281 = vst.msk [vmem:[%s4886_s18 + $0x11c] sm:$0xf] %vm3209_vm4, %v3883_v40 }
 0x138   : > { %v2378_v46 = vld [vmem:[#allocation2 + $0x240] sm:$0xff]  ;;  %v2449_v49 = vadd.f32 %v4864_v20, %v2314_v45  ;;  %2185 = vst.msk [vmem:[#allocation2 + $0x50] sm:$0xff] %vm264_vm3, %v2056_v41  ;;  %2249 = vst.msk [vmem:[#allocation2 + $0x250] sm:$0xff] %vm264_vm3, %v2120_v42  ;;  %v2315_v55 = vld [vmem:[#allocation2 + $0x48] sm:$0xff] }
 0x139   : > { %v2513_v50 = vadd.f32 %v4864_v20, %v2378_v46  ;;  %v2379_v56 = vld [vmem:[#allocation2 + $0x248] sm:$0xff]  ;;  %v2450_v59 = vadd.f32 %v4864_v20, %v2315_v55  ;;  %2186 = vst.msk [vmem:[#allocation2 + $0x58] sm:$0xff] %vm264_vm3, %v2057_v51  ;;  %2250 = vst.msk [vmem:[#allocation2 + $0x258] sm:$0xff] %vm264_vm3, %v2121_v52 }
 0x13a   : > { %v2577_v57 = vmax.f32 %v2449_v49, 0.0  ;;  %v2514_v60 = vadd.f32 %v4864_v20, %v2379_v56  ;;  %v1583_v3 = vpop.f32.mrb[24].mxu0  ;;  %v1839_v4 = vpop.f32.mrb[24].mxu1 }
 0x13b   : > { %v2641_v58 = vmax.f32 %v2513_v50, 0.0  ;;  %v2578_v1 = vmax.f32 %v2450_v59, 0.0  ;;  %v2058_v9 = vadd.f32 %v1583_v3, %v405_v61  ;;  %v2122_v10 = vadd.f32 %v1839_v4, %v469_v62  ;;  %v1585_v11 = vpop.f32.mrb[25].mxu0  ;;  %v1841_v12 = vpop.f32.mrb[25].mxu1  ;;  %v409_v62 = vld [vmem:[#allocation2 + $0x80] sm:$0xff] }
 0x13c   : > { %v3820_v63 = vpack.c.bf16 %v2577_v57, %v2577_v57  ;;  %v2642_v2 = vmax.f32 %v2514_v60, 0.0  ;;  %v1586_v15 = vpop.f32.mrb[26].mxu0  ;;  %v1842_v16 = vpop.f32.mrb[26].mxu1 }
 0x13d   : > { %v3884_v0 = vpack.c.bf16 %v2641_v58, %v2641_v58  ;;  %v3821_v7 = vpack.c.bf16 %v2578_v1, %v2578_v1  ;;  %2187 = vst.msk [vmem:[#allocation2 + $0x60] sm:$0xff] %vm264_vm3, %v2058_v9  ;;  %2251 = vst.msk [vmem:[#allocation2 + $0x260] sm:$0xff] %vm264_vm3, %v2122_v10  ;;  %v2059_v19 = vadd.f32 %v1586_v15, %v406_v5  ;;  %v1588_v22 = vpop.f32.mrb[27].mxu0  ;;  %v1844_v23 = vpop.f32.mrb[27].mxu1 }
 0x13e   : > { %3218 = vst.msk [vmem:[%s4886_s18 + $0x20] sm:$0xf] %vm3209_vm4, %v3820_v63  ;;  %v3885_v8 = vpack.c.bf16 %v2642_v2, %v2642_v2  ;;  %v2123_v21 = vadd.f32 %v1842_v16, %v470_v6  ;;  %v473_v63 = vld [vmem:[#allocation2 + $0x280] sm:$0xff]  ;;  %v410_v6 = vld [vmem:[#allocation2 + $0x88] sm:$0xff] }
 0x13f   : > { %3282 = vst.msk [vmem:[%s4886_s18 + $0x120] sm:$0xf] %vm3209_vm4, %v3884_v0  ;;  %v2316_v13 = vld [vmem:[#allocation2 + $0x50] sm:$0xff]  ;;  %3219 = vst.msk [vmem:[%s4886_s18 + $0x24] sm:$0xf] %vm3209_vm4, %v3821_v7  ;;  %v474_v7 = vld [vmem:[#allocation2 + $0x288] sm:$0xff] }
 0x140   : > { %v2380_v14 = vld [vmem:[#allocation2 + $0x250] sm:$0xff]  ;;  %3283 = vst.msk [vmem:[%s4886_s18 + $0x124] sm:$0xf] %vm3209_vm4, %v3885_v8  ;;  %v2451_v17 = vadd.f32 %v4864_v20, %v2316_v13  ;;  %v2317_v24 = vld [vmem:[#allocation2 + $0x58] sm:$0xff] }
 0x141   : > { %v2515_v18 = vadd.f32 %v4864_v20, %v2380_v14  ;;  %v2381_v25 = vld [vmem:[#allocation2 + $0x258] sm:$0xff]  ;;  %v2452_v28 = vadd.f32 %v4864_v20, %v2317_v24  ;;  %2188 = vst.msk [vmem:[#allocation2 + $0x68] sm:$0xff] %vm264_vm3, %v2059_v19  ;;  %2252 = vst.msk [vmem:[#allocation2 + $0x268] sm:$0xff] %vm264_vm3, %v2123_v21 }
 0x142   : > { %v2579_v26 = vmax.f32 %v2451_v17, 0.0  ;;  %v2516_v29 = vadd.f32 %v4864_v20, %v2381_v25  ;;  %v1591_v36 = vpop.f32.mrb[28].mxu0  ;;  %v1847_v37 = vpop.f32.mrb[28].mxu1 }
 0x143   : > { %v2643_v27 = vmax.f32 %v2515_v18, 0.0  ;;  %v2580_v34 = vmax.f32 %v2452_v28, 0.0  ;;  %v2060_v42 = vadd.f32 %v1591_v36, %v407_v30  ;;  %v2124_v43 = vadd.f32 %v1847_v37, %v471_v31  ;;  %v1593_v44 = vpop.f32.mrb[29].mxu0  ;;  %v1849_v45 = vpop.f32.mrb[29].mxu1  ;;  %v411_v31 = vld [vmem:[#allocation2 + $0x90] sm:$0xff] }
 0x144   : > { %v3822_v32 = vpack.c.bf16 %v2579_v26, %v2579_v26  ;;  %v2644_v35 = vmax.f32 %v2516_v29, 0.0  ;;  %v2318_v46 = vld [vmem:[#allocation2 + $0x60] sm:$0xff]  ;;  %v1594_v48 = vpop.f32.mrb[30].mxu0  ;;  %v1850_v49 = vpop.f32.mrb[30].mxu1 }
 0x145   : > { %v3886_v33 = vpack.c.bf16 %v2643_v27, %v2643_v27  ;;  %v3823_v40 = vpack.c.bf16 %v2580_v34, %v2580_v34  ;;  %v2382_v47 = vld [vmem:[#allocation2 + $0x260] sm:$0xff]  ;;  %v2453_v50 = vadd.f32 %v4864_v20, %v2318_v46  ;;  %2189 = vst.msk [vmem:[#allocation2 + $0x70] sm:$0xff] %vm264_vm3, %v2060_v42  ;;  %2253 = vst.msk [vmem:[#allocation2 + $0x270] sm:$0xff] %vm264_vm3, %v2124_v43  ;;  %v1596_v54 = vpop.f32.mrb[31].mxu0  ;;  %v1852_v55 = vpop.f32.mrb[31].mxu1 }
 0x146   : > { %3220 = vst.msk [vmem:[%s4886_s18 + $0x28] sm:$0xf] %vm3209_vm4, %v3822_v32  ;;  %v3887_v41 = vpack.c.bf16 %v2644_v35, %v2644_v35  ;;  %v2517_v51 = vadd.f32 %v4864_v20, %v2382_v47  ;;  %v2061_v52 = vadd.f32 %v1594_v48, %v408_v38  ;;  %v2125_v53 = vadd.f32 %v1850_v49, %v472_v39  ;;  %v475_v32 = vld [vmem:[#allocation2 + $0x290] sm:$0xff]  ;;  %v412_v39 = vld [vmem:[#allocation2 + $0x98] sm:$0xff] }
 0x147   : > { %3284 = vst.msk [vmem:[%s4886_s18 + $0x128] sm:$0xf] %vm3209_vm4, %v3886_v33  ;;  %3221 = vst.msk [vmem:[%s4886_s18 + $0x2c] sm:$0xf] %vm3209_vm4, %v3823_v40  ;;  %v2581_v58 = vmax.f32 %v2453_v50, 0.0  ;;  %v476_v40 = vld [vmem:[#allocation2 + $0x298] sm:$0xff] }
 0x148   : > { %3285 = vst.msk [vmem:[%s4886_s18 + $0x12c] sm:$0xf] %vm3209_vm4, %v3887_v41  ;;  %v2319_v56 = vld [vmem:[#allocation2 + $0x68] sm:$0xff]  ;;  %v2645_v59 = vmax.f32 %v2517_v51, 0.0 }
 0x149   : > { %v2383_v57 = vld [vmem:[#allocation2 + $0x268] sm:$0xff]  ;;  %v2454_v60 = vadd.f32 %v4864_v20, %v2319_v56  ;;  %2190 = vst.msk [vmem:[#allocation2 + $0x78] sm:$0xff] %vm264_vm3, %v2061_v52  ;;  %2254 = vst.msk [vmem:[#allocation2 + $0x278] sm:$0xff] %vm264_vm3, %v2125_v53  ;;  %v3824_v0 = vpack.c.bf16 %v2581_v58, %v2581_v58 }
 0x14a   : > { %v2518_v61 = vadd.f32 %v4864_v20, %v2383_v57  ;;  %v3888_v1 = vpack.c.bf16 %v2645_v59, %v2645_v59  ;;  %v1599_v4 = vpop.f32.mrb[32].mxu0  ;;  %v1855_v5 = vpop.f32.mrb[32].mxu1 }
 0x14b   : > { %v2582_v2 = vmax.f32 %v2454_v60, 0.0  ;;  %3222 = vst.msk [vmem:[%s4886_s18 + $0x30] sm:$0xf] %vm3209_vm4, %v3824_v0  ;;  %v2062_v10 = vadd.f32 %v1599_v4, %v409_v62  ;;  %v2126_v11 = vadd.f32 %v1855_v5, %v473_v63  ;;  %v1601_v12 = vpop.f32.mrb[33].mxu0  ;;  %v1857_v13 = vpop.f32.mrb[33].mxu1  ;;  %v413_v63 = vld [vmem:[#allocation2 + $0xa0] sm:$0xff] }
 0x14c   : > { %v2646_v3 = vmax.f32 %v2518_v61, 0.0  ;;  %3286 = vst.msk [vmem:[%s4886_s18 + $0x130] sm:$0xf] %vm3209_vm4, %v3888_v1  ;;  %v2320_v14 = vld [vmem:[#allocation2 + $0x70] sm:$0xff]  ;;  %v1602_v16 = vpop.f32.mrb[34].mxu0  ;;  %v1858_v17 = vpop.f32.mrb[34].mxu1 }
 0x14d   : > { %v3825_v8 = vpack.c.bf16 %v2582_v2, %v2582_v2  ;;  %v2384_v15 = vld [vmem:[#allocation2 + $0x270] sm:$0xff]  ;;  %v2455_v18 = vadd.f32 %v4864_v20, %v2320_v14  ;;  %2191 = vst.msk [vmem:[#allocation2 + $0x80] sm:$0xff] %vm264_vm3, %v2062_v10  ;;  %2255 = vst.msk [vmem:[#allocation2 + $0x280] sm:$0xff] %vm264_vm3, %v2126_v11  ;;  %v2063_v21 = vadd.f32 %v1602_v16, %v410_v6  ;;  %v1604_v23 = vpop.f32.mrb[35].mxu0  ;;  %v1860_v24 = vpop.f32.mrb[35].mxu1  ;;  %v477_v0 = vld [vmem:[#allocation2 + $0x2a0] sm:$0xff] }
 0x14e   : > { %v3889_v9 = vpack.c.bf16 %v2646_v3, %v2646_v3  ;;  %v2519_v19 = vadd.f32 %v4864_v20, %v2384_v15  ;;  %v2127_v22 = vadd.f32 %v1858_v17, %v474_v7  ;;  %v414_v7 = vld [vmem:[#allocation2 + $0xa8] sm:$0xff] }
 0x14f   : > { %3223 = vst.msk [vmem:[%s4886_s18 + $0x34] sm:$0xf] %vm3209_vm4, %v3825_v8  ;;  %v2583_v27 = vmax.f32 %v2455_v18, 0.0  ;;  %v478_v8 = vld [vmem:[#allocation2 + $0x2a8] sm:$0xff] }
 0x150   : > { %3287 = vst.msk [vmem:[%s4886_s18 + $0x134] sm:$0xf] %vm3209_vm4, %v3889_v9  ;;  %v2321_v25 = vld [vmem:[#allocation2 + $0x78] sm:$0xff]  ;;  %v2647_v28 = vmax.f32 %v2519_v19, 0.0 }
 0x151   : > { %v2385_v26 = vld [vmem:[#allocation2 + $0x278] sm:$0xff]  ;;  %v2456_v29 = vadd.f32 %v4864_v20, %v2321_v25  ;;  %2192 = vst.msk [vmem:[#allocation2 + $0x88] sm:$0xff] %vm264_vm3, %v2063_v21  ;;  %2256 = vst.msk [vmem:[#allocation2 + $0x288] sm:$0xff] %vm264_vm3, %v2127_v22  ;;  %v3826_v33 = vpack.c.bf16 %v2583_v27, %v2583_v27 }
 0x152   : > { %v2520_v30 = vadd.f32 %v4864_v20, %v2385_v26  ;;  %v3890_v34 = vpack.c.bf16 %v2647_v28, %v2647_v28  ;;  %v1607_v37 = vpop.f32.mrb[36].mxu0  ;;  %v1863_v38 = vpop.f32.mrb[36].mxu1 }
 0x153   : > { %v2584_v35 = vmax.f32 %v2456_v29, 0.0  ;;  %3224 = vst.msk [vmem:[%s4886_s18 + $0x38] sm:$0xf] %vm3209_vm4, %v3826_v33  ;;  %v2064_v43 = vadd.f32 %v1607_v37, %v411_v31  ;;  %v2128_v44 = vadd.f32 %v1863_v38, %v475_v32  ;;  %v1609_v45 = vpop.f32.mrb[37].mxu0  ;;  %v1865_v46 = vpop.f32.mrb[37].mxu1  ;;  %v415_v32 = vld [vmem:[#allocation2 + $0xb0] sm:$0xff] }
 0x154   : > { %v2648_v36 = vmax.f32 %v2520_v30, 0.0  ;;  %3288 = vst.msk [vmem:[%s4886_s18 + $0x138] sm:$0xf] %vm3209_vm4, %v3890_v34  ;;  %v2322_v47 = vld [vmem:[#allocation2 + $0x80] sm:$0xff]  ;;  %v1610_v49 = vpop.f32.mrb[38].mxu0  ;;  %v1866_v50 = vpop.f32.mrb[38].mxu1 }
 0x155   : > { %v3827_v41 = vpack.c.bf16 %v2584_v35, %v2584_v35  ;;  %v2386_v48 = vld [vmem:[#allocation2 + $0x280] sm:$0xff]  ;;  %v2457_v51 = vadd.f32 %v4864_v20, %v2322_v47  ;;  %2193 = vst.msk [vmem:[#allocation2 + $0x90] sm:$0xff] %vm264_vm3, %v2064_v43  ;;  %2257 = vst.msk [vmem:[#allocation2 + $0x290] sm:$0xff] %vm264_vm3, %v2128_v44  ;;  %v2065_v53 = vadd.f32 %v1610_v49, %v412_v39  ;;  %v1612_v55 = vpop.f32.mrb[39].mxu0  ;;  %v1868_v56 = vpop.f32.mrb[39].mxu1  ;;  %v479_v33 = vld [vmem:[#allocation2 + $0x2b0] sm:$0xff] }
 0x156   : > { %v3891_v42 = vpack.c.bf16 %v2648_v36, %v2648_v36  ;;  %v2521_v52 = vadd.f32 %v4864_v20, %v2386_v48  ;;  %v2129_v54 = vadd.f32 %v1866_v50, %v476_v40  ;;  %v416_v40 = vld [vmem:[#allocation2 + $0xb8] sm:$0xff] }
 0x157   : > { %3225 = vst.msk [vmem:[%s4886_s18 + $0x3c] sm:$0xf] %vm3209_vm4, %v3827_v41  ;;  %v2585_v59 = vmax.f32 %v2457_v51, 0.0  ;;  %v480_v41 = vld [vmem:[#allocation2 + $0x2b8] sm:$0xff] }
 0x158   : > { %3289 = vst.msk [vmem:[%s4886_s18 + $0x13c] sm:$0xf] %vm3209_vm4, %v3891_v42  ;;  %v2323_v57 = vld [vmem:[#allocation2 + $0x88] sm:$0xff]  ;;  %v2649_v60 = vmax.f32 %v2521_v52, 0.0 }
 0x159   : > { %v2387_v58 = vld [vmem:[#allocation2 + $0x288] sm:$0xff]  ;;  %v2458_v61 = vadd.f32 %v4864_v20, %v2323_v57  ;;  %2194 = vst.msk [vmem:[#allocation2 + $0x98] sm:$0xff] %vm264_vm3, %v2065_v53  ;;  %2258 = vst.msk [vmem:[#allocation2 + $0x298] sm:$0xff] %vm264_vm3, %v2129_v54  ;;  %v3828_v1 = vpack.c.bf16 %v2585_v59, %v2585_v59 }
 0x15a   : > { %v2522_v62 = vadd.f32 %v4864_v20, %v2387_v58  ;;  %v3892_v2 = vpack.c.bf16 %v2649_v60, %v2649_v60  ;;  %v1615_v5 = vpop.f32.mrb[40].mxu0  ;;  %v1871_v6 = vpop.f32.mrb[40].mxu1 }
 0x15b   : > { %v2586_v3 = vmax.f32 %v2458_v61, 0.0  ;;  %3226 = vst.msk [vmem:[%s4886_s18 + $0x40] sm:$0xf] %vm3209_vm4, %v3828_v1  ;;  %v2066_v11 = vadd.f32 %v1615_v5, %v413_v63  ;;  %v2130_v12 = vadd.f32 %v1871_v6, %v477_v0  ;;  %v1617_v13 = vpop.f32.mrb[41].mxu0  ;;  %v1873_v14 = vpop.f32.mrb[41].mxu1  ;;  %v417_v0 = vld [vmem:[#allocation2 + $0xc0] sm:$0xff] }
 0x15c   : > { %v2650_v4 = vmax.f32 %v2522_v62, 0.0  ;;  %3290 = vst.msk [vmem:[%s4886_s18 + $0x140] sm:$0xf] %vm3209_vm4, %v3892_v2  ;;  %v2324_v15 = vld [vmem:[#allocation2 + $0x90] sm:$0xff]  ;;  %v1618_v17 = vpop.f32.mrb[42].mxu0  ;;  %v1874_v18 = vpop.f32.mrb[42].mxu1 }
 0x15d   : > { %v3829_v9 = vpack.c.bf16 %v2586_v3, %v2586_v3  ;;  %v2388_v16 = vld [vmem:[#allocation2 + $0x290] sm:$0xff]  ;;  %v2459_v19 = vadd.f32 %v4864_v20, %v2324_v15  ;;  %2195 = vst.msk [vmem:[#allocation2 + $0xa0] sm:$0xff] %vm264_vm3, %v2066_v11  ;;  %2259 = vst.msk [vmem:[#allocation2 + $0x2a0] sm:$0xff] %vm264_vm3, %v2130_v12  ;;  %v2067_v22 = vadd.f32 %v1618_v17, %v414_v7  ;;  %v1620_v24 = vpop.f32.mrb[43].mxu0  ;;  %v1876_v25 = vpop.f32.mrb[43].mxu1  ;;  %v481_v1 = vld [vmem:[#allocation2 + $0x2c0] sm:$0xff] }
 0x15e   : > { %v3893_v10 = vpack.c.bf16 %v2650_v4, %v2650_v4  ;;  %v2523_v21 = vadd.f32 %v4864_v20, %v2388_v16  ;;  %v2131_v23 = vadd.f32 %v1874_v18, %v478_v8  ;;  %v418_v8 = vld [vmem:[#allocation2 + $0xc8] sm:$0xff] }
 0x15f   : > { %3227 = vst.msk [vmem:[%s4886_s18 + $0x44] sm:$0xf] %vm3209_vm4, %v3829_v9  ;;  %v2587_v28 = vmax.f32 %v2459_v19, 0.0  ;;  %v482_v9 = vld [vmem:[#allocation2 + $0x2c8] sm:$0xff] }
 0x160   : > { %3291 = vst.msk [vmem:[%s4886_s18 + $0x144] sm:$0xf] %vm3209_vm4, %v3893_v10  ;;  %v2325_v26 = vld [vmem:[#allocation2 + $0x98] sm:$0xff]  ;;  %v2651_v29 = vmax.f32 %v2523_v21, 0.0 }
 0x161   : > { %v2389_v27 = vld [vmem:[#allocation2 + $0x298] sm:$0xff]  ;;  %v2460_v30 = vadd.f32 %v4864_v20, %v2325_v26  ;;  %2196 = vst.msk [vmem:[#allocation2 + $0xa8] sm:$0xff] %vm264_vm3, %v2067_v22  ;;  %2260 = vst.msk [vmem:[#allocation2 + $0x2a8] sm:$0xff] %vm264_vm3, %v2131_v23  ;;  %v3830_v34 = vpack.c.bf16 %v2587_v28, %v2587_v28 }
 0x162   : > { %v2524_v31 = vadd.f32 %v4864_v20, %v2389_v27  ;;  %v3894_v35 = vpack.c.bf16 %v2651_v29, %v2651_v29  ;;  %v1623_v38 = vpop.f32.mrb[44].mxu0  ;;  %v1879_v39 = vpop.f32.mrb[44].mxu1 }
 0x163   : > { %v2588_v36 = vmax.f32 %v2460_v30, 0.0  ;;  %3228 = vst.msk [vmem:[%s4886_s18 + $0x48] sm:$0xf] %vm3209_vm4, %v3830_v34  ;;  %v2068_v44 = vadd.f32 %v1623_v38, %v415_v32  ;;  %v2132_v45 = vadd.f32 %v1879_v39, %v479_v33  ;;  %v1625_v46 = vpop.f32.mrb[45].mxu0  ;;  %v1881_v47 = vpop.f32.mrb[45].mxu1  ;;  %v419_v33 = vld [vmem:[#allocation2 + $0xd0] sm:$0xff] }
 0x164   : > { %v2652_v37 = vmax.f32 %v2524_v31, 0.0  ;;  %3292 = vst.msk [vmem:[%s4886_s18 + $0x148] sm:$0xf] %vm3209_vm4, %v3894_v35  ;;  %v2326_v48 = vld [vmem:[#allocation2 + $0xa0] sm:$0xff]  ;;  %v1626_v50 = vpop.f32.mrb[46].mxu0  ;;  %v1882_v51 = vpop.f32.mrb[46].mxu1 }
 0x165   : > { %v3831_v42 = vpack.c.bf16 %v2588_v36, %v2588_v36  ;;  %v2390_v49 = vld [vmem:[#allocation2 + $0x2a0] sm:$0xff]  ;;  %v2461_v52 = vadd.f32 %v4864_v20, %v2326_v48  ;;  %2197 = vst.msk [vmem:[#allocation2 + $0xb0] sm:$0xff] %vm264_vm3, %v2068_v44  ;;  %2261 = vst.msk [vmem:[#allocation2 + $0x2b0] sm:$0xff] %vm264_vm3, %v2132_v45  ;;  %v2069_v54 = vadd.f32 %v1626_v50, %v416_v40  ;;  %v1628_v56 = vpop.f32.mrb[47].mxu0  ;;  %v1884_v57 = vpop.f32.mrb[47].mxu1  ;;  %v483_v34 = vld [vmem:[#allocation2 + $0x2d0] sm:$0xff] }
 0x166   : > { %v3895_v43 = vpack.c.bf16 %v2652_v37, %v2652_v37  ;;  %v2525_v53 = vadd.f32 %v4864_v20, %v2390_v49  ;;  %v2133_v55 = vadd.f32 %v1882_v51, %v480_v41  ;;  %v420_v41 = vld [vmem:[#allocation2 + $0xd8] sm:$0xff] }
 0x167   : > { %3229 = vst.msk [vmem:[%s4886_s18 + $0x4c] sm:$0xf] %vm3209_vm4, %v3831_v42  ;;  %v2589_v60 = vmax.f32 %v2461_v52, 0.0  ;;  %v484_v42 = vld [vmem:[#allocation2 + $0x2d8] sm:$0xff]  ;;  %v5088_v52 = vld [vmem:[%s5470_s2] ss:$0 sm:$0xff] }
 0x168   : > { %3293 = vst.msk [vmem:[%s4886_s18 + $0x14c] sm:$0xf] %vm3209_vm4, %v3895_v43  ;;  %v2327_v58 = vld [vmem:[#allocation2 + $0xa8] sm:$0xff]  ;;  %v2653_v61 = vmax.f32 %v2525_v53, 0.0 }
 0x169   : > { %v2391_v59 = vld [vmem:[#allocation2 + $0x2a8] sm:$0xff]  ;;  %v2462_v62 = vadd.f32 %v4864_v20, %v2327_v58  ;;  %2198 = vst.msk [vmem:[#allocation2 + $0xb8] sm:$0xff] %vm264_vm3, %v2069_v54  ;;  %2262 = vst.msk [vmem:[#allocation2 + $0x2b8] sm:$0xff] %vm264_vm3, %v2133_v55  ;;  %v3832_v2 = vpack.c.bf16 %v2589_v60, %v2589_v60 }
 0x16a   : > { %v2526_v63 = vadd.f32 %v4864_v20, %v2391_v59  ;;  %v3896_v3 = vpack.c.bf16 %v2653_v61, %v2653_v61  ;;  %v1631_v6 = vpop.f32.mrb[48].mxu0  ;;  %v1887_v7 = vpop.f32.mrb[48].mxu1 }
 0x16b   : > { %v2590_v4 = vmax.f32 %v2462_v62, 0.0  ;;  %3230 = vst.msk [vmem:[%s4886_s18 + $0x50] sm:$0xf] %vm3209_vm4, %v3832_v2  ;;  %v2070_v12 = vadd.f32 %v1631_v6, %v417_v0  ;;  %v2134_v13 = vadd.f32 %v1887_v7, %v481_v1  ;;  %v1633_v14 = vpop.f32.mrb[49].mxu0  ;;  %v1889_v15 = vpop.f32.mrb[49].mxu1  ;;  %v421_v1 = vld [vmem:[#allocation2 + $0xe0] sm:$0xff] }
 0x16c   : > { %v2654_v5 = vmax.f32 %v2526_v63, 0.0  ;;  %3294 = vst.msk [vmem:[%s4886_s18 + $0x150] sm:$0xf] %vm3209_vm4, %v3896_v3  ;;  %v2328_v16 = vld [vmem:[#allocation2 + $0xb0] sm:$0xff]  ;;  %v1634_v18 = vpop.f32.mrb[50].mxu0  ;;  %v1890_v19 = vpop.f32.mrb[50].mxu1 }
 0x16d   : > { %v3833_v10 = vpack.c.bf16 %v2590_v4, %v2590_v4  ;;  %v2392_v17 = vld [vmem:[#allocation2 + $0x2b0] sm:$0xff]  ;;  %v2463_v21 = vadd.f32 %v4864_v20, %v2328_v16  ;;  %2199 = vst.msk [vmem:[#allocation2 + $0xc0] sm:$0xff] %vm264_vm3, %v2070_v12  ;;  %2263 = vst.msk [vmem:[#allocation2 + $0x2c0] sm:$0xff] %vm264_vm3, %v2134_v13  ;;  %v2071_v23 = vadd.f32 %v1634_v18, %v418_v8  ;;  %v1636_v25 = vpop.f32.mrb[51].mxu0  ;;  %v1892_v26 = vpop.f32.mrb[51].mxu1  ;;  %v485_v2 = vld [vmem:[#allocation2 + $0x2e0] sm:$0xff] }
 0x16e   : > { %v3897_v11 = vpack.c.bf16 %v2654_v5, %v2654_v5  ;;  %v2527_v22 = vadd.f32 %v4864_v20, %v2392_v17  ;;  %v2135_v24 = vadd.f32 %v1890_v19, %v482_v9  ;;  %v422_v9 = vld [vmem:[#allocation2 + $0xe8] sm:$0xff] }
 0x16f   : > { %3231 = vst.msk [vmem:[%s4886_s18 + $0x54] sm:$0xf] %vm3209_vm4, %v3833_v10  ;;  %v2591_v29 = vmax.f32 %v2463_v21, 0.0  ;;  %v486_v10 = vld [vmem:[#allocation2 + $0x2e8] sm:$0xff] }
 0x170   : > { %3295 = vst.msk [vmem:[%s4886_s18 + $0x154] sm:$0xf] %vm3209_vm4, %v3897_v11  ;;  %v2329_v27 = vld [vmem:[#allocation2 + $0xb8] sm:$0xff]  ;;  %v2655_v30 = vmax.f32 %v2527_v22, 0.0 }
 0x171   : > { %v2393_v28 = vld [vmem:[#allocation2 + $0x2b8] sm:$0xff]  ;;  %v2464_v31 = vadd.f32 %v4864_v20, %v2329_v27  ;;  %2200 = vst.msk [vmem:[#allocation2 + $0xc8] sm:$0xff] %vm264_vm3, %v2071_v23  ;;  %2264 = vst.msk [vmem:[#allocation2 + $0x2c8] sm:$0xff] %vm264_vm3, %v2135_v24  ;;  %v3834_v35 = vpack.c.bf16 %v2591_v29, %v2591_v29 }
 0x172   : > { %v2528_v32 = vadd.f32 %v4864_v20, %v2393_v28  ;;  %v3898_v36 = vpack.c.bf16 %v2655_v30, %v2655_v30  ;;  %v1639_v39 = vpop.f32.mrb[52].mxu0  ;;  %v1895_v40 = vpop.f32.mrb[52].mxu1 }
 0x173   : > { %v2592_v37 = vmax.f32 %v2464_v31, 0.0  ;;  %3232 = vst.msk [vmem:[%s4886_s18 + $0x58] sm:$0xf] %vm3209_vm4, %v3834_v35  ;;  %v2072_v44 = vadd.f32 %v1639_v39, %v419_v33  ;;  %v2136_v45 = vadd.f32 %v1895_v40, %v483_v34  ;;  %v1641_v46 = vpop.f32.mrb[53].mxu0  ;;  %v1897_v47 = vpop.f32.mrb[53].mxu1  ;;  %v423_v34 = vld [vmem:[#allocation2 + $0xf0] sm:$0xff] }
 0x174   : > { %v2656_v38 = vmax.f32 %v2528_v32, 0.0  ;;  %3296 = vst.msk [vmem:[%s4886_s18 + $0x158] sm:$0xf] %vm3209_vm4, %v3898_v36  ;;  %v2330_v48 = vld [vmem:[#allocation2 + $0xc0] sm:$0xff]  ;;  %v1642_v50 = vpop.f32.mrb[54].mxu0  ;;  %v1898_v51 = vpop.f32.mrb[54].mxu1 }
 0x175   : > { %v3835_v20 = vpack.c.bf16 %v2592_v37, %v2592_v37  ;;  %v2394_v49 = vld [vmem:[#allocation2 + $0x2c0] sm:$0xff]  ;;  %v2465_v53 = vadd.f32 %v5088_v52, %v2330_v48  ;;  %2201 = vst.msk [vmem:[#allocation2 + $0xd0] sm:$0xff] %vm264_vm3, %v2072_v44  ;;  %2265 = vst.msk [vmem:[#allocation2 + $0x2d0] sm:$0xff] %vm264_vm3, %v2136_v45  ;;  %v2073_v55 = vadd.f32 %v1642_v50, %v420_v41  ;;  %v1644_v57 = vpop.f32.mrb[55].mxu0  ;;  %v1900_v58 = vpop.f32.mrb[55].mxu1  ;;  %v487_v35 = vld [vmem:[#allocation2 + $0x2f0] sm:$0xff] }
 0x176   : > { %v3899_v43 = vpack.c.bf16 %v2656_v38, %v2656_v38  ;;  %v2529_v54 = vadd.f32 %v5088_v52, %v2394_v49  ;;  %v2137_v56 = vadd.f32 %v1898_v51, %v484_v42  ;;  %v424_v42 = vld [vmem:[#allocation2 + $0xf8] sm:$0xff] }
 0x177   : > { %3233 = vst.msk [vmem:[%s4886_s18 + $0x5c] sm:$0xf] %vm3209_vm4, %v3835_v20  ;;  %v2593_v61 = vmax.f32 %v2465_v53, 0.0  ;;  %v488_v20 = vld [vmem:[#allocation2 + $0x2f8] sm:$0xff] }
 0x178   : > { %3297 = vst.msk [vmem:[%s4886_s18 + $0x15c] sm:$0xf] %vm3209_vm4, %v3899_v43  ;;  %v2331_v59 = vld [vmem:[#allocation2 + $0xc8] sm:$0xff]  ;;  %v2657_v62 = vmax.f32 %v2529_v54, 0.0 }
 0x179   : > { %v2395_v60 = vld [vmem:[#allocation2 + $0x2c8] sm:$0xff]  ;;  %v2466_v63 = vadd.f32 %v5088_v52, %v2331_v59  ;;  %2202 = vst.msk [vmem:[#allocation2 + $0xd8] sm:$0xff] %vm264_vm3, %v2073_v55  ;;  %2266 = vst.msk [vmem:[#allocation2 + $0x2d8] sm:$0xff] %vm264_vm3, %v2137_v56  ;;  %v3836_v3 = vpack.c.bf16 %v2593_v61, %v2593_v61 }
 0x17a   : > { %v2530_v0 = vadd.f32 %v5088_v52, %v2395_v60  ;;  %v3900_v4 = vpack.c.bf16 %v2657_v62, %v2657_v62  ;;  %v1647_v7 = vpop.f32.mrb[56].mxu0  ;;  %v1903_v8 = vpop.f32.mrb[56].mxu1 }
 0x17b   : > { %v2594_v5 = vmax.f32 %v2466_v63, 0.0  ;;  %3234 = vst.msk [vmem:[%s4886_s18 + $0x60] sm:$0xf] %vm3209_vm4, %v3836_v3  ;;  %v2074_v13 = vadd.f32 %v1647_v7, %v421_v1  ;;  %v2138_v14 = vadd.f32 %v1903_v8, %v485_v2  ;;  %v1649_v15 = vpop.f32.mrb[57].mxu0  ;;  %v1905_v16 = vpop.f32.mrb[57].mxu1  ;;  %v425_v2 = vld [vmem:[#allocation2 + $0x100] sm:$0xff] }
 0x17c   : > { %v2658_v6 = vmax.f32 %v2530_v0, 0.0  ;;  %3298 = vst.msk [vmem:[%s4886_s18 + $0x160] sm:$0xf] %vm3209_vm4, %v3900_v4  ;;  %v2332_v17 = vld [vmem:[#allocation2 + $0xd0] sm:$0xff]  ;;  %v1650_v19 = vpop.f32.mrb[58].mxu0  ;;  %v1906_v21 = vpop.f32.mrb[58].mxu1 }
 0x17d   : > { %v3837_v11 = vpack.c.bf16 %v2594_v5, %v2594_v5  ;;  %v2396_v18 = vld [vmem:[#allocation2 + $0x2d0] sm:$0xff]  ;;  %v2467_v22 = vadd.f32 %v5088_v52, %v2332_v17  ;;  %2203 = vst.msk [vmem:[#allocation2 + $0xe0] sm:$0xff] %vm264_vm3, %v2074_v13  ;;  %2267 = vst.msk [vmem:[#allocation2 + $0x2e0] sm:$0xff] %vm264_vm3, %v2138_v14  ;;  %v2075_v24 = vadd.f32 %v1650_v19, %v422_v9  ;;  %v1652_v26 = vpop.f32.mrb[59].mxu0  ;;  %v1908_v27 = vpop.f32.mrb[59].mxu1  ;;  %v489_v3 = vld [vmem:[#allocation2 + $0x300] sm:$0xff] }
 0x17e   : > { %v3901_v12 = vpack.c.bf16 %v2658_v6, %v2658_v6  ;;  %v2531_v23 = vadd.f32 %v5088_v52, %v2396_v18  ;;  %v2139_v25 = vadd.f32 %v1906_v21, %v486_v10  ;;  %v426_v10 = vld [vmem:[#allocation2 + $0x108] sm:$0xff] }
 0x17f   : > { %3235 = vst.msk [vmem:[%s4886_s18 + $0x64] sm:$0xf] %vm3209_vm4, %v3837_v11  ;;  %v2595_v30 = vmax.f32 %v2467_v22, 0.0  ;;  %v490_v11 = vld [vmem:[#allocation2 + $0x308] sm:$0xff] }
 0x180   : > { %3299 = vst.msk [vmem:[%s4886_s18 + $0x164] sm:$0xf] %vm3209_vm4, %v3901_v12  ;;  %v2333_v28 = vld [vmem:[#allocation2 + $0xd8] sm:$0xff]  ;;  %v2659_v31 = vmax.f32 %v2531_v23, 0.0 }
 0x181   : > { %v2397_v29 = vld [vmem:[#allocation2 + $0x2d8] sm:$0xff]  ;;  %v2468_v32 = vadd.f32 %v5088_v52, %v2333_v28  ;;  %2204 = vst.msk [vmem:[#allocation2 + $0xe8] sm:$0xff] %vm264_vm3, %v2075_v24  ;;  %2268 = vst.msk [vmem:[#allocation2 + $0x2e8] sm:$0xff] %vm264_vm3, %v2139_v25  ;;  %v3838_v36 = vpack.c.bf16 %v2595_v30, %v2595_v30 }
 0x182   : > { %v2532_v33 = vadd.f32 %v5088_v52, %v2397_v29  ;;  %v3902_v37 = vpack.c.bf16 %v2659_v31, %v2659_v31  ;;  %v1655_v40 = vpop.f32.mrb[60].mxu0  ;;  %v1911_v41 = vpop.f32.mrb[60].mxu1 }
 0x183   : > { %v2596_v38 = vmax.f32 %v2468_v32, 0.0  ;;  %3236 = vst.msk [vmem:[%s4886_s18 + $0x68] sm:$0xf] %vm3209_vm4, %v3838_v36  ;;  %v2076_v45 = vadd.f32 %v1655_v40, %v423_v34  ;;  %v2140_v46 = vadd.f32 %v1911_v41, %v487_v35  ;;  %v1657_v47 = vpop.f32.mrb[61].mxu0  ;;  %v1913_v48 = vpop.f32.mrb[61].mxu1  ;;  %v427_v35 = vld [vmem:[#allocation2 + $0x110] sm:$0xff] }
 0x184   : > { %v2660_v39 = vmax.f32 %v2532_v33, 0.0  ;;  %3300 = vst.msk [vmem:[%s4886_s18 + $0x168] sm:$0xf] %vm3209_vm4, %v3902_v37  ;;  %v2334_v49 = vld [vmem:[#allocation2 + $0xe0] sm:$0xff]  ;;  %v1658_v51 = vpop.f32.mrb[62].mxu0  ;;  %v1914_v53 = vpop.f32.mrb[62].mxu1 }
 0x185   : > { %v3839_v43 = vpack.c.bf16 %v2596_v38, %v2596_v38  ;;  %v2398_v50 = vld [vmem:[#allocation2 + $0x2e0] sm:$0xff]  ;;  %v2469_v54 = vadd.f32 %v5088_v52, %v2334_v49  ;;  %2205 = vst.msk [vmem:[#allocation2 + $0xf0] sm:$0xff] %vm264_vm3, %v2076_v45  ;;  %2269 = vst.msk [vmem:[#allocation2 + $0x2f0] sm:$0xff] %vm264_vm3, %v2140_v46  ;;  %v2077_v56 = vadd.f32 %v1658_v51, %v424_v42  ;;  %v1660_v58 = vpop.f32.mrb[63].mxu0  ;;  %v1916_v59 = vpop.f32.mrb[63].mxu1  ;;  %v491_v36 = vld [vmem:[#allocation2 + $0x310] sm:$0xff] }
 0x186   : > { %v3903_v44 = vpack.c.bf16 %v2660_v39, %v2660_v39  ;;  %v2533_v55 = vadd.f32 %v5088_v52, %v2398_v50  ;;  %v2141_v57 = vadd.f32 %v1914_v53, %v488_v20  ;;  %v428_v20 = vld [vmem:[#allocation2 + $0x118] sm:$0xff] }
 0x187   : > { %3237 = vst.msk [vmem:[%s4886_s18 + $0x6c] sm:$0xf] %vm3209_vm4, %v3839_v43  ;;  %v2597_v62 = vmax.f32 %v2469_v54, 0.0  ;;  %v492_v43 = vld [vmem:[#allocation2 + $0x318] sm:$0xff] }
 0x188   : > { %3301 = vst.msk [vmem:[%s4886_s18 + $0x16c] sm:$0xf] %vm3209_vm4, %v3903_v44  ;;  %v2335_v60 = vld [vmem:[#allocation2 + $0xe8] sm:$0xff]  ;;  %v2661_v63 = vmax.f32 %v2533_v55, 0.0 }
 0x189   : > { %v2399_v61 = vld [vmem:[#allocation2 + $0x2e8] sm:$0xff]  ;;  %v2470_v0 = vadd.f32 %v5088_v52, %v2335_v60  ;;  %2206 = vst.msk [vmem:[#allocation2 + $0xf8] sm:$0xff] %vm264_vm3, %v2077_v56  ;;  %2270 = vst.msk [vmem:[#allocation2 + $0x2f8] sm:$0xff] %vm264_vm3, %v2141_v57  ;;  %v3840_v4 = vpack.c.bf16 %v2597_v62, %v2597_v62 }
 0x18a   : > { %v2534_v1 = vadd.f32 %v5088_v52, %v2399_v61  ;;  %v3904_v5 = vpack.c.bf16 %v2661_v63, %v2661_v63  ;;  %v1663_v8 = vpop.f32.mrb[64].mxu0  ;;  %v1919_v9 = vpop.f32.mrb[64].mxu1 }
 0x18b   : > { %v2598_v6 = vmax.f32 %v2470_v0, 0.0  ;;  %3238 = vst.msk [vmem:[%s4886_s18 + $0x70] sm:$0xf] %vm3209_vm4, %v3840_v4  ;;  %v2078_v14 = vadd.f32 %v1663_v8, %v425_v2  ;;  %v2142_v15 = vadd.f32 %v1919_v9, %v489_v3  ;;  %v1665_v16 = vpop.f32.mrb[65].mxu0  ;;  %v1921_v17 = vpop.f32.mrb[65].mxu1  ;;  %v429_v3 = vld [vmem:[#allocation2 + $0x120] sm:$0xff] }
 0x18c   : > { %v2662_v7 = vmax.f32 %v2534_v1, 0.0  ;;  %3302 = vst.msk [vmem:[%s4886_s18 + $0x170] sm:$0xf] %vm3209_vm4, %v3904_v5  ;;  %v2336_v18 = vld [vmem:[#allocation2 + $0xf0] sm:$0xff]  ;;  %v1666_v21 = vpop.f32.mrb[66].mxu0  ;;  %v1922_v22 = vpop.f32.mrb[66].mxu1 }
 0x18d   : > { %v3841_v12 = vpack.c.bf16 %v2598_v6, %v2598_v6  ;;  %v2400_v19 = vld [vmem:[#allocation2 + $0x2f0] sm:$0xff]  ;;  %v2471_v23 = vadd.f32 %v5088_v52, %v2336_v18  ;;  %2207 = vst.msk [vmem:[#allocation2 + $0x100] sm:$0xff] %vm264_vm3, %v2078_v14  ;;  %2271 = vst.msk [vmem:[#allocation2 + $0x300] sm:$0xff] %vm264_vm3, %v2142_v15  ;;  %v2079_v25 = vadd.f32 %v1666_v21, %v426_v10  ;;  %v1668_v27 = vpop.f32.mrb[67].mxu0  ;;  %v1924_v28 = vpop.f32.mrb[67].mxu1  ;;  %v493_v4 = vld [vmem:[#allocation2 + $0x320] sm:$0xff] }
 0x18e   : > { %v3905_v13 = vpack.c.bf16 %v2662_v7, %v2662_v7  ;;  %v2535_v24 = vadd.f32 %v5088_v52, %v2400_v19  ;;  %v2143_v26 = vadd.f32 %v1922_v22, %v490_v11  ;;  %v430_v11 = vld [vmem:[#allocation2 + $0x128] sm:$0xff] }
 0x18f   : > { %3239 = vst.msk [vmem:[%s4886_s18 + $0x74] sm:$0xf] %vm3209_vm4, %v3841_v12  ;;  %v2599_v31 = vmax.f32 %v2471_v23, 0.0  ;;  %v494_v12 = vld [vmem:[#allocation2 + $0x328] sm:$0xff] }
 0x190   : > { %3303 = vst.msk [vmem:[%s4886_s18 + $0x174] sm:$0xf] %vm3209_vm4, %v3905_v13  ;;  %v2337_v29 = vld [vmem:[#allocation2 + $0xf8] sm:$0xff]  ;;  %v2663_v32 = vmax.f32 %v2535_v24, 0.0 }
 0x191   : > { %v2401_v30 = vld [vmem:[#allocation2 + $0x2f8] sm:$0xff]  ;;  %v2472_v33 = vadd.f32 %v5088_v52, %v2337_v29  ;;  %2208 = vst.msk [vmem:[#allocation2 + $0x108] sm:$0xff] %vm264_vm3, %v2079_v25  ;;  %2272 = vst.msk [vmem:[#allocation2 + $0x308] sm:$0xff] %vm264_vm3, %v2143_v26  ;;  %v3842_v37 = vpack.c.bf16 %v2599_v31, %v2599_v31 }
 0x192   : > { %v2536_v34 = vadd.f32 %v5088_v52, %v2401_v30  ;;  %v3906_v38 = vpack.c.bf16 %v2663_v32, %v2663_v32  ;;  %v1671_v41 = vpop.f32.mrb[68].mxu0  ;;  %v1927_v42 = vpop.f32.mrb[68].mxu1 }
 0x193   : > { %v2600_v39 = vmax.f32 %v2472_v33, 0.0  ;;  %3240 = vst.msk [vmem:[%s4886_s18 + $0x78] sm:$0xf] %vm3209_vm4, %v3842_v37  ;;  %v2080_v46 = vadd.f32 %v1671_v41, %v427_v35  ;;  %v2144_v47 = vadd.f32 %v1927_v42, %v491_v36  ;;  %v1673_v48 = vpop.f32.mrb[69].mxu0  ;;  %v1929_v49 = vpop.f32.mrb[69].mxu1  ;;  %v431_v36 = vld [vmem:[#allocation2 + $0x130] sm:$0xff] }
 0x194   : > { %v2664_v40 = vmax.f32 %v2536_v34, 0.0  ;;  %3304 = vst.msk [vmem:[%s4886_s18 + $0x178] sm:$0xf] %vm3209_vm4, %v3906_v38  ;;  %v2338_v50 = vld [vmem:[#allocation2 + $0x100] sm:$0xff]  ;;  %v1674_v53 = vpop.f32.mrb[70].mxu0  ;;  %v1930_v54 = vpop.f32.mrb[70].mxu1 }
 0x195   : > { %v3843_v44 = vpack.c.bf16 %v2600_v39, %v2600_v39  ;;  %v2402_v51 = vld [vmem:[#allocation2 + $0x300] sm:$0xff]  ;;  %v2473_v55 = vadd.f32 %v5088_v52, %v2338_v50  ;;  %2209 = vst.msk [vmem:[#allocation2 + $0x110] sm:$0xff] %vm264_vm3, %v2080_v46  ;;  %2273 = vst.msk [vmem:[#allocation2 + $0x310] sm:$0xff] %vm264_vm3, %v2144_v47  ;;  %v2081_v57 = vadd.f32 %v1674_v53, %v428_v20  ;;  %v1676_v59 = vpop.f32.mrb[71].mxu0  ;;  %v1932_v60 = vpop.f32.mrb[71].mxu1  ;;  %v495_v37 = vld [vmem:[#allocation2 + $0x330] sm:$0xff] }
 0x196   : > { %v3907_v45 = vpack.c.bf16 %v2664_v40, %v2664_v40  ;;  %v2537_v56 = vadd.f32 %v5088_v52, %v2402_v51  ;;  %v2145_v58 = vadd.f32 %v1930_v54, %v492_v43  ;;  %v432_v43 = vld [vmem:[#allocation2 + $0x138] sm:$0xff] }
 0x197   : > { %3241 = vst.msk [vmem:[%s4886_s18 + $0x7c] sm:$0xf] %vm3209_vm4, %v3843_v44  ;;  %v2601_v63 = vmax.f32 %v2473_v55, 0.0  ;;  %v496_v44 = vld [vmem:[#allocation2 + $0x338] sm:$0xff] }
 0x198   : > { %3305 = vst.msk [vmem:[%s4886_s18 + $0x17c] sm:$0xf] %vm3209_vm4, %v3907_v45  ;;  %v2339_v61 = vld [vmem:[#allocation2 + $0x108] sm:$0xff]  ;;  %v2665_v0 = vmax.f32 %v2537_v56, 0.0 }
 0x199   : > { %v2403_v62 = vld [vmem:[#allocation2 + $0x308] sm:$0xff]  ;;  %v2474_v1 = vadd.f32 %v5088_v52, %v2339_v61  ;;  %2210 = vst.msk [vmem:[#allocation2 + $0x118] sm:$0xff] %vm264_vm3, %v2081_v57  ;;  %2274 = vst.msk [vmem:[#allocation2 + $0x318] sm:$0xff] %vm264_vm3, %v2145_v58  ;;  %v3844_v5 = vpack.c.bf16 %v2601_v63, %v2601_v63 }
 0x19a   : > { %v2538_v2 = vadd.f32 %v5088_v52, %v2403_v62  ;;  %v3908_v6 = vpack.c.bf16 %v2665_v0, %v2665_v0  ;;  %v1679_v9 = vpop.f32.mrb[72].mxu0  ;;  %v1935_v10 = vpop.f32.mrb[72].mxu1 }
 0x19b   : > { %v2602_v7 = vmax.f32 %v2474_v1, 0.0  ;;  %3242 = vst.msk [vmem:[%s4886_s18 + $0x80] sm:$0xf] %vm3209_vm4, %v3844_v5  ;;  %v2082_v15 = vadd.f32 %v1679_v9, %v429_v3  ;;  %v2146_v16 = vadd.f32 %v1935_v10, %v493_v4  ;;  %v1681_v17 = vpop.f32.mrb[73].mxu0  ;;  %v1937_v18 = vpop.f32.mrb[73].mxu1  ;;  %v433_v4 = vld [vmem:[#allocation2 + $0x140] sm:$0xff] }
 0x19c   : > { %v2666_v8 = vmax.f32 %v2538_v2, 0.0  ;;  %3306 = vst.msk [vmem:[%s4886_s18 + $0x180] sm:$0xf] %vm3209_vm4, %v3908_v6  ;;  %v2340_v19 = vld [vmem:[#allocation2 + $0x110] sm:$0xff]  ;;  %v1682_v22 = vpop.f32.mrb[74].mxu0  ;;  %v1938_v23 = vpop.f32.mrb[74].mxu1 }
 0x19d   : > { %v3845_v13 = vpack.c.bf16 %v2602_v7, %v2602_v7  ;;  %v2404_v21 = vld [vmem:[#allocation2 + $0x310] sm:$0xff]  ;;  %v2475_v24 = vadd.f32 %v5088_v52, %v2340_v19  ;;  %2211 = vst.msk [vmem:[#allocation2 + $0x120] sm:$0xff] %vm264_vm3, %v2082_v15  ;;  %2275 = vst.msk [vmem:[#allocation2 + $0x320] sm:$0xff] %vm264_vm3, %v2146_v16  ;;  %v2083_v26 = vadd.f32 %v1682_v22, %v430_v11  ;;  %v1684_v28 = vpop.f32.mrb[75].mxu0  ;;  %v1940_v29 = vpop.f32.mrb[75].mxu1  ;;  %v497_v5 = vld [vmem:[#allocation2 + $0x340] sm:$0xff] }
 0x19e   : > { %v3909_v14 = vpack.c.bf16 %v2666_v8, %v2666_v8  ;;  %v2539_v25 = vadd.f32 %v5088_v52, %v2404_v21  ;;  %v2147_v27 = vadd.f32 %v1938_v23, %v494_v12  ;;  %v434_v12 = vld [vmem:[#allocation2 + $0x148] sm:$0xff] }
 0x19f   : > { %3243 = vst.msk [vmem:[%s4886_s18 + $0x84] sm:$0xf] %vm3209_vm4, %v3845_v13  ;;  %v2603_v32 = vmax.f32 %v2475_v24, 0.0  ;;  %v498_v13 = vld [vmem:[#allocation2 + $0x348] sm:$0xff] }
 0x1a0   : > { %3307 = vst.msk [vmem:[%s4886_s18 + $0x184] sm:$0xf] %vm3209_vm4, %v3909_v14  ;;  %v2341_v30 = vld [vmem:[#allocation2 + $0x118] sm:$0xff]  ;;  %v2667_v33 = vmax.f32 %v2539_v25, 0.0 }
 0x1a1   : > { %v2405_v31 = vld [vmem:[#allocation2 + $0x318] sm:$0xff]  ;;  %v2476_v34 = vadd.f32 %v5088_v52, %v2341_v30  ;;  %2212 = vst.msk [vmem:[#allocation2 + $0x128] sm:$0xff] %vm264_vm3, %v2083_v26  ;;  %2276 = vst.msk [vmem:[#allocation2 + $0x328] sm:$0xff] %vm264_vm3, %v2147_v27  ;;  %v3846_v38 = vpack.c.bf16 %v2603_v32, %v2603_v32 }
 0x1a2   : > { %v2540_v35 = vadd.f32 %v5088_v52, %v2405_v31  ;;  %v3910_v39 = vpack.c.bf16 %v2667_v33, %v2667_v33  ;;  %v1687_v42 = vpop.f32.mrb[76].mxu0  ;;  %v1943_v20 = vpop.f32.mrb[76].mxu1 }
 0x1a3   : > { %v2604_v40 = vmax.f32 %v2476_v34, 0.0  ;;  %3244 = vst.msk [vmem:[%s4886_s18 + $0x88] sm:$0xf] %vm3209_vm4, %v3846_v38  ;;  %v2084_v47 = vadd.f32 %v1687_v42, %v431_v36  ;;  %v2148_v48 = vadd.f32 %v1943_v20, %v495_v37  ;;  %v1689_v49 = vpop.f32.mrb[77].mxu0  ;;  %v1945_v50 = vpop.f32.mrb[77].mxu1  ;;  %v435_v37 = vld [vmem:[#allocation2 + $0x150] sm:$0xff] }
 0x1a4   : > { %v2668_v41 = vmax.f32 %v2540_v35, 0.0  ;;  %3308 = vst.msk [vmem:[%s4886_s18 + $0x188] sm:$0xf] %vm3209_vm4, %v3910_v39  ;;  %v2342_v51 = vld [vmem:[#allocation2 + $0x120] sm:$0xff]  ;;  %v1690_v54 = vpop.f32.mrb[78].mxu0  ;;  %v1946_v55 = vpop.f32.mrb[78].mxu1 }
 0x1a5   : > { %v3847_v45 = vpack.c.bf16 %v2604_v40, %v2604_v40  ;;  %v2406_v53 = vld [vmem:[#allocation2 + $0x320] sm:$0xff]  ;;  %v2477_v56 = vadd.f32 %v5088_v52, %v2342_v51  ;;  %2213 = vst.msk [vmem:[#allocation2 + $0x130] sm:$0xff] %vm264_vm3, %v2084_v47  ;;  %2277 = vst.msk [vmem:[#allocation2 + $0x330] sm:$0xff] %vm264_vm3, %v2148_v48  ;;  %v2085_v58 = vadd.f32 %v1690_v54, %v432_v43  ;;  %v1692_v60 = vpop.f32.mrb[79].mxu0  ;;  %v1948_v61 = vpop.f32.mrb[79].mxu1  ;;  %v499_v38 = vld [vmem:[#allocation2 + $0x350] sm:$0xff] }
 0x1a6   : > { %v3911_v46 = vpack.c.bf16 %v2668_v41, %v2668_v41  ;;  %v2541_v57 = vadd.f32 %v5088_v52, %v2406_v53  ;;  %v2149_v59 = vadd.f32 %v1946_v55, %v496_v44  ;;  %v436_v44 = vld [vmem:[#allocation2 + $0x158] sm:$0xff] }
 0x1a7   : > { %3245 = vst.msk [vmem:[%s4886_s18 + $0x8c] sm:$0xf] %vm3209_vm4, %v3847_v45  ;;  %v2605_v0 = vmax.f32 %v2477_v56, 0.0  ;;  %v500_v45 = vld [vmem:[#allocation2 + $0x358] sm:$0xff] }
 0x1a8   : > { %3309 = vst.msk [vmem:[%s4886_s18 + $0x18c] sm:$0xf] %vm3209_vm4, %v3911_v46  ;;  %v2343_v62 = vld [vmem:[#allocation2 + $0x128] sm:$0xff]  ;;  %v2669_v1 = vmax.f32 %v2541_v57, 0.0 }
 0x1a9   : > { %v2407_v63 = vld [vmem:[#allocation2 + $0x328] sm:$0xff]  ;;  %v2478_v2 = vadd.f32 %v5088_v52, %v2343_v62  ;;  %2214 = vst.msk [vmem:[#allocation2 + $0x138] sm:$0xff] %vm264_vm3, %v2085_v58  ;;  %2278 = vst.msk [vmem:[#allocation2 + $0x338] sm:$0xff] %vm264_vm3, %v2149_v59  ;;  %v3848_v6 = vpack.c.bf16 %v2605_v0, %v2605_v0 }
 0x1aa   : > { %v2542_v3 = vadd.f32 %v5088_v52, %v2407_v63  ;;  %v3912_v7 = vpack.c.bf16 %v2669_v1, %v2669_v1  ;;  %v1695_v10 = vpop.f32.mrb[80].mxu0  ;;  %v1951_v11 = vpop.f32.mrb[80].mxu1 }
 0x1ab   : > { %v2606_v8 = vmax.f32 %v2478_v2, 0.0  ;;  %3246 = vst.msk [vmem:[%s4886_s18 + $0x90] sm:$0xf] %vm3209_vm4, %v3848_v6  ;;  %v2086_v16 = vadd.f32 %v1695_v10, %v433_v4  ;;  %v2150_v17 = vadd.f32 %v1951_v11, %v497_v5  ;;  %v1697_v18 = vpop.f32.mrb[81].mxu0  ;;  %v1953_v19 = vpop.f32.mrb[81].mxu1  ;;  %v437_v5 = vld [vmem:[#allocation2 + $0x160] sm:$0xff] }
 0x1ac   : > { %v2670_v9 = vmax.f32 %v2542_v3, 0.0  ;;  %3310 = vst.msk [vmem:[%s4886_s18 + $0x190] sm:$0xf] %vm3209_vm4, %v3912_v7  ;;  %v2344_v21 = vld [vmem:[#allocation2 + $0x130] sm:$0xff]  ;;  %v1698_v23 = vpop.f32.mrb[82].mxu0  ;;  %v1954_v24 = vpop.f32.mrb[82].mxu1 }
 0x1ad   : > { %v3849_v14 = vpack.c.bf16 %v2606_v8, %v2606_v8  ;;  %v2408_v22 = vld [vmem:[#allocation2 + $0x330] sm:$0xff]  ;;  %v2479_v25 = vadd.f32 %v5088_v52, %v2344_v21  ;;  %2215 = vst.msk [vmem:[#allocation2 + $0x140] sm:$0xff] %vm264_vm3, %v2086_v16  ;;  %2279 = vst.msk [vmem:[#allocation2 + $0x340] sm:$0xff] %vm264_vm3, %v2150_v17  ;;  %v2087_v27 = vadd.f32 %v1698_v23, %v434_v12  ;;  %v1700_v29 = vpop.f32.mrb[83].mxu0  ;;  %v1956_v30 = vpop.f32.mrb[83].mxu1  ;;  %v501_v6 = vld [vmem:[#allocation2 + $0x360] sm:$0xff] }
 0x1ae   : > { %v3913_v15 = vpack.c.bf16 %v2670_v9, %v2670_v9  ;;  %v2543_v26 = vadd.f32 %v5088_v52, %v2408_v22  ;;  %v2151_v28 = vadd.f32 %v1954_v24, %v498_v13  ;;  %v438_v13 = vld [vmem:[#allocation2 + $0x168] sm:$0xff] }
 0x1af   : > { %3247 = vst.msk [vmem:[%s4886_s18 + $0x94] sm:$0xf] %vm3209_vm4, %v3849_v14  ;;  %v2607_v33 = vmax.f32 %v2479_v25, 0.0  ;;  %v502_v14 = vld [vmem:[#allocation2 + $0x368] sm:$0xff] }
 0x1b0   : > { %3311 = vst.msk [vmem:[%s4886_s18 + $0x194] sm:$0xf] %vm3209_vm4, %v3913_v15  ;;  %v2345_v31 = vld [vmem:[#allocation2 + $0x138] sm:$0xff]  ;;  %v2671_v34 = vmax.f32 %v2543_v26, 0.0 }
 0x1b1   : > { %v2409_v32 = vld [vmem:[#allocation2 + $0x338] sm:$0xff]  ;;  %v2480_v35 = vadd.f32 %v5088_v52, %v2345_v31  ;;  %2216 = vst.msk [vmem:[#allocation2 + $0x148] sm:$0xff] %vm264_vm3, %v2087_v27  ;;  %2280 = vst.msk [vmem:[#allocation2 + $0x348] sm:$0xff] %vm264_vm3, %v2151_v28  ;;  %v3850_v39 = vpack.c.bf16 %v2607_v33, %v2607_v33 }
 0x1b2   : > { %v2544_v36 = vadd.f32 %v5088_v52, %v2409_v32  ;;  %v3914_v40 = vpack.c.bf16 %v2671_v34, %v2671_v34  ;;  %v1703_v20 = vpop.f32.mrb[84].mxu0  ;;  %v1959_v43 = vpop.f32.mrb[84].mxu1 }
 0x1b3   : > { %v2608_v41 = vmax.f32 %v2480_v35, 0.0  ;;  %3248 = vst.msk [vmem:[%s4886_s18 + $0x98] sm:$0xf] %vm3209_vm4, %v3850_v39  ;;  %v2088_v48 = vadd.f32 %v1703_v20, %v435_v37  ;;  %v2152_v49 = vadd.f32 %v1959_v43, %v499_v38  ;;  %v1705_v50 = vpop.f32.mrb[85].mxu0  ;;  %v1961_v51 = vpop.f32.mrb[85].mxu1  ;;  %v439_v38 = vld [vmem:[#allocation2 + $0x170] sm:$0xff] }
 0x1b4   : > { %v2672_v42 = vmax.f32 %v2544_v36, 0.0  ;;  %3312 = vst.msk [vmem:[%s4886_s18 + $0x198] sm:$0xf] %vm3209_vm4, %v3914_v40  ;;  %v2346_v53 = vld [vmem:[#allocation2 + $0x140] sm:$0xff]  ;;  %v1706_v55 = vpop.f32.mrb[86].mxu0  ;;  %v1962_v56 = vpop.f32.mrb[86].mxu1 }
 0x1b5   : > { %v3851_v46 = vpack.c.bf16 %v2608_v41, %v2608_v41  ;;  %v2410_v54 = vld [vmem:[#allocation2 + $0x340] sm:$0xff]  ;;  %v2481_v57 = vadd.f32 %v5088_v52, %v2346_v53  ;;  %2217 = vst.msk [vmem:[#allocation2 + $0x150] sm:$0xff] %vm264_vm3, %v2088_v48  ;;  %2281 = vst.msk [vmem:[#allocation2 + $0x350] sm:$0xff] %vm264_vm3, %v2152_v49  ;;  %v2089_v59 = vadd.f32 %v1706_v55, %v436_v44  ;;  %v1708_v61 = vpop.f32.mrb[87].mxu0  ;;  %v1964_v62 = vpop.f32.mrb[87].mxu1  ;;  %v503_v39 = vld [vmem:[#allocation2 + $0x370] sm:$0xff] }
 0x1b6   : > { %v3915_v47 = vpack.c.bf16 %v2672_v42, %v2672_v42  ;;  %v2545_v58 = vadd.f32 %v5088_v52, %v2410_v54  ;;  %v2153_v60 = vadd.f32 %v1962_v56, %v500_v45  ;;  %v440_v45 = vld [vmem:[#allocation2 + $0x178] sm:$0xff] }
 0x1b7   : > { %3249 = vst.msk [vmem:[%s4886_s18 + $0x9c] sm:$0xf] %vm3209_vm4, %v3851_v46  ;;  %v2609_v1 = vmax.f32 %v2481_v57, 0.0  ;;  %v504_v46 = vld [vmem:[#allocation2 + $0x378] sm:$0xff] }
 0x1b8   : > { %3313 = vst.msk [vmem:[%s4886_s18 + $0x19c] sm:$0xf] %vm3209_vm4, %v3915_v47  ;;  %v2347_v63 = vld [vmem:[#allocation2 + $0x148] sm:$0xff]  ;;  %v2673_v2 = vmax.f32 %v2545_v58, 0.0 }
 0x1b9   : > { %v2411_v0 = vld [vmem:[#allocation2 + $0x348] sm:$0xff]  ;;  %v2482_v3 = vadd.f32 %v5088_v52, %v2347_v63  ;;  %2218 = vst.msk [vmem:[#allocation2 + $0x158] sm:$0xff] %vm264_vm3, %v2089_v59  ;;  %2282 = vst.msk [vmem:[#allocation2 + $0x358] sm:$0xff] %vm264_vm3, %v2153_v60  ;;  %v3852_v7 = vpack.c.bf16 %v2609_v1, %v2609_v1 }
 0x1ba   : > { %v2546_v4 = vadd.f32 %v5088_v52, %v2411_v0  ;;  %v3916_v8 = vpack.c.bf16 %v2673_v2, %v2673_v2  ;;  %v1711_v11 = vpop.f32.mrb[88].mxu0  ;;  %v1967_v12 = vpop.f32.mrb[88].mxu1 }
 0x1bb   : > { %v2610_v9 = vmax.f32 %v2482_v3, 0.0  ;;  %3250 = vst.msk [vmem:[%s4886_s18 + $0xa0] sm:$0xf] %vm3209_vm4, %v3852_v7  ;;  %v2090_v17 = vadd.f32 %v1711_v11, %v437_v5  ;;  %v2154_v18 = vadd.f32 %v1967_v12, %v501_v6  ;;  %v1713_v19 = vpop.f32.mrb[89].mxu0  ;;  %v1969_v21 = vpop.f32.mrb[89].mxu1  ;;  %v441_v6 = vld [vmem:[#allocation2 + $0x180] sm:$0xff] }
 0x1bc   : > { %v2674_v10 = vmax.f32 %v2546_v4, 0.0  ;;  %3314 = vst.msk [vmem:[%s4886_s18 + $0x1a0] sm:$0xf] %vm3209_vm4, %v3916_v8  ;;  %v2348_v22 = vld [vmem:[#allocation2 + $0x150] sm:$0xff]  ;;  %v1714_v24 = vpop.f32.mrb[90].mxu0  ;;  %v1970_v25 = vpop.f32.mrb[90].mxu1 }
 0x1bd   : > { %v3853_v15 = vpack.c.bf16 %v2610_v9, %v2610_v9  ;;  %v2412_v23 = vld [vmem:[#allocation2 + $0x350] sm:$0xff]  ;;  %v2483_v26 = vadd.f32 %v5088_v52, %v2348_v22  ;;  %2219 = vst.msk [vmem:[#allocation2 + $0x160] sm:$0xff] %vm264_vm3, %v2090_v17  ;;  %2283 = vst.msk [vmem:[#allocation2 + $0x360] sm:$0xff] %vm264_vm3, %v2154_v18  ;;  %v2091_v28 = vadd.f32 %v1714_v24, %v438_v13  ;;  %v1716_v30 = vpop.f32.mrb[91].mxu0  ;;  %v1972_v31 = vpop.f32.mrb[91].mxu1  ;;  %v505_v7 = vld [vmem:[#allocation2 + $0x380] sm:$0xff] }
 0x1be   : > { %v3917_v16 = vpack.c.bf16 %v2674_v10, %v2674_v10  ;;  %v2547_v27 = vadd.f32 %v5088_v52, %v2412_v23  ;;  %v2155_v29 = vadd.f32 %v1970_v25, %v502_v14  ;;  %v442_v14 = vld [vmem:[#allocation2 + $0x188] sm:$0xff] }
 0x1bf   : > { %3251 = vst.msk [vmem:[%s4886_s18 + $0xa4] sm:$0xf] %vm3209_vm4, %v3853_v15  ;;  %v2611_v34 = vmax.f32 %v2483_v26, 0.0  ;;  %v506_v15 = vld [vmem:[#allocation2 + $0x388] sm:$0xff] }
 0x1c0   : > { %3315 = vst.msk [vmem:[%s4886_s18 + $0x1a4] sm:$0xf] %vm3209_vm4, %v3917_v16  ;;  %v2349_v32 = vld [vmem:[#allocation2 + $0x158] sm:$0xff]  ;;  %v2675_v35 = vmax.f32 %v2547_v27, 0.0 }
 0x1c1   : > { %v2413_v33 = vld [vmem:[#allocation2 + $0x358] sm:$0xff]  ;;  %v2484_v36 = vadd.f32 %v5088_v52, %v2349_v32  ;;  %2220 = vst.msk [vmem:[#allocation2 + $0x168] sm:$0xff] %vm264_vm3, %v2091_v28  ;;  %2284 = vst.msk [vmem:[#allocation2 + $0x368] sm:$0xff] %vm264_vm3, %v2155_v29  ;;  %v3854_v40 = vpack.c.bf16 %v2611_v34, %v2611_v34 }
 0x1c2   : > { %v2548_v37 = vadd.f32 %v5088_v52, %v2413_v33  ;;  %v3918_v41 = vpack.c.bf16 %v2675_v35, %v2675_v35  ;;  %v1719_v43 = vpop.f32.mrb[92].mxu0  ;;  %v1975_v44 = vpop.f32.mrb[92].mxu1 }
 0x1c3   : > { %v2612_v42 = vmax.f32 %v2484_v36, 0.0  ;;  %3252 = vst.msk [vmem:[%s4886_s18 + $0xa8] sm:$0xf] %vm3209_vm4, %v3854_v40  ;;  %v2092_v49 = vadd.f32 %v1719_v43, %v439_v38  ;;  %v2156_v50 = vadd.f32 %v1975_v44, %v503_v39  ;;  %v1721_v51 = vpop.f32.mrb[93].mxu0  ;;  %v1977_v53 = vpop.f32.mrb[93].mxu1  ;;  %v443_v39 = vld [vmem:[#allocation2 + $0x190] sm:$0xff] }
 0x1c4   : > { %v2676_v20 = vmax.f32 %v2548_v37, 0.0  ;;  %3316 = vst.msk [vmem:[%s4886_s18 + $0x1a8] sm:$0xf] %vm3209_vm4, %v3918_v41  ;;  %v2350_v54 = vld [vmem:[#allocation2 + $0x160] sm:$0xff]  ;;  %v1722_v56 = vpop.f32.mrb[94].mxu0  ;;  %v1978_v57 = vpop.f32.mrb[94].mxu1 }
 0x1c5   : > { %v3855_v47 = vpack.c.bf16 %v2612_v42, %v2612_v42  ;;  %v2414_v55 = vld [vmem:[#allocation2 + $0x360] sm:$0xff]  ;;  %v2485_v58 = vadd.f32 %v5088_v52, %v2350_v54  ;;  %2221 = vst.msk [vmem:[#allocation2 + $0x170] sm:$0xff] %vm264_vm3, %v2092_v49  ;;  %2285 = vst.msk [vmem:[#allocation2 + $0x370] sm:$0xff] %vm264_vm3, %v2156_v50  ;;  %v2093_v60 = vadd.f32 %v1722_v56, %v440_v45  ;;  %v1724_v62 = vpop.f32.mrb[95].mxu0  ;;  %v1980_v63 = vpop.f32.mrb[95].mxu1  ;;  %v507_v40 = vld [vmem:[#allocation2 + $0x390] sm:$0xff] }
 0x1c6   : > { %v3919_v48 = vpack.c.bf16 %v2676_v20, %v2676_v20  ;;  %v2549_v59 = vadd.f32 %v5088_v52, %v2414_v55  ;;  %v2157_v61 = vadd.f32 %v1978_v57, %v504_v46  ;;  %v444_v46 = vld [vmem:[#allocation2 + $0x198] sm:$0xff] }
 0x1c7   : > { %3253 = vst.msk [vmem:[%s4886_s18 + $0xac] sm:$0xf] %vm3209_vm4, %v3855_v47  ;;  %v2613_v2 = vmax.f32 %v2485_v58, 0.0  ;;  %v508_v47 = vld [vmem:[#allocation2 + $0x398] sm:$0xff] }
 0x1c8   : > { %3317 = vst.msk [vmem:[%s4886_s18 + $0x1ac] sm:$0xf] %vm3209_vm4, %v3919_v48  ;;  %v2351_v0 = vld [vmem:[#allocation2 + $0x168] sm:$0xff]  ;;  %v2677_v3 = vmax.f32 %v2549_v59, 0.0 }
 0x1c9   : > { %v2415_v1 = vld [vmem:[#allocation2 + $0x368] sm:$0xff]  ;;  %v2486_v4 = vadd.f32 %v5088_v52, %v2351_v0  ;;  %2222 = vst.msk [vmem:[#allocation2 + $0x178] sm:$0xff] %vm264_vm3, %v2093_v60  ;;  %2286 = vst.msk [vmem:[#allocation2 + $0x378] sm:$0xff] %vm264_vm3, %v2157_v61  ;;  %v3856_v8 = vpack.c.bf16 %v2613_v2, %v2613_v2 }
 0x1ca   : > { %v2550_v5 = vadd.f32 %v5088_v52, %v2415_v1  ;;  %v3920_v9 = vpack.c.bf16 %v2677_v3, %v2677_v3  ;;  %v1727_v12 = vpop.f32.mrb[96].mxu0  ;;  %v1983_v13 = vpop.f32.mrb[96].mxu1 }
 0x1cb   : > { %v2614_v10 = vmax.f32 %v2486_v4, 0.0  ;;  %3254 = vst.msk [vmem:[%s4886_s18 + $0xb0] sm:$0xf] %vm3209_vm4, %v3856_v8  ;;  %v2094_v18 = vadd.f32 %v1727_v12, %v441_v6  ;;  %v2158_v19 = vadd.f32 %v1983_v13, %v505_v7  ;;  %v1729_v21 = vpop.f32.mrb[97].mxu0  ;;  %v1985_v22 = vpop.f32.mrb[97].mxu1  ;;  %v445_v7 = vld [vmem:[#allocation2 + $0x1a0] sm:$0xff] }
 0x1cc   : > { %v2678_v11 = vmax.f32 %v2550_v5, 0.0  ;;  %3318 = vst.msk [vmem:[%s4886_s18 + $0x1b0] sm:$0xf] %vm3209_vm4, %v3920_v9  ;;  %v2352_v23 = vld [vmem:[#allocation2 + $0x170] sm:$0xff]  ;;  %v1730_v25 = vpop.f32.mrb[98].mxu0  ;;  %v1986_v26 = vpop.f32.mrb[98].mxu1 }
 0x1cd   : > { %v3857_v16 = vpack.c.bf16 %v2614_v10, %v2614_v10  ;;  %v2416_v24 = vld [vmem:[#allocation2 + $0x370] sm:$0xff]  ;;  %v2487_v27 = vadd.f32 %v5088_v52, %v2352_v23  ;;  %2223 = vst.msk [vmem:[#allocation2 + $0x180] sm:$0xff] %vm264_vm3, %v2094_v18  ;;  %2287 = vst.msk [vmem:[#allocation2 + $0x380] sm:$0xff] %vm264_vm3, %v2158_v19  ;;  %v2095_v29 = vadd.f32 %v1730_v25, %v442_v14  ;;  %v1732_v31 = vpop.f32.mrb[99].mxu0  ;;  %v1988_v32 = vpop.f32.mrb[99].mxu1  ;;  %v509_v8 = vld [vmem:[#allocation2 + $0x3a0] sm:$0xff] }
 0x1ce   : > { %v3921_v17 = vpack.c.bf16 %v2678_v11, %v2678_v11  ;;  %v2551_v28 = vadd.f32 %v5088_v52, %v2416_v24  ;;  %v2159_v30 = vadd.f32 %v1986_v26, %v506_v15  ;;  %v446_v15 = vld [vmem:[#allocation2 + $0x1a8] sm:$0xff] }
 0x1cf   : > { %3255 = vst.msk [vmem:[%s4886_s18 + $0xb4] sm:$0xf] %vm3209_vm4, %v3857_v16  ;;  %v2615_v35 = vmax.f32 %v2487_v27, 0.0  ;;  %v510_v16 = vld [vmem:[#allocation2 + $0x3a8] sm:$0xff]  ;;  %v5301_v27 = vld [vmem:[%s5470_s2] ss:$0 sm:$0xff] }
 0x1d0   : > { %3319 = vst.msk [vmem:[%s4886_s18 + $0x1b4] sm:$0xf] %vm3209_vm4, %v3921_v17  ;;  %v2353_v33 = vld [vmem:[#allocation2 + $0x178] sm:$0xff]  ;;  %v2679_v36 = vmax.f32 %v2551_v28, 0.0 }
 0x1d1   : > { %v2417_v34 = vld [vmem:[#allocation2 + $0x378] sm:$0xff]  ;;  %v2488_v37 = vadd.f32 %v5088_v52, %v2353_v33  ;;  %2224 = vst.msk [vmem:[#allocation2 + $0x188] sm:$0xff] %vm264_vm3, %v2095_v29  ;;  %2288 = vst.msk [vmem:[#allocation2 + $0x388] sm:$0xff] %vm264_vm3, %v2159_v30  ;;  %v3858_v41 = vpack.c.bf16 %v2615_v35, %v2615_v35 }
 0x1d2   : > { %v2552_v38 = vadd.f32 %v5088_v52, %v2417_v34  ;;  %v3922_v42 = vpack.c.bf16 %v2679_v36, %v2679_v36  ;;  %v1735_v44 = vpop.f32.mrb[100].mxu0  ;;  %v1991_v45 = vpop.f32.mrb[100].mxu1 }
 0x1d3   : > { %v2616_v20 = vmax.f32 %v2488_v37, 0.0  ;;  %3256 = vst.msk [vmem:[%s4886_s18 + $0xb8] sm:$0xf] %vm3209_vm4, %v3858_v41  ;;  %v2096_v50 = vadd.f32 %v1735_v44, %v443_v39  ;;  %v2160_v51 = vadd.f32 %v1991_v45, %v507_v40  ;;  %v1737_v53 = vpop.f32.mrb[101].mxu0  ;;  %v1993_v54 = vpop.f32.mrb[101].mxu1  ;;  %v447_v40 = vld [vmem:[#allocation2 + $0x1b0] sm:$0xff] }
 0x1d4   : > { %v2680_v43 = vmax.f32 %v2552_v38, 0.0  ;;  %3320 = vst.msk [vmem:[%s4886_s18 + $0x1b8] sm:$0xf] %vm3209_vm4, %v3922_v42  ;;  %v2354_v55 = vld [vmem:[#allocation2 + $0x180] sm:$0xff]  ;;  %v1738_v57 = vpop.f32.mrb[102].mxu0  ;;  %v1994_v58 = vpop.f32.mrb[102].mxu1 }
 0x1d5   : > { %v3859_v48 = vpack.c.bf16 %v2616_v20, %v2616_v20  ;;  %v2418_v56 = vld [vmem:[#allocation2 + $0x380] sm:$0xff]  ;;  %v2489_v59 = vadd.f32 %v5088_v52, %v2354_v55  ;;  %2225 = vst.msk [vmem:[#allocation2 + $0x190] sm:$0xff] %vm264_vm3, %v2096_v50  ;;  %2289 = vst.msk [vmem:[#allocation2 + $0x390] sm:$0xff] %vm264_vm3, %v2160_v51  ;;  %v2097_v61 = vadd.f32 %v1738_v57, %v444_v46  ;;  %v1740_v63 = vpop.f32.mrb[103].mxu0  ;;  %v1996_v0 = vpop.f32.mrb[103].mxu1  ;;  %v511_v41 = vld [vmem:[#allocation2 + $0x3b0] sm:$0xff] }
 0x1d6   : > { %v3923_v49 = vpack.c.bf16 %v2680_v43, %v2680_v43  ;;  %v2553_v60 = vadd.f32 %v5088_v52, %v2418_v56  ;;  %v2161_v62 = vadd.f32 %v1994_v58, %v508_v47  ;;  %v448_v47 = vld [vmem:[#allocation2 + $0x1b8] sm:$0xff] }
 0x1d7   : > { %3257 = vst.msk [vmem:[%s4886_s18 + $0xbc] sm:$0xf] %vm3209_vm4, %v3859_v48  ;;  %v2617_v3 = vmax.f32 %v2489_v59, 0.0  ;;  %v512_v48 = vld [vmem:[#allocation2 + $0x3b8] sm:$0xff] }
 0x1d8   : > { %3321 = vst.msk [vmem:[%s4886_s18 + $0x1bc] sm:$0xf] %vm3209_vm4, %v3923_v49  ;;  %v2355_v1 = vld [vmem:[#allocation2 + $0x188] sm:$0xff]  ;;  %v2681_v4 = vmax.f32 %v2553_v60, 0.0 }
 0x1d9   : > { %v2419_v2 = vld [vmem:[#allocation2 + $0x388] sm:$0xff]  ;;  %v2490_v5 = vadd.f32 %v5088_v52, %v2355_v1  ;;  %2226 = vst.msk [vmem:[#allocation2 + $0x198] sm:$0xff] %vm264_vm3, %v2097_v61  ;;  %2290 = vst.msk [vmem:[#allocation2 + $0x398] sm:$0xff] %vm264_vm3, %v2161_v62  ;;  %v3860_v9 = vpack.c.bf16 %v2617_v3, %v2617_v3 }
 0x1da   : > { %v2554_v6 = vadd.f32 %v5088_v52, %v2419_v2  ;;  %v3924_v10 = vpack.c.bf16 %v2681_v4, %v2681_v4  ;;  %v1743_v13 = vpop.f32.mrb[104].mxu0  ;;  %v1999_v14 = vpop.f32.mrb[104].mxu1 }
 0x1db   : > { %v2618_v11 = vmax.f32 %v2490_v5, 0.0  ;;  %3258 = vst.msk [vmem:[%s4886_s18 + $0xc0] sm:$0xf] %vm3209_vm4, %v3860_v9  ;;  %v2098_v18 = vadd.f32 %v1743_v13, %v445_v7  ;;  %v2162_v19 = vadd.f32 %v1999_v14, %v509_v8  ;;  %v1745_v21 = vpop.f32.mrb[105].mxu0  ;;  %v2001_v22 = vpop.f32.mrb[105].mxu1  ;;  %v449_v8 = vld [vmem:[#allocation2 + $0x1c0] sm:$0xff] }
 0x1dc   : > { %v2682_v12 = vmax.f32 %v2554_v6, 0.0  ;;  %3322 = vst.msk [vmem:[%s4886_s18 + $0x1c0] sm:$0xf] %vm3209_vm4, %v3924_v10  ;;  %v2356_v23 = vld [vmem:[#allocation2 + $0x190] sm:$0xff]  ;;  %v1746_v25 = vpop.f32.mrb[106].mxu0  ;;  %v2002_v26 = vpop.f32.mrb[106].mxu1 }
 0x1dd   : > { %v3861_v52 = vpack.c.bf16 %v2618_v11, %v2618_v11  ;;  %v2420_v24 = vld [vmem:[#allocation2 + $0x390] sm:$0xff]  ;;  %v2491_v28 = vadd.f32 %v5301_v27, %v2356_v23  ;;  %2227 = vst.msk [vmem:[#allocation2 + $0x1a0] sm:$0xff] %vm264_vm3, %v2098_v18  ;;  %2291 = vst.msk [vmem:[#allocation2 + $0x3a0] sm:$0xff] %vm264_vm3, %v2162_v19  ;;  %v2099_v30 = vadd.f32 %v1746_v25, %v446_v15  ;;  %v1748_v32 = vpop.f32.mrb[107].mxu0  ;;  %v2004_v33 = vpop.f32.mrb[107].mxu1  ;;  %v513_v9 = vld [vmem:[#allocation2 + $0x3c0] sm:$0xff] }
 0x1de   : > { %v3925_v17 = vpack.c.bf16 %v2682_v12, %v2682_v12  ;;  %v2555_v29 = vadd.f32 %v5301_v27, %v2420_v24  ;;  %v2163_v31 = vadd.f32 %v2002_v26, %v510_v16  ;;  %v450_v16 = vld [vmem:[#allocation2 + $0x1c8] sm:$0xff] }
 0x1df   : > { %3259 = vst.msk [vmem:[%s4886_s18 + $0xc4] sm:$0xf] %vm3209_vm4, %v3861_v52  ;;  %v2619_v36 = vmax.f32 %v2491_v28, 0.0  ;;  %v514_v52 = vld [vmem:[#allocation2 + $0x3c8] sm:$0xff] }
 0x1e0   : > { %3323 = vst.msk [vmem:[%s4886_s18 + $0x1c4] sm:$0xf] %vm3209_vm4, %v3925_v17  ;;  %v2357_v34 = vld [vmem:[#allocation2 + $0x198] sm:$0xff]  ;;  %v2683_v37 = vmax.f32 %v2555_v29, 0.0 }
 0x1e1   : > { %v2421_v35 = vld [vmem:[#allocation2 + $0x398] sm:$0xff]  ;;  %v2492_v38 = vadd.f32 %v5301_v27, %v2357_v34  ;;  %2228 = vst.msk [vmem:[#allocation2 + $0x1a8] sm:$0xff] %vm264_vm3, %v2099_v30  ;;  %2292 = vst.msk [vmem:[#allocation2 + $0x3a8] sm:$0xff] %vm264_vm3, %v2163_v31  ;;  %v3862_v42 = vpack.c.bf16 %v2619_v36, %v2619_v36 }
 0x1e2   : > { %v2556_v39 = vadd.f32 %v5301_v27, %v2421_v35  ;;  %v3926_v20 = vpack.c.bf16 %v2683_v37, %v2683_v37  ;;  %v1751_v45 = vpop.f32.mrb[108].mxu0  ;;  %v2007_v46 = vpop.f32.mrb[108].mxu1 }
 0x1e3   : > { %v2620_v43 = vmax.f32 %v2492_v38, 0.0  ;;  %3260 = vst.msk [vmem:[%s4886_s18 + $0xc8] sm:$0xf] %vm3209_vm4, %v3862_v42  ;;  %v2100_v51 = vadd.f32 %v1751_v45, %v447_v40  ;;  %v2164_v53 = vadd.f32 %v2007_v46, %v511_v41  ;;  %v1753_v54 = vpop.f32.mrb[109].mxu0  ;;  %v2009_v55 = vpop.f32.mrb[109].mxu1  ;;  %v451_v41 = vld [vmem:[#allocation2 + $0x1d0] sm:$0xff] }
 0x1e4   : > { %v2684_v44 = vmax.f32 %v2556_v39, 0.0  ;;  %3324 = vst.msk [vmem:[%s4886_s18 + $0x1c8] sm:$0xf] %vm3209_vm4, %v3926_v20  ;;  %v2358_v56 = vld [vmem:[#allocation2 + $0x1a0] sm:$0xff]  ;;  %v1754_v58 = vpop.f32.mrb[110].mxu0  ;;  %v2010_v59 = vpop.f32.mrb[110].mxu1 }
 0x1e5   : > { %v3863_v49 = vpack.c.bf16 %v2620_v43, %v2620_v43  ;;  %v2422_v57 = vld [vmem:[#allocation2 + $0x3a0] sm:$0xff]  ;;  %v2493_v60 = vadd.f32 %v5301_v27, %v2358_v56  ;;  %2229 = vst.msk [vmem:[#allocation2 + $0x1b0] sm:$0xff] %vm264_vm3, %v2100_v51  ;;  %2293 = vst.msk [vmem:[#allocation2 + $0x3b0] sm:$0xff] %vm264_vm3, %v2164_v53  ;;  %v2101_v62 = vadd.f32 %v1754_v58, %v448_v47  ;;  %v1756_v0 = vpop.f32.mrb[111].mxu0  ;;  %v2012_v1 = vpop.f32.mrb[111].mxu1  ;;  %v515_v42 = vld [vmem:[#allocation2 + $0x3d0] sm:$0xff] }
 0x1e6   : > { %v3927_v50 = vpack.c.bf16 %v2684_v44, %v2684_v44  ;;  %v2557_v61 = vadd.f32 %v5301_v27, %v2422_v57  ;;  %v2165_v63 = vadd.f32 %v2010_v59, %v512_v48  ;;  %v452_v48 = vld [vmem:[#allocation2 + $0x1d8] sm:$0xff] }
 0x1e7   : > { %3261 = vst.msk [vmem:[%s4886_s18 + $0xcc] sm:$0xf] %vm3209_vm4, %v3863_v49  ;;  %v2621_v4 = vmax.f32 %v2493_v60, 0.0  ;;  %v516_v49 = vld [vmem:[#allocation2 + $0x3d8] sm:$0xff] }
 0x1e8   : > { %3325 = vst.msk [vmem:[%s4886_s18 + $0x1cc] sm:$0xf] %vm3209_vm4, %v3927_v50  ;;  %v2359_v2 = vld [vmem:[#allocation2 + $0x1a8] sm:$0xff]  ;;  %v2685_v5 = vmax.f32 %v2557_v61, 0.0 }
 0x1e9   : > { %v2423_v3 = vld [vmem:[#allocation2 + $0x3a8] sm:$0xff]  ;;  %v2494_v6 = vadd.f32 %v5301_v27, %v2359_v2  ;;  %2230 = vst.msk [vmem:[#allocation2 + $0x1b8] sm:$0xff] %vm264_vm3, %v2101_v62  ;;  %2294 = vst.msk [vmem:[#allocation2 + $0x3b8] sm:$0xff] %vm264_vm3, %v2165_v63  ;;  %v3864_v10 = vpack.c.bf16 %v2621_v4, %v2621_v4 }
 0x1ea   : > { %v2558_v7 = vadd.f32 %v5301_v27, %v2423_v3  ;;  %v3928_v11 = vpack.c.bf16 %v2685_v5, %v2685_v5  ;;  %v1759_v14 = vpop.f32.mrb[112].mxu0  ;;  %v2015_v15 = vpop.f32.mrb[112].mxu1 }
 0x1eb   : > { %v2622_v12 = vmax.f32 %v2494_v6, 0.0  ;;  %3262 = vst.msk [vmem:[%s4886_s18 + $0xd0] sm:$0xf] %vm3209_vm4, %v3864_v10  ;;  %v2102_v19 = vadd.f32 %v1759_v14, %v449_v8  ;;  %v2166_v21 = vadd.f32 %v2015_v15, %v513_v9  ;;  %v1761_v22 = vpop.f32.mrb[113].mxu0  ;;  %v2017_v23 = vpop.f32.mrb[113].mxu1  ;;  %v453_v9 = vld [vmem:[#allocation2 + $0x1e0] sm:$0xff] }
 0x1ec   : > { %v2686_v13 = vmax.f32 %v2558_v7, 0.0  ;;  %3326 = vst.msk [vmem:[%s4886_s18 + $0x1d0] sm:$0xf] %vm3209_vm4, %v3928_v11  ;;  %v2360_v24 = vld [vmem:[#allocation2 + $0x1b0] sm:$0xff]  ;;  %v1762_v26 = vpop.f32.mrb[114].mxu0  ;;  %v2018_v28 = vpop.f32.mrb[114].mxu1 }
 0x1ed   : > { %v3865_v17 = vpack.c.bf16 %v2622_v12, %v2622_v12  ;;  %v2424_v25 = vld [vmem:[#allocation2 + $0x3b0] sm:$0xff]  ;;  %v2495_v29 = vadd.f32 %v5301_v27, %v2360_v24  ;;  %2231 = vst.msk [vmem:[#allocation2 + $0x1c0] sm:$0xff] %vm264_vm3, %v2102_v19  ;;  %2295 = vst.msk [vmem:[#allocation2 + $0x3c0] sm:$0xff] %vm264_vm3, %v2166_v21  ;;  %v2103_v31 = vadd.f32 %v1762_v26, %v450_v16  ;;  %v1764_v33 = vpop.f32.mrb[115].mxu0  ;;  %v2020_v34 = vpop.f32.mrb[115].mxu1  ;;  %v517_v10 = vld [vmem:[#allocation2 + $0x3e0] sm:$0xff] }
 0x1ee   : > { %v3929_v18 = vpack.c.bf16 %v2686_v13, %v2686_v13  ;;  %v2559_v30 = vadd.f32 %v5301_v27, %v2424_v25  ;;  %v2167_v32 = vadd.f32 %v2018_v28, %v514_v52  ;;  %v454_v52 = vld [vmem:[#allocation2 + $0x1e8] sm:$0xff] }
 0x1ef   : > { %3263 = vst.msk [vmem:[%s4886_s18 + $0xd4] sm:$0xf] %vm3209_vm4, %v3865_v17  ;;  %v2623_v37 = vmax.f32 %v2495_v29, 0.0  ;;  %v518_v17 = vld [vmem:[#allocation2 + $0x3e8] sm:$0xff] }
 0x1f0   : > { %3327 = vst.msk [vmem:[%s4886_s18 + $0x1d4] sm:$0xf] %vm3209_vm4, %v3929_v18  ;;  %v2361_v35 = vld [vmem:[#allocation2 + $0x1b8] sm:$0xff]  ;;  %v2687_v38 = vmax.f32 %v2559_v30, 0.0 }
 0x1f1   : > { %v2425_v36 = vld [vmem:[#allocation2 + $0x3b8] sm:$0xff]  ;;  %v2496_v39 = vadd.f32 %v5301_v27, %v2361_v35  ;;  %2232 = vst.msk [vmem:[#allocation2 + $0x1c8] sm:$0xff] %vm264_vm3, %v2103_v31  ;;  %2296 = vst.msk [vmem:[#allocation2 + $0x3c8] sm:$0xff] %vm264_vm3, %v2167_v32  ;;  %v3866_v20 = vpack.c.bf16 %v2623_v37, %v2623_v37 }
 0x1f2   : > { %v2560_v40 = vadd.f32 %v5301_v27, %v2425_v36  ;;  %v3930_v43 = vpack.c.bf16 %v2687_v38, %v2687_v38  ;;  %v1767_v46 = vpop.f32.mrb[116].mxu0  ;;  %v2023_v47 = vpop.f32.mrb[116].mxu1 }
 0x1f3   : > { %v2624_v44 = vmax.f32 %v2496_v39, 0.0  ;;  %3264 = vst.msk [vmem:[%s4886_s18 + $0xd8] sm:$0xf] %vm3209_vm4, %v3866_v20  ;;  %v2104_v53 = vadd.f32 %v1767_v46, %v451_v41  ;;  %v2168_v54 = vadd.f32 %v2023_v47, %v515_v42  ;;  %v1769_v55 = vpop.f32.mrb[117].mxu0  ;;  %v2025_v56 = vpop.f32.mrb[117].mxu1  ;;  %v455_v42 = vld [vmem:[#allocation2 + $0x1f0] sm:$0xff] }
 0x1f4   : > { %v2688_v45 = vmax.f32 %v2560_v40, 0.0  ;;  %3328 = vst.msk [vmem:[%s4886_s18 + $0x1d8] sm:$0xf] %vm3209_vm4, %v3930_v43  ;;  %v2362_v57 = vld [vmem:[#allocation2 + $0x1c0] sm:$0xff]  ;;  %v1770_v59 = vpop.f32.mrb[118].mxu0  ;;  %v2026_v60 = vpop.f32.mrb[118].mxu1 }
 0x1f5   : > { %v3867_v50 = vpack.c.bf16 %v2624_v44, %v2624_v44  ;;  %v2426_v58 = vld [vmem:[#allocation2 + $0x3c0] sm:$0xff]  ;;  %v2497_v61 = vadd.f32 %v5301_v27, %v2362_v57  ;;  %2233 = vst.msk [vmem:[#allocation2 + $0x1d0] sm:$0xff] %vm264_vm3, %v2104_v53  ;;  %2297 = vst.msk [vmem:[#allocation2 + $0x3d0] sm:$0xff] %vm264_vm3, %v2168_v54  ;;  %v2105_v63 = vadd.f32 %v1770_v59, %v452_v48  ;;  %v1772_v1 = vpop.f32.mrb[119].mxu0  ;;  %v2028_v2 = vpop.f32.mrb[119].mxu1  ;;  %v519_v20 = vld [vmem:[#allocation2 + $0x3f0] sm:$0xff] }
 0x1f6   : > { %v3931_v51 = vpack.c.bf16 %v2688_v45, %v2688_v45  ;;  %v2561_v62 = vadd.f32 %v5301_v27, %v2426_v58  ;;  %v2169_v0 = vadd.f32 %v2026_v60, %v516_v49  ;;  %v456_v49 = vld [vmem:[#allocation2 + $0x1f8] sm:$0xff] }
 0x1f7   : > { %3265 = vst.msk [vmem:[%s4886_s18 + $0xdc] sm:$0xf] %vm3209_vm4, %v3867_v50  ;;  %v2625_v5 = vmax.f32 %v2497_v61, 0.0  ;;  %v520_v50 = vld [vmem:[#allocation2 + $0x3f8] sm:$0xff] }
 0x1f8   : > { %3329 = vst.msk [vmem:[%s4886_s18 + $0x1dc] sm:$0xf] %vm3209_vm4, %v3931_v51  ;;  %v2363_v3 = vld [vmem:[#allocation2 + $0x1c8] sm:$0xff]  ;;  %v2689_v6 = vmax.f32 %v2561_v62, 0.0 }
 0x1f9   : > { %v2427_v4 = vld [vmem:[#allocation2 + $0x3c8] sm:$0xff]  ;;  %v2498_v7 = vadd.f32 %v5301_v27, %v2363_v3  ;;  %2234 = vst.msk [vmem:[#allocation2 + $0x1d8] sm:$0xff] %vm264_vm3, %v2105_v63  ;;  %2298 = vst.msk [vmem:[#allocation2 + $0x3d8] sm:$0xff] %vm264_vm3, %v2169_v0  ;;  %v3868_v11 = vpack.c.bf16 %v2625_v5, %v2625_v5 }
 0x1fa   : > { %v2562_v8 = vadd.f32 %v5301_v27, %v2427_v4  ;;  %v3932_v12 = vpack.c.bf16 %v2689_v6, %v2689_v6  ;;  %v1775_v15 = vpop.f32.mrb[120].mxu0  ;;  %v2031_v16 = vpop.f32.mrb[120].mxu1 }
 0x1fb   : > { %v2626_v13 = vmax.f32 %v2498_v7, 0.0  ;;  %3266 = vst.msk [vmem:[%s4886_s18 + $0xe0] sm:$0xf] %vm3209_vm4, %v3868_v11  ;;  %v2106_v21 = vadd.f32 %v1775_v15, %v453_v9  ;;  %v2170_v22 = vadd.f32 %v2031_v16, %v517_v10  ;;  %v1777_v23 = vpop.f32.mrb[121].mxu0  ;;  %v2033_v24 = vpop.f32.mrb[121].mxu1 }
 0x1fc   : > { %v2690_v14 = vmax.f32 %v2562_v8, 0.0  ;;  %3330 = vst.msk [vmem:[%s4886_s18 + $0x1e0] sm:$0xf] %vm3209_vm4, %v3932_v12  ;;  %v2364_v25 = vld [vmem:[#allocation2 + $0x1d0] sm:$0xff]  ;;  %v1778_v28 = vpop.f32.mrb[122].mxu0  ;;  %v2034_v29 = vpop.f32.mrb[122].mxu1 }
 0x1fd   : > { %v3869_v18 = vpack.c.bf16 %v2626_v13, %v2626_v13  ;;  %v2428_v26 = vld [vmem:[#allocation2 + $0x3d0] sm:$0xff]  ;;  %v2499_v30 = vadd.f32 %v5301_v27, %v2364_v25  ;;  %2235 = vst.msk [vmem:[#allocation2 + $0x1e0] sm:$0xff] %vm264_vm3, %v2106_v21  ;;  %2299 = vst.msk [vmem:[#allocation2 + $0x3e0] sm:$0xff] %vm264_vm3, %v2170_v22  ;;  %v2107_v32 = vadd.f32 %v1778_v28, %v454_v52  ;;  %v1780_v34 = vpop.f32.mrb[123].mxu0  ;;  %v2036_v35 = vpop.f32.mrb[123].mxu1 }
 0x1fe   : > { %v3933_v19 = vpack.c.bf16 %v2690_v14, %v2690_v14  ;;  %v2563_v31 = vadd.f32 %v5301_v27, %v2428_v26  ;;  %v2171_v33 = vadd.f32 %v2034_v29, %v518_v17 }
 0x1ff   : > { %3267 = vst.msk [vmem:[%s4886_s18 + $0xe4] sm:$0xf] %vm3209_vm4, %v3869_v18  ;;  %v2627_v38 = vmax.f32 %v2499_v30, 0.0 }
 0x200   : > { %3331 = vst.msk [vmem:[%s4886_s18 + $0x1e4] sm:$0xf] %vm3209_vm4, %v3933_v19  ;;  %v2365_v36 = vld [vmem:[#allocation2 + $0x1d8] sm:$0xff]  ;;  %v2691_v39 = vmax.f32 %v2563_v31, 0.0 }
 0x201   : > { %v2429_v37 = vld [vmem:[#allocation2 + $0x3d8] sm:$0xff]  ;;  %v2500_v40 = vadd.f32 %v5301_v27, %v2365_v36  ;;  %2236 = vst.msk [vmem:[#allocation2 + $0x1e8] sm:$0xff] %vm264_vm3, %v2107_v32  ;;  %2300 = vst.msk [vmem:[#allocation2 + $0x3e8] sm:$0xff] %vm264_vm3, %v2171_v33  ;;  %v3870_v43 = vpack.c.bf16 %v2627_v38, %v2627_v38 }
 0x202   : > { %v2564_v41 = vadd.f32 %v5301_v27, %v2429_v37  ;;  %v3934_v44 = vpack.c.bf16 %v2691_v39, %v2691_v39  ;;  %v1783_v47 = vpop.f32.mrb[124].mxu0  ;;  %v2039_v48 = vpop.f32.mrb[124].mxu1 }
 0x203   : > { %v2628_v45 = vmax.f32 %v2500_v40, 0.0  ;;  %3268 = vst.msk [vmem:[%s4886_s18 + $0xe8] sm:$0xf] %vm3209_vm4, %v3870_v43  ;;  %v2108_v54 = vadd.f32 %v1783_v47, %v455_v42  ;;  %v2172_v55 = vadd.f32 %v2039_v48, %v519_v20  ;;  %v1785_v56 = vpop.f32.mrb[125].mxu0  ;;  %v2041_v57 = vpop.f32.mrb[125].mxu1 }
 0x204   : > { %v2692_v46 = vmax.f32 %v2564_v41, 0.0  ;;  %3332 = vst.msk [vmem:[%s4886_s18 + $0x1e8] sm:$0xf] %vm3209_vm4, %v3934_v44  ;;  %v2366_v58 = vld [vmem:[#allocation2 + $0x1e0] sm:$0xff]  ;;  %v1786_v60 = vpop.f32.mrb[126].mxu0  ;;  %v2042_v61 = vpop.f32.mrb[126].mxu1 }
 0x205   : > { %v3871_v51 = vpack.c.bf16 %v2628_v45, %v2628_v45  ;;  %v2430_v59 = vld [vmem:[#allocation2 + $0x3e0] sm:$0xff]  ;;  %v2501_v62 = vadd.f32 %v5301_v27, %v2366_v58  ;;  %2237 = vst.msk [vmem:[#allocation2 + $0x1f0] sm:$0xff] %vm264_vm3, %v2108_v54  ;;  %2301 = vst.msk [vmem:[#allocation2 + $0x3f0] sm:$0xff] %vm264_vm3, %v2172_v55  ;;  %v2109_v0 = vadd.f32 %v1786_v60, %v456_v49  ;;  %v1788_v2 = vpop.f32.mrb[127].mxu0  ;;  %v2044_v3 = vpop.f32.mrb[127].mxu1 }
 0x206   : > { %v3935_v53 = vpack.c.bf16 %v2692_v46, %v2692_v46  ;;  %v2565_v63 = vadd.f32 %v5301_v27, %v2430_v59  ;;  %v2173_v1 = vadd.f32 %v2042_v61, %v520_v50 }
 0x207   : > { %3269 = vst.msk [vmem:[%s4886_s18 + $0xec] sm:$0xf] %vm3209_vm4, %v3871_v51  ;;  %v2629_v6 = vmax.f32 %v2501_v62, 0.0 }
 0x208   : > { %3333 = vst.msk [vmem:[%s4886_s18 + $0x1ec] sm:$0xf] %vm3209_vm4, %v3935_v53  ;;  %v2367_v4 = vld [vmem:[#allocation2 + $0x1e8] sm:$0xff]  ;;  %v2693_v7 = vmax.f32 %v2565_v63, 0.0 }
 0x209   : > { %v2431_v5 = vld [vmem:[#allocation2 + $0x3e8] sm:$0xff]  ;;  %v2502_v8 = vadd.f32 %v5301_v27, %v2367_v4  ;;  %2238 = vst.msk [vmem:[#allocation2 + $0x1f8] sm:$0xff] %vm264_vm3, %v2109_v0  ;;  %2302 = vst.msk [vmem:[#allocation2 + $0x3f8] sm:$0xff] %vm264_vm3, %v2173_v1  ;;  %v3872_v10 = vpack.c.bf16 %v2629_v6, %v2629_v6 }
 0x20a   : > { %v2566_v9 = vadd.f32 %v5301_v27, %v2431_v5  ;;  %v3936_v11 = vpack.c.bf16 %v2693_v7, %v2693_v7 }
 0x20b   : > { %v2630_v12 = vmax.f32 %v2502_v8, 0.0  ;;  %3270 = vst.msk [vmem:[%s4886_s18 + $0xf0] sm:$0xf] %vm3209_vm4, %v3872_v10 }
 0x20c   : > { %v2694_v13 = vmax.f32 %v2566_v9, 0.0  ;;  %3334 = vst.msk [vmem:[%s4886_s18 + $0x1f0] sm:$0xf] %vm3209_vm4, %v3936_v11  ;;  %v2368_v16 = vld [vmem:[#allocation2 + $0x1f0] sm:$0xff] }
 0x20d   : > { %v3873_v14 = vpack.c.bf16 %v2630_v12, %v2630_v12  ;;  %v2432_v52 = vld [vmem:[#allocation2 + $0x3f0] sm:$0xff]  ;;  %v2503_v17 = vadd.f32 %v5301_v27, %v2368_v16 }
 0x20e   : > { %v3937_v15 = vpack.c.bf16 %v2694_v13, %v2694_v13  ;;  %v2567_v18 = vadd.f32 %v5301_v27, %v2432_v52 }
 0x20f   : > { %3271 = vst.msk [vmem:[%s4886_s18 + $0xf4] sm:$0xf] %vm3209_vm4, %v3873_v14  ;;  %v2631_v22 = vmax.f32 %v2503_v17, 0.0 }
 0x210   : > { %3335 = vst.msk [vmem:[%s4886_s18 + $0x1f4] sm:$0xf] %vm3209_vm4, %v3937_v15  ;;  %v2369_v19 = vld [vmem:[#allocation2 + $0x1f8] sm:$0xff]  ;;  %v2695_v23 = vmax.f32 %v2567_v18, 0.0 }
 0x211   : > { %v2433_v21 = vld [vmem:[#allocation2 + $0x3f8] sm:$0xff]  ;;  %v2504_v24 = vadd.f32 %v5301_v27, %v2369_v19  ;;  %v3874_v26 = vpack.c.bf16 %v2631_v22, %v2631_v22 }
 0x212   : > { %v2568_v25 = vadd.f32 %v5301_v27, %v2433_v21  ;;  %v3938_v28 = vpack.c.bf16 %v2695_v23, %v2695_v23 }
 0x213   : > { %v2632_v29 = vmax.f32 %v2504_v24, 0.0  ;;  %3272 = vst.msk [vmem:[%s4886_s18 + $0xf8] sm:$0xf] %vm3209_vm4, %v3874_v26 }
 0x214   : > { %v2696_v30 = vmax.f32 %v2568_v25, 0.0  ;;  %3336 = vst.msk [vmem:[%s4886_s18 + $0x1f8] sm:$0xf] %vm3209_vm4, %v3938_v28 }
 0x215   : > { %v3875_v27 = vpack.c.bf16 %v2632_v29, %v2632_v29 }
 0x216   : > { %v3939_v31 = vpack.c.bf16 %v2696_v30, %v2696_v30 }
 0x217   : > { %3273 = vst.msk [vmem:[%s4886_s18 + $0xfc] sm:$0xf] %vm3209_vm4, %v3875_v27 }
 0x218   : > { %3337 = vst.msk [vmem:[%s4886_s18 + $0x1fc] sm:$0xf] %vm3209_vm4, %v3939_v31 }
 0x219   : > { %4238 = shalt.err (!%p4235_p5)
}
 0x21a   : > { %s4239_s7 = scalar_lea.hbm %s5408_s30, 8192  ;;  %s4243_s18 = scalar_lea.hbm %s5471_s3, 16384 }
 0x21b   : > { %p4240_p6 = scmp.ne.s32.totalorder %s5408_s30, %s4239_s7  ;;  %p4244_p10 = scmp.lt.u32.totalorder %s5408_s30, %s5471_s3 }
 0x21c   : > { %p4245_p11 = scmp.lt.u32.totalorder %s4243_s18, %s4239_s7  ;;  %p4247_p13 = scmp.lt.u32.totalorder %s4239_s7, %s5408_s30 }
 0x21d   : > { %p4241_p7 = pnand %p4240_p6, %p4371_p4 }
 0x21e   : > { %p4246_p12 = por %p4245_p11, %p4244_p10 }
 0x21f   : > { %p4242_p9 = pneg %p4241_p7 }
 0x220   : > { %p4248_p0 = por %p4247_p13, %p4246_p12 }
 0x222   : > { %p4249_p1 = pnand %p4248_p0, %p4242_p9 }
 0x224   : > { %4252 = shalt.err (!%p4249_p1)
}
 0x225   : > { %s4309_s21 = smov 64   ;;  %s4310_s23 = smov 4  }
 0x226   : > { %3961 = dma.vmem_to_hbm [thread:$0]  (%p4371_p4), %s5410_s27, 8192, %s5408_s30, %s5422_s15, %s4309_s21, %s4309_s21, %s4310_s23  }
 0x227 PF: > { %p3967_p2 = scmp.ge.s32.totalorder %s4303_s17, 2  ;;  %s3368_s26 = sand.u32 1, %s4283_s12  }
 0x228   : > { %s3369_s28 = scalar_lea.sflag [#allocation4], %s3368_s26 }
 0x229   : > { %p3964_p3 = pnand %p3967_p2, %p4378_p8 }
 0x22b   : > { %4278 = dma.done.wait (!%p3964_p3), %s3369_s28, 8192  }
 0x22c   : > { %4280 = vsyncadd (!%p3964_p3), %s3369_s28, 4294959104  ;;  %s16_s17 = sadd.s32 1, %s4303_s17   ;;  %s5474_s12 = smov %s4287_s13 }
 0x22d   : > { %p13_p5 = scmp.ge.s32.totalorder %s16_s17, 4   ;;  %s5475_s13 = smov %s4291_s14 }
 0x22e   : > { %s5476_s14 = smov %s4384_s25  ;;  %s5477_s15 = smov %s4299_s16 }
 0x22f   : > { %s5478_s16 = smov %s5480_s20  ;;  %15 = sbr.rel (!%p13_p5) target bundleno = 4 (0x4), region = 81 }
 0x236   :  { %3374 = vsyncpa [#allocation4], 1 }
 0x237   :  { %3376 = vsyncpa [#allocation4 + $0x1], 1 }

</bundles_post_ra>
